<compile_context>
chip_gen: v7x
topology: tpu7x:2x2x1
jax: 0.10.0
libtpu: 0.0.40
codegen_flags: <defaults>
</compile_context>

<pallas_src>
import functools

import jax
import jax.numpy as jnp
from jax.experimental import pallas as pl
from jax.experimental.pallas import tpu as pltpu


VOCAB = 32
EMBED = 16
HIDDEN = 32          # GRU hidden size (FiLMGen)
NUM_MODULES = 2      # number of FiLMed ResBlocks
MODULE_DIM = 16      # channels inside FiLMedNet
CLS_PROJ = 32        # classifier conv projection dim
FC_DIM = 32          # classifier FC dim
NUM_ANSWERS = 10
LANE = 128           # lane-padded output width


# -----------------------------------------------------------------------------
# One fused kernel: GRU question encoder -> FiLMed CNN executor -> answer scores
# Feature maps live lane-dense as (B*H, W*C); 3x3 convs = 3 pltpu.roll'ed rows x
# band-structured (W*C, W*D) weights (horizontal taps folded into the bands).
# -----------------------------------------------------------------------------

def film_kernel(x_q_ref, mask_ref,
                wih_ref, whh_ref, bih_ref, bhh_ref, decw_ref, decb_ref,
                x_img_ref, vmask_up_ref, vmask_dn_ref,
                b_expand_ref, p_tile_ref, avg_sum_ref,
                stem_w_ref, stem_b_ref,
                c1w_ref, c1b_ref, c2w_ref, c2b_ref,
                clsw_ref, clsb_ref, fc1w_ref, fc1b_ref, fc2w_ref, fc2b_ref,
                o_ref, *, seq_len, batch, height, width):
    f32 = jnp.float32
    bf16 = jnp.bfloat16
    hid = HIDDEN
    d = MODULE_DIM
    bh = batch * height
    wd = width * d

    # ---------------- FiLMGen: hoisted input projection + unrolled masked GRU --
    gi_all = (jnp.dot(x_q_ref[...], wih_ref[...], preferred_element_type=f32)
              + bih_ref[...])                                   # (T*B, 3H), stays a value
    whh = whh_ref[...]
    bhh = bhh_ref[...]
    h = jnp.zeros((batch, hid), f32)
    for t in range(seq_len):                                    # short static unroll
        gi = gi_all[t * batch:(t + 1) * batch, :]               # value slice (no VMEM trip)
        gh = jnp.dot(h.astype(bf16), whh, preferred_element_type=f32) + bhh
        i_r, i_z, i_n = gi[:, :hid], gi[:, hid:2 * hid], gi[:, 2 * hid:]
        h_r, h_z, h_n = gh[:, :hid], gh[:, hid:2 * hid], gh[:, 2 * hid:]
        r = jax.nn.sigmoid(i_r + h_r)
        z = jax.nn.sigmoid(i_z + h_z)
        n = jnp.tanh(i_n + r * h_n)
        h_new = (1.0 - z) * n + z * h
        m_t = mask_ref[t]                                       # (B, 1) precomputed mask
        h = m_t * h_new + (1.0 - m_t) * h
    cond = (jnp.dot(h.astype(bf16), decw_ref[...], preferred_element_type=f32)
            + decb_ref[...])                                    # (B, 2*M*D)

    # ---------------- FiLMedNet --------------------------------------------------
    m_up = vmask_up_ref[...]      # (B*H, 1): 0 where the ky=-1 tap leaves the image
    m_dn = vmask_dn_ref[...]      # (B*H, 1): 0 where the ky=+1 tap leaves the image
    b_expand = b_expand_ref[...]  # (B*H, B) one-hot: row -> image
    p_tile = p_tile_ref[...]      # (D, W*D): tile a channel row across W pixel groups
    avg_sum = avg_sum_ref[...]    # (W*D, D): sum the W pixel groups per channel

    def conv3x3(x, weight_for, bias_row):
        """3x3 'same' conv in the (B*H, W*Cin) layout.

        Vertical taps via pltpu.roll (sublane rotate) + in-image row masks; horizontal
        taps and W-boundary zeros are folded into the band weights."""
        acc = jnp.dot(x.astype(bf16), weight_for(1), preferred_element_type=f32)
        up = pltpu.roll(x, shift=1, axis=0) * m_up              # xs[r] = x[r-1]
        acc = acc + jnp.dot(up.astype(bf16), weight_for(0), preferred_element_type=f32)
        dn = pltpu.roll(x, shift=bh - 1, axis=0) * m_dn         # xs[r] = x[r+1]
        acc = acc + jnp.dot(dn.astype(bf16), weight_for(2), preferred_element_type=f32)
        return acc + bias_row

    # stem: 3x3 conv + ReLU
    x = conv3x3(x_img_ref[...], lambda k: stem_w_ref[k], stem_b_ref[...])
    x = jnp.maximum(x, 0.0)                                     # (B*H, W*D)

    for m in range(NUM_MODULES):
        res = x
        # FiLM coefficient maps for this module: two tiny one-hot matmuls (batch-independent).
        g_m = cond[:, (2 * m) * d:(2 * m + 1) * d] + 1.0        # gamma baseline shift
        b_m = cond[:, (2 * m + 1) * d:(2 * m + 2) * d]
        g_map = jnp.dot(jnp.dot(b_expand, g_m, preferred_element_type=f32), p_tile,
                        preferred_element_type=f32)             # (B*H, W*D)
        b_map = jnp.dot(jnp.dot(b_expand, b_m, preferred_element_type=f32), p_tile,
                        preferred_element_type=f32)
        # 1x1 conv + ReLU (block-diagonal matmul in the lane-dense layout)
        h1 = jnp.dot(x.astype(bf16), c1w_ref[m], preferred_element_type=f32)
        h1 = jnp.maximum(h1 + c1b_ref[m:m + 1, :], 0.0)
        # 3x3 conv
        h2 = conv3x3(h1, lambda k, _m=m: c2w_ref[_m * 3 + k], c2b_ref[m:m + 1, :])
        # BatchNorm(affine=False) with batch statistics, per channel
        inv_n = 1.0 / (bh * width)
        rs = jnp.sum(h2, axis=0, keepdims=True)                 # (1, W*D) sublane reduce
        rs2 = jnp.sum(h2 * h2, axis=0, keepdims=True)
        mu_c = jnp.dot(rs, avg_sum, preferred_element_type=f32) * inv_n     # (1, D)
        ex2_c = jnp.dot(rs2, avg_sum, preferred_element_type=f32) * inv_n
        var_c = jnp.maximum(ex2_c - mu_c * mu_c, 0.0)           # clamp: cancellation guard
        inv_std_c = jax.lax.rsqrt(var_c + 1e-5)
        mu = jnp.dot(mu_c, p_tile, preferred_element_type=f32)              # retile (1, W*D)
        inv_std = jnp.dot(inv_std_c, p_tile, preferred_element_type=f32)
        xn = (h2 - mu) * inv_std
        # FiLM + ReLU + residual
        x = jnp.maximum(g_map * xn + b_map, 0.0) + res

    # classifier: 1x1 conv + ReLU
    proj = jnp.dot(x.astype(bf16), clsw_ref[...], preferred_element_type=f32) + clsb_ref[...]
    proj = jnp.maximum(proj, 0.0)                               # (B*H, W*P)
    # global max-pool over W via an aligned lane-halving tree ...
    cur = width * CLS_PROJ
    while cur > CLS_PROJ:
        half = cur // 2
        proj = jnp.maximum(proj[:, :half], proj[:, half:cur])
        cur = half
    # ... and over H via one sublane-split reshape + reduce.
    pooled = jnp.max(proj.reshape(batch, height, CLS_PROJ), axis=1)          # (B, P)

    # FC head (fc2 weights pre-padded to 128 lanes -> lane-dense output store)
    hcls = jnp.maximum(
        jnp.dot(pooled.astype(bf16), fc1w_ref[...], preferred_element_type=f32)
        + fc1b_ref[...], 0.0)
    scores = jnp.dot(hcls.astype(bf16), fc2w_ref[...], preferred_element_type=f32) + fc2b_ref[...]
    o_ref[...] = scores.astype(o_ref.dtype)


def film_forward(params, questions, feats, question_lens):
    batch, seq = questions.shape

    # --- FiLMGen inputs ---------------------------------------------------------
    # TODO(synk): embedding gather stays in plain JAX (tiny; no clean tiled Pallas gather here).
    emb = jnp.take(params["embed_w"], questions, axis=0)                     # (B, T, E)
    x_q = jnp.transpose(emb, (1, 0, 2)).reshape(seq * batch, EMBED).astype(jnp.bfloat16)
    t_idx = jnp.arange(seq, dtype=jnp.int32)
    step_mask = (t_idx[:, None] < question_lens.astype(jnp.int32)[None, :]
                 ).astype(jnp.float32)[:, :, None]                           # (T, B, 1)

    # --- FiLMedNet inputs: NCHW -> NHWC -> lane-dense (B*H, W*C) -----------------
    x = jnp.transpose(feats, (0, 2, 3, 1)).astype(jnp.float32)
    _, height, width, cin = x.shape
    assert width & (width - 1) == 0, "max-pool lane tree assumes power-of-two W"
    x2d = x.reshape(batch * height, width * cin)

    # Structural constants: built in the wrapper (constant-folded), not in the kernel.
    bh = batch * height
    rows = jnp.arange(bh, dtype=jnp.int32)
    vmask_up = (rows % height != 0).astype(jnp.float32)[:, None]             # ky = -1 valid
    vmask_dn = (rows % height != height - 1).astype(jnp.float32)[:, None]    # ky = +1 valid
    b_expand = (rows[:, None] // height ==
                jnp.arange(batch, dtype=jnp.int32)[None, :]).astype(jnp.float32)   # (B*H, B)
    eye_d = jnp.eye(MODULE_DIM, dtype=jnp.float32)
    p_tile = jnp.tile(eye_d, (1, width))                                     # (D, W*D)
    avg_sum = jnp.tile(eye_d, (width, 1))                                    # (W*D, D)

    operands = (x_q, step_mask,
                params["wih"], params["whh"], params["bih"], params["bhh"],
                params["dec_w"], params["dec_b"],
                x2d, vmask_up, vmask_dn, b_expand, p_tile, avg_sum,
                params["stem_w"], params["stem_b"],
                params["conv1_w"], params["conv1_b"],
                params["conv2_w"], params["conv2_b"],
                params["cls_conv_w"], params["cls_conv_b"],
                params["fc1_w"], params["fc1_b"],
                params["fc2_w"], params["fc2_b"])

    n_cond = 2 * NUM_MODULES * MODULE_DIM
    pix = batch * height * width
    flops = 2 * (seq * batch * EMBED * 3 * HIDDEN
                 + seq * batch * HIDDEN * 3 * HIDDEN
                 + batch * HIDDEN * n_cond
                 + pix * (9 * cin * MODULE_DIM
                          + NUM_MODULES * (MODULE_DIM * MODULE_DIM
                                           + 9 * MODULE_DIM * MODULE_DIM)
                          + MODULE_DIM * CLS_PROJ)
                 + batch * (CLS_PROJ * FC_DIM + FC_DIM * LANE))
    bytes_acc = (sum(int(a.size) * a.dtype.itemsize for a in operands)
                 + batch * LANE * 4)

    scores_padded = pl.pallas_call(
        functools.partial(film_kernel, seq_len=seq, batch=batch,
                          height=height, width=width),
        out_shape=jax.ShapeDtypeStruct((batch, LANE), jnp.float32),
        compiler_params=pltpu.CompilerParams(vmem_limit_bytes=32 * 1024 * 1024),
        cost_estimate=pl.CostEstimate(
            flops=int(flops),
            transcendentals=seq * batch * 3 * HIDDEN + NUM_MODULES * MODULE_DIM,
            bytes_accessed=int(bytes_acc)),
    )(*operands)
    return scores_padded[:, :NUM_ANSWERS]


# -----------------------------------------------------------------------------
# Parameters (synthetic, deterministic, pre-expanded to kernel-ready layouts)
# -----------------------------------------------------------------------------

def init_params(key, c_in, spatial_w):
    def nrm(k, shape, scale=0.1):
        return scale * jax.random.normal(k, shape, jnp.float32)

    w = spatial_w
    d = MODULE_DIM
    eye_w = jnp.eye(w, dtype=jnp.float32)

    def block_diag(mat):                       # (C, Dout) -> (W*C, W*Dout), 1x1 conv
        return jnp.kron(eye_w, mat)

    def band3x3(w9):                           # (3,3,C,Dout) -> (3, W*C, W*Dout); k <-> ky=k-1
        mats = []
        for ky in (-1, 0, 1):
            m = sum(jnp.kron(jnp.eye(w, k=-kx, dtype=jnp.float32), w9[ky + 1, kx + 1])
                    for kx in (-1, 0, 1))
            mats.append(m)
        return jnp.stack(mats)

    def tile_bias(vec):                        # (Dout,) -> (1, W*Dout)
        return jnp.tile(vec, w).reshape(1, -1)

    keys = jax.random.split(key, 24)
    ki = iter(keys)
    p = {}
    # FiLMGen (matmul weights stored bf16, biases f32)
    p["embed_w"] = nrm(next(ki), (VOCAB, EMBED))
    p["wih"] = nrm(next(ki), (EMBED, 3 * HIDDEN)).astype(jnp.bfloat16)
    p["whh"] = nrm(next(ki), (HIDDEN, 3 * HIDDEN)).astype(jnp.bfloat16)
    p["bih"] = nrm(next(ki), (1, 3 * HIDDEN))
    p["bhh"] = nrm(next(ki), (1, 3 * HIDDEN))
    p["dec_w"] = nrm(next(ki), (HIDDEN, 2 * NUM_MODULES * MODULE_DIM)).astype(jnp.bfloat16)
    p["dec_b"] = nrm(next(ki), (1, 2 * NUM_MODULES * MODULE_DIM))
    # FiLMedNet stem (3x3 conv), band-expanded once here
    p["stem_w"] = band3x3(nrm(next(ki), (3, 3, c_in, d))).astype(jnp.bfloat16)
    p["stem_b"] = tile_bias(nrm(next(ki), (d,)))
    # FiLMed ResBlocks
    c1w, c1b, c2w, c2b = [], [], [], []
    for _ in range(NUM_MODULES):
        c1w.append(block_diag(nrm(next(ki), (d, d))))
        c1b.append(tile_bias(nrm(next(ki), (d,))))
        c2w.append(band3x3(nrm(next(ki), (3, 3, d, d))))
        c2b.append(tile_bias(nrm(next(ki), (d,))))
    p["conv1_w"] = jnp.stack(c1w).astype(jnp.bfloat16)                 # (M, W*D, W*D)
    p["conv1_b"] = jnp.concatenate(c1b, axis=0)                        # (M, W*D)
    p["conv2_w"] = jnp.concatenate(c2w, axis=0).astype(jnp.bfloat16)   # (M*3, W*D, W*D)
    p["conv2_b"] = jnp.concatenate(c2b, axis=0)                        # (M, W*D)
    # Classifier
    p["cls_conv_w"] = block_diag(nrm(next(ki), (d, CLS_PROJ))).astype(jnp.bfloat16)
    p["cls_conv_b"] = tile_bias(nrm(next(ki), (CLS_PROJ,)))
    p["fc1_w"] = nrm(next(ki), (CLS_PROJ, FC_DIM)).astype(jnp.bfloat16)
    p["fc1_b"] = nrm(next(ki), (1, FC_DIM))
    # fc2 padded to 128 lanes (zeros beyond NUM_ANSWERS) for a lane-dense output store
    fc2w = nrm(next(ki), (FC_DIM, NUM_ANSWERS))
    fc2b = nrm(next(ki), (1, NUM_ANSWERS))
    p["fc2_w"] = (jnp.zeros((FC_DIM, LANE), jnp.float32)
                  .at[:, :NUM_ANSWERS].set(fc2w).astype(jnp.bfloat16))
    p["fc2_b"] = jnp.zeros((1, LANE), jnp.float32).at[:, :NUM_ANSWERS].set(fc2b)
    return p


# -----------------------------------------------------------------------------
# Main
# -----------------------------------------------------------------------------

if __name__ == "__main__":
    key = jax.random.PRNGKey(0)
    k_param, k_q, k_f = jax.random.split(key, 3)

    B, T = 2, 8
    C_IN, SP = 4, 8

    params = init_params(k_param, C_IN, SP)

    questions = jax.random.randint(k_q, (B, T), 0, VOCAB, dtype=jnp.int32)
    question_lens = jnp.array([5, 8], dtype=jnp.int32)
    feats = jax.random.normal(k_f, (B, C_IN, SP, SP), jnp.float32)   # NCHW like PyTorch

    fwd = jax.jit(film_forward)
    scores = jax.block_until_ready(fwd(params, questions, feats, question_lens))

    assert scores.shape == (B, NUM_ANSWERS), scores.shape
    assert bool(jnp.all(jnp.isfinite(scores)))
    print("KERNEL_OK")
</pallas_src>

<mosaic_0001>
module attributes {stable_mosaic.version = 11 : i64} {
  func.func @film_kernel(%arg0: memref<16x16xbf16, #tpu.memory_space<vmem>>, %arg1: memref<8x2x1xf32, #tpu.memory_space<vmem>>, %arg2: memref<16x96xbf16, #tpu.memory_space<vmem>>, %arg3: memref<32x96xbf16, #tpu.memory_space<vmem>>, %arg4: memref<1x96xf32, #tpu.memory_space<vmem>>, %arg5: memref<1x96xf32, #tpu.memory_space<vmem>>, %arg6: memref<32x64xbf16, #tpu.memory_space<vmem>>, %arg7: memref<1x64xf32, #tpu.memory_space<vmem>>, %arg8: memref<16x32xf32, #tpu.memory_space<vmem>>, %arg9: memref<16x1xf32, #tpu.memory_space<vmem>>, %arg10: memref<16x1xf32, #tpu.memory_space<vmem>>, %arg11: memref<16x2xf32, #tpu.memory_space<vmem>>, %arg12: memref<16x128xf32, #tpu.memory_space<vmem>>, %arg13: memref<128x16xf32, #tpu.memory_space<vmem>>, %arg14: memref<3x32x128xbf16, #tpu.memory_space<vmem>>, %arg15: memref<1x128xf32, #tpu.memory_space<vmem>>, %arg16: memref<2x128x128xbf16, #tpu.memory_space<vmem>>, %arg17: memref<2x128xf32, #tpu.memory_space<vmem>>, %arg18: memref<6x128x128xbf16, #tpu.memory_space<vmem>>, %arg19: memref<2x128xf32, #tpu.memory_space<vmem>>, %arg20: memref<128x256xbf16, #tpu.memory_space<vmem>>, %arg21: memref<1x256xf32, #tpu.memory_space<vmem>>, %arg22: memref<32x32xbf16, #tpu.memory_space<vmem>>, %arg23: memref<1x32xf32, #tpu.memory_space<vmem>>, %arg24: memref<32x128xbf16, #tpu.memory_space<vmem>>, %arg25: memref<1x128xf32, #tpu.memory_space<vmem>>, %arg26: memref<2x128xf32, #tpu.memory_space<vmem>>) attributes {dimension_semantics = [], scalar_prefetch = 0 : i64, scratch_operands = 0 : i64, tpu.core_type = #tpu.core_type<tc>} {
    %c0 = arith.constant 0 : index
    %c0_0 = arith.constant 0 : index
    %0 = vector.load %arg0[%c0, %c0_0] : memref<16x16xbf16, #tpu.memory_space<vmem>>, vector<16x16xbf16>
    %c0_1 = arith.constant 0 : index
    %c0_2 = arith.constant 0 : index
    %1 = vector.load %arg2[%c0_1, %c0_2] : memref<16x96xbf16, #tpu.memory_space<vmem>>, vector<16x96xbf16>
    %cst = arith.constant dense<0.000000e+00> : vector<16x96xf32>
    %2 = tpu.matmul %0, %1, %cst {dimension_numbers = #tpu.dot_dimension_numbers<[1], [0], [0], [1], [0, 0, 1, 1], [], []>} : vector<16x16xbf16>, vector<16x96xbf16>, vector<16x96xf32> -> vector<16x96xf32>
    %c0_3 = arith.constant 0 : index
    %c0_4 = arith.constant 0 : index
    %3 = vector.load %arg4[%c0_3, %c0_4] : memref<1x96xf32, #tpu.memory_space<vmem>>, vector<1x96xf32>
    %4 = vector.broadcast %3 : vector<1x96xf32> to vector<16x96xf32>
    %5 = arith.addf %2, %4 : vector<16x96xf32>
    %c0_5 = arith.constant 0 : index
    %c0_6 = arith.constant 0 : index
    %6 = vector.load %arg3[%c0_5, %c0_6] : memref<32x96xbf16, #tpu.memory_space<vmem>>, vector<32x96xbf16>
    %c0_7 = arith.constant 0 : index
    %c0_8 = arith.constant 0 : index
    %7 = vector.load %arg5[%c0_7, %c0_8] : memref<1x96xf32, #tpu.memory_space<vmem>>, vector<1x96xf32>
    %cst_9 = arith.constant 0.000000e+00 : f32
    %8 = vector.broadcast %cst_9 : f32 to vector<2x32xf32>
    %9 = vector.extract_strided_slice %5 {offsets = [0, 0], sizes = [2, 96], strides = [1, 1]} : vector<16x96xf32> to vector<2x96xf32>
    %10 = arith.truncf %8 : vector<2x32xf32> to vector<2x32xbf16>
    %cst_10 = arith.constant dense<0.000000e+00> : vector<2x96xf32>
    %11 = tpu.matmul %10, %6, %cst_10 {dimension_numbers = #tpu.dot_dimension_numbers<[1], [0], [0], [1], [0, 0, 1, 1], [], []>} : vector<2x32xbf16>, vector<32x96xbf16>, vector<2x96xf32> -> vector<2x96xf32>
    %12 = vector.broadcast %7 : vector<1x96xf32> to vector<2x96xf32>
    %13 = arith.addf %11, %12 : vector<2x96xf32>
    %14 = vector.extract_strided_slice %9 {offsets = [0, 0], sizes = [2, 32], strides = [1, 1]} : vector<2x96xf32> to vector<2x32xf32>
    %15 = vector.extract_strided_slice %9 {offsets = [0, 32], sizes = [2, 32], strides = [1, 1]} : vector<2x96xf32> to vector<2x32xf32>
    %16 = vector.extract_strided_slice %9 {offsets = [0, 64], sizes = [2, 32], strides = [1, 1]} : vector<2x96xf32> to vector<2x32xf32>
    %17 = vector.extract_strided_slice %13 {offsets = [0, 0], sizes = [2, 32], strides = [1, 1]} : vector<2x96xf32> to vector<2x32xf32>
    %18 = vector.extract_strided_slice %13 {offsets = [0, 32], sizes = [2, 32], strides = [1, 1]} : vector<2x96xf32> to vector<2x32xf32>
    %19 = vector.extract_strided_slice %13 {offsets = [0, 64], sizes = [2, 32], strides = [1, 1]} : vector<2x96xf32> to vector<2x32xf32>
    %20 = arith.addf %14, %17 : vector<2x32xf32>
    %21 = arith.negf %20 : vector<2x32xf32>
    %22 = math.exp %21 : vector<2x32xf32>
    %cst_11 = arith.constant 1.000000e+00 : f32
    %23 = vector.broadcast %cst_11 : f32 to vector<2x32xf32>
    %24 = arith.addf %23, %22 : vector<2x32xf32>
    %25 = arith.divf %23, %24 : vector<2x32xf32>
    %26 = arith.addf %15, %18 : vector<2x32xf32>
    %27 = arith.negf %26 : vector<2x32xf32>
    %28 = math.exp %27 : vector<2x32xf32>
    %cst_12 = arith.constant 1.000000e+00 : f32
    %29 = vector.broadcast %cst_12 : f32 to vector<2x32xf32>
    %30 = arith.addf %29, %28 : vector<2x32xf32>
    %31 = arith.divf %29, %30 : vector<2x32xf32>
    %32 = arith.mulf %25, %19 : vector<2x32xf32>
    %33 = arith.addf %16, %32 : vector<2x32xf32>
    %34 = math.tanh %33 : vector<2x32xf32>
    %cst_13 = arith.constant 1.000000e+00 : f32
    %35 = vector.broadcast %cst_13 : f32 to vector<2x32xf32>
    %36 = arith.subf %35, %31 : vector<2x32xf32>
    %37 = arith.mulf %36, %34 : vector<2x32xf32>
    %38 = arith.mulf %31, %8 : vector<2x32xf32>
    %39 = arith.addf %37, %38 : vector<2x32xf32>
    %c0_14 = arith.constant 0 : index
    %c0_15 = arith.constant 0 : index
    %c0_16 = arith.constant 0 : index
    %40 = vector.load %arg1[%c0_14, %c0_15, %c0_16] : memref<8x2x1xf32, #tpu.memory_space<vmem>>, vector<1x2x1xf32>
    %41 = vector.shape_cast %40 : vector<1x2x1xf32> to vector<2x1xf32>
    %42 = vector.broadcast %41 : vector<2x1xf32> to vector<2x32xf32>
    %43 = arith.mulf %42, %39 : vector<2x32xf32>
    %cst_17 = arith.constant 1.000000e+00 : f32
    %44 = vector.broadcast %cst_17 : f32 to vector<2x1xf32>
    %45 = arith.subf %44, %41 : vector<2x1xf32>
    %46 = vector.broadcast %45 : vector<2x1xf32> to vector<2x32xf32>
    %47 = arith.mulf %46, %8 : vector<2x32xf32>
    %48 = arith.addf %43, %47 : vector<2x32xf32>
    %49 = vector.extract_strided_slice %5 {offsets = [2, 0], sizes = [2, 96], strides = [1, 1]} : vector<16x96xf32> to vector<2x96xf32>
    %50 = arith.truncf %48 : vector<2x32xf32> to vector<2x32xbf16>
    %cst_18 = arith.constant dense<0.000000e+00> : vector<2x96xf32>
    %51 = tpu.matmul %50, %6, %cst_18 {dimension_numbers = #tpu.dot_dimension_numbers<[1], [0], [0], [1], [0, 0, 1, 1], [], []>} : vector<2x32xbf16>, vector<32x96xbf16>, vector<2x96xf32> -> vector<2x96xf32>
    %52 = vector.broadcast %7 : vector<1x96xf32> to vector<2x96xf32>
    %53 = arith.addf %51, %52 : vector<2x96xf32>
    %54 = vector.extract_strided_slice %49 {offsets = [0, 0], sizes = [2, 32], strides = [1, 1]} : vector<2x96xf32> to vector<2x32xf32>
    %55 = vector.extract_strided_slice %49 {offsets = [0, 32], sizes = [2, 32], strides = [1, 1]} : vector<2x96xf32> to vector<2x32xf32>
    %56 = vector.extract_strided_slice %49 {offsets = [0, 64], sizes = [2, 32], strides = [1, 1]} : vector<2x96xf32> to vector<2x32xf32>
    %57 = vector.extract_strided_slice %53 {offsets = [0, 0], sizes = [2, 32], strides = [1, 1]} : vector<2x96xf32> to vector<2x32xf32>
    %58 = vector.extract_strided_slice %53 {offsets = [0, 32], sizes = [2, 32], strides = [1, 1]} : vector<2x96xf32> to vector<2x32xf32>
    %59 = vector.extract_strided_slice %53 {offsets = [0, 64], sizes = [2, 32], strides = [1, 1]} : vector<2x96xf32> to vector<2x32xf32>
    %60 = arith.addf %54, %57 : vector<2x32xf32>
    %61 = arith.negf %60 : vector<2x32xf32>
    %62 = math.exp %61 : vector<2x32xf32>
    %cst_19 = arith.constant 1.000000e+00 : f32
    %63 = vector.broadcast %cst_19 : f32 to vector<2x32xf32>
    %64 = arith.addf %63, %62 : vector<2x32xf32>
    %65 = arith.divf %63, %64 : vector<2x32xf32>
    %66 = arith.addf %55, %58 : vector<2x32xf32>
    %67 = arith.negf %66 : vector<2x32xf32>
    %68 = math.exp %67 : vector<2x32xf32>
    %cst_20 = arith.constant 1.000000e+00 : f32
    %69 = vector.broadcast %cst_20 : f32 to vector<2x32xf32>
    %70 = arith.addf %69, %68 : vector<2x32xf32>
    %71 = arith.divf %69, %70 : vector<2x32xf32>
    %72 = arith.mulf %65, %59 : vector<2x32xf32>
    %73 = arith.addf %56, %72 : vector<2x32xf32>
    %74 = math.tanh %73 : vector<2x32xf32>
    %cst_21 = arith.constant 1.000000e+00 : f32
    %75 = vector.broadcast %cst_21 : f32 to vector<2x32xf32>
    %76 = arith.subf %75, %71 : vector<2x32xf32>
    %77 = arith.mulf %76, %74 : vector<2x32xf32>
    %78 = arith.mulf %71, %48 : vector<2x32xf32>
    %79 = arith.addf %77, %78 : vector<2x32xf32>
    %c1 = arith.constant 1 : index
    %c0_22 = arith.constant 0 : index
    %c0_23 = arith.constant 0 : index
    %80 = vector.load %arg1[%c1, %c0_22, %c0_23] : memref<8x2x1xf32, #tpu.memory_space<vmem>>, vector<1x2x1xf32>
    %81 = vector.shape_cast %80 : vector<1x2x1xf32> to vector<2x1xf32>
    %82 = vector.broadcast %81 : vector<2x1xf32> to vector<2x32xf32>
    %83 = arith.mulf %82, %79 : vector<2x32xf32>
    %cst_24 = arith.constant 1.000000e+00 : f32
    %84 = vector.broadcast %cst_24 : f32 to vector<2x1xf32>
    %85 = arith.subf %84, %81 : vector<2x1xf32>
    %86 = vector.broadcast %85 : vector<2x1xf32> to vector<2x32xf32>
    %87 = arith.mulf %86, %48 : vector<2x32xf32>
    %88 = arith.addf %83, %87 : vector<2x32xf32>
    %89 = vector.extract_strided_slice %5 {offsets = [4, 0], sizes = [2, 96], strides = [1, 1]} : vector<16x96xf32> to vector<2x96xf32>
    %90 = arith.truncf %88 : vector<2x32xf32> to vector<2x32xbf16>
    %cst_25 = arith.constant dense<0.000000e+00> : vector<2x96xf32>
    %91 = tpu.matmul %90, %6, %cst_25 {dimension_numbers = #tpu.dot_dimension_numbers<[1], [0], [0], [1], [0, 0, 1, 1], [], []>} : vector<2x32xbf16>, vector<32x96xbf16>, vector<2x96xf32> -> vector<2x96xf32>
    %92 = vector.broadcast %7 : vector<1x96xf32> to vector<2x96xf32>
    %93 = arith.addf %91, %92 : vector<2x96xf32>
    %94 = vector.extract_strided_slice %89 {offsets = [0, 0], sizes = [2, 32], strides = [1, 1]} : vector<2x96xf32> to vector<2x32xf32>
    %95 = vector.extract_strided_slice %89 {offsets = [0, 32], sizes = [2, 32], strides = [1, 1]} : vector<2x96xf32> to vector<2x32xf32>
    %96 = vector.extract_strided_slice %89 {offsets = [0, 64], sizes = [2, 32], strides = [1, 1]} : vector<2x96xf32> to vector<2x32xf32>
    %97 = vector.extract_strided_slice %93 {offsets = [0, 0], sizes = [2, 32], strides = [1, 1]} : vector<2x96xf32> to vector<2x32xf32>
    %98 = vector.extract_strided_slice %93 {offsets = [0, 32], sizes = [2, 32], strides = [1, 1]} : vector<2x96xf32> to vector<2x32xf32>
    %99 = vector.extract_strided_slice %93 {offsets = [0, 64], sizes = [2, 32], strides = [1, 1]} : vector<2x96xf32> to vector<2x32xf32>
    %100 = arith.addf %94, %97 : vector<2x32xf32>
    %101 = arith.negf %100 : vector<2x32xf32>
    %102 = math.exp %101 : vector<2x32xf32>
    %cst_26 = arith.constant 1.000000e+00 : f32
    %103 = vector.broadcast %cst_26 : f32 to vector<2x32xf32>
    %104 = arith.addf %103, %102 : vector<2x32xf32>
    %105 = arith.divf %103, %104 : vector<2x32xf32>
    %106 = arith.addf %95, %98 : vector<2x32xf32>
    %107 = arith.negf %106 : vector<2x32xf32>
    %108 = math.exp %107 : vector<2x32xf32>
    %cst_27 = arith.constant 1.000000e+00 : f32
    %109 = vector.broadcast %cst_27 : f32 to vector<2x32xf32>
    %110 = arith.addf %109, %108 : vector<2x32xf32>
    %111 = arith.divf %109, %110 : vector<2x32xf32>
    %112 = arith.mulf %105, %99 : vector<2x32xf32>
    %113 = arith.addf %96, %112 : vector<2x32xf32>
    %114 = math.tanh %113 : vector<2x32xf32>
    %cst_28 = arith.constant 1.000000e+00 : f32
    %115 = vector.broadcast %cst_28 : f32 to vector<2x32xf32>
    %116 = arith.subf %115, %111 : vector<2x32xf32>
    %117 = arith.mulf %116, %114 : vector<2x32xf32>
    %118 = arith.mulf %111, %88 : vector<2x32xf32>
    %119 = arith.addf %117, %118 : vector<2x32xf32>
    %c2 = arith.constant 2 : index
    %c0_29 = arith.constant 0 : index
    %c0_30 = arith.constant 0 : index
    %120 = vector.load %arg1[%c2, %c0_29, %c0_30] : memref<8x2x1xf32, #tpu.memory_space<vmem>>, vector<1x2x1xf32>
    %121 = vector.shape_cast %120 : vector<1x2x1xf32> to vector<2x1xf32>
    %122 = vector.broadcast %121 : vector<2x1xf32> to vector<2x32xf32>
    %123 = arith.mulf %122, %119 : vector<2x32xf32>
    %cst_31 = arith.constant 1.000000e+00 : f32
    %124 = vector.broadcast %cst_31 : f32 to vector<2x1xf32>
    %125 = arith.subf %124, %121 : vector<2x1xf32>
    %126 = vector.broadcast %125 : vector<2x1xf32> to vector<2x32xf32>
    %127 = arith.mulf %126, %88 : vector<2x32xf32>
    %128 = arith.addf %123, %127 : vector<2x32xf32>
    %129 = vector.extract_strided_slice %5 {offsets = [6, 0], sizes = [2, 96], strides = [1, 1]} : vector<16x96xf32> to vector<2x96xf32>
    %130 = arith.truncf %128 : vector<2x32xf32> to vector<2x32xbf16>
    %cst_32 = arith.constant dense<0.000000e+00> : vector<2x96xf32>
    %131 = tpu.matmul %130, %6, %cst_32 {dimension_numbers = #tpu.dot_dimension_numbers<[1], [0], [0], [1], [0, 0, 1, 1], [], []>} : vector<2x32xbf16>, vector<32x96xbf16>, vector<2x96xf32> -> vector<2x96xf32>
    %132 = vector.broadcast %7 : vector<1x96xf32> to vector<2x96xf32>
    %133 = arith.addf %131, %132 : vector<2x96xf32>
    %134 = vector.extract_strided_slice %129 {offsets = [0, 0], sizes = [2, 32], strides = [1, 1]} : vector<2x96xf32> to vector<2x32xf32>
    %135 = vector.extract_strided_slice %129 {offsets = [0, 32], sizes = [2, 32], strides = [1, 1]} : vector<2x96xf32> to vector<2x32xf32>
    %136 = vector.extract_strided_slice %129 {offsets = [0, 64], sizes = [2, 32], strides = [1, 1]} : vector<2x96xf32> to vector<2x32xf32>
    %137 = vector.extract_strided_slice %133 {offsets = [0, 0], sizes = [2, 32], strides = [1, 1]} : vector<2x96xf32> to vector<2x32xf32>
    %138 = vector.extract_strided_slice %133 {offsets = [0, 32], sizes = [2, 32], strides = [1, 1]} : vector<2x96xf32> to vector<2x32xf32>
    %139 = vector.extract_strided_slice %133 {offsets = [0, 64], sizes = [2, 32], strides = [1, 1]} : vector<2x96xf32> to vector<2x32xf32>
    %140 = arith.addf %134, %137 : vector<2x32xf32>
    %141 = arith.negf %140 : vector<2x32xf32>
    %142 = math.exp %141 : vector<2x32xf32>
    %cst_33 = arith.constant 1.000000e+00 : f32
    %143 = vector.broadcast %cst_33 : f32 to vector<2x32xf32>
    %144 = arith.addf %143, %142 : vector<2x32xf32>
    %145 = arith.divf %143, %144 : vector<2x32xf32>
    %146 = arith.addf %135, %138 : vector<2x32xf32>
    %147 = arith.negf %146 : vector<2x32xf32>
    %148 = math.exp %147 : vector<2x32xf32>
    %cst_34 = arith.constant 1.000000e+00 : f32
    %149 = vector.broadcast %cst_34 : f32 to vector<2x32xf32>
    %150 = arith.addf %149, %148 : vector<2x32xf32>
    %151 = arith.divf %149, %150 : vector<2x32xf32>
    %152 = arith.mulf %145, %139 : vector<2x32xf32>
    %153 = arith.addf %136, %152 : vector<2x32xf32>
    %154 = math.tanh %153 : vector<2x32xf32>
    %cst_35 = arith.constant 1.000000e+00 : f32
    %155 = vector.broadcast %cst_35 : f32 to vector<2x32xf32>
    %156 = arith.subf %155, %151 : vector<2x32xf32>
    %157 = arith.mulf %156, %154 : vector<2x32xf32>
    %158 = arith.mulf %151, %128 : vector<2x32xf32>
    %159 = arith.addf %157, %158 : vector<2x32xf32>
    %c3 = arith.constant 3 : index
    %c0_36 = arith.constant 0 : index
    %c0_37 = arith.constant 0 : index
    %160 = vector.load %arg1[%c3, %c0_36, %c0_37] : memref<8x2x1xf32, #tpu.memory_space<vmem>>, vector<1x2x1xf32>
    %161 = vector.shape_cast %160 : vector<1x2x1xf32> to vector<2x1xf32>
    %162 = vector.broadcast %161 : vector<2x1xf32> to vector<2x32xf32>
    %163 = arith.mulf %162, %159 : vector<2x32xf32>
    %cst_38 = arith.constant 1.000000e+00 : f32
    %164 = vector.broadcast %cst_38 : f32 to vector<2x1xf32>
    %165 = arith.subf %164, %161 : vector<2x1xf32>
    %166 = vector.broadcast %165 : vector<2x1xf32> to vector<2x32xf32>
    %167 = arith.mulf %166, %128 : vector<2x32xf32>
    %168 = arith.addf %163, %167 : vector<2x32xf32>
    %169 = vector.extract_strided_slice %5 {offsets = [8, 0], sizes = [2, 96], strides = [1, 1]} : vector<16x96xf32> to vector<2x96xf32>
    %170 = arith.truncf %168 : vector<2x32xf32> to vector<2x32xbf16>
    %cst_39 = arith.constant dense<0.000000e+00> : vector<2x96xf32>
    %171 = tpu.matmul %170, %6, %cst_39 {dimension_numbers = #tpu.dot_dimension_numbers<[1], [0], [0], [1], [0, 0, 1, 1], [], []>} : vector<2x32xbf16>, vector<32x96xbf16>, vector<2x96xf32> -> vector<2x96xf32>
    %172 = vector.broadcast %7 : vector<1x96xf32> to vector<2x96xf32>
    %173 = arith.addf %171, %172 : vector<2x96xf32>
    %174 = vector.extract_strided_slice %169 {offsets = [0, 0], sizes = [2, 32], strides = [1, 1]} : vector<2x96xf32> to vector<2x32xf32>
    %175 = vector.extract_strided_slice %169 {offsets = [0, 32], sizes = [2, 32], strides = [1, 1]} : vector<2x96xf32> to vector<2x32xf32>
    %176 = vector.extract_strided_slice %169 {offsets = [0, 64], sizes = [2, 32], strides = [1, 1]} : vector<2x96xf32> to vector<2x32xf32>
    %177 = vector.extract_strided_slice %173 {offsets = [0, 0], sizes = [2, 32], strides = [1, 1]} : vector<2x96xf32> to vector<2x32xf32>
    %178 = vector.extract_strided_slice %173 {offsets = [0, 32], sizes = [2, 32], strides = [1, 1]} : vector<2x96xf32> to vector<2x32xf32>
    %179 = vector.extract_strided_slice %173 {offsets = [0, 64], sizes = [2, 32], strides = [1, 1]} : vector<2x96xf32> to vector<2x32xf32>
    %180 = arith.addf %174, %177 : vector<2x32xf32>
    %181 = arith.negf %180 : vector<2x32xf32>
    %182 = math.exp %181 : vector<2x32xf32>
    %cst_40 = arith.constant 1.000000e+00 : f32
    %183 = vector.broadcast %cst_40 : f32 to vector<2x32xf32>
    %184 = arith.addf %183, %182 : vector<2x32xf32>
    %185 = arith.divf %183, %184 : vector<2x32xf32>
    %186 = arith.addf %175, %178 : vector<2x32xf32>
    %187 = arith.negf %186 : vector<2x32xf32>
    %188 = math.exp %187 : vector<2x32xf32>
    %cst_41 = arith.constant 1.000000e+00 : f32
    %189 = vector.broadcast %cst_41 : f32 to vector<2x32xf32>
    %190 = arith.addf %189, %188 : vector<2x32xf32>
    %191 = arith.divf %189, %190 : vector<2x32xf32>
    %192 = arith.mulf %185, %179 : vector<2x32xf32>
    %193 = arith.addf %176, %192 : vector<2x32xf32>
    %194 = math.tanh %193 : vector<2x32xf32>
    %cst_42 = arith.constant 1.000000e+00 : f32
    %195 = vector.broadcast %cst_42 : f32 to vector<2x32xf32>
    %196 = arith.subf %195, %191 : vector<2x32xf32>
    %197 = arith.mulf %196, %194 : vector<2x32xf32>
    %198 = arith.mulf %191, %168 : vector<2x32xf32>
    %199 = arith.addf %197, %198 : vector<2x32xf32>
    %c4 = arith.constant 4 : index
    %c0_43 = arith.constant 0 : index
    %c0_44 = arith.constant 0 : index
    %200 = vector.load %arg1[%c4, %c0_43, %c0_44] : memref<8x2x1xf32, #tpu.memory_space<vmem>>, vector<1x2x1xf32>
    %201 = vector.shape_cast %200 : vector<1x2x1xf32> to vector<2x1xf32>
    %202 = vector.broadcast %201 : vector<2x1xf32> to vector<2x32xf32>
    %203 = arith.mulf %202, %199 : vector<2x32xf32>
    %cst_45 = arith.constant 1.000000e+00 : f32
    %204 = vector.broadcast %cst_45 : f32 to vector<2x1xf32>
    %205 = arith.subf %204, %201 : vector<2x1xf32>
    %206 = vector.broadcast %205 : vector<2x1xf32> to vector<2x32xf32>
    %207 = arith.mulf %206, %168 : vector<2x32xf32>
    %208 = arith.addf %203, %207 : vector<2x32xf32>
    %209 = vector.extract_strided_slice %5 {offsets = [10, 0], sizes = [2, 96], strides = [1, 1]} : vector<16x96xf32> to vector<2x96xf32>
    %210 = arith.truncf %208 : vector<2x32xf32> to vector<2x32xbf16>
    %cst_46 = arith.constant dense<0.000000e+00> : vector<2x96xf32>
    %211 = tpu.matmul %210, %6, %cst_46 {dimension_numbers = #tpu.dot_dimension_numbers<[1], [0], [0], [1], [0, 0, 1, 1], [], []>} : vector<2x32xbf16>, vector<32x96xbf16>, vector<2x96xf32> -> vector<2x96xf32>
    %212 = vector.broadcast %7 : vector<1x96xf32> to vector<2x96xf32>
    %213 = arith.addf %211, %212 : vector<2x96xf32>
    %214 = vector.extract_strided_slice %209 {offsets = [0, 0], sizes = [2, 32], strides = [1, 1]} : vector<2x96xf32> to vector<2x32xf32>
    %215 = vector.extract_strided_slice %209 {offsets = [0, 32], sizes = [2, 32], strides = [1, 1]} : vector<2x96xf32> to vector<2x32xf32>
    %216 = vector.extract_strided_slice %209 {offsets = [0, 64], sizes = [2, 32], strides = [1, 1]} : vector<2x96xf32> to vector<2x32xf32>
    %217 = vector.extract_strided_slice %213 {offsets = [0, 0], sizes = [2, 32], strides = [1, 1]} : vector<2x96xf32> to vector<2x32xf32>
    %218 = vector.extract_strided_slice %213 {offsets = [0, 32], sizes = [2, 32], strides = [1, 1]} : vector<2x96xf32> to vector<2x32xf32>
    %219 = vector.extract_strided_slice %213 {offsets = [0, 64], sizes = [2, 32], strides = [1, 1]} : vector<2x96xf32> to vector<2x32xf32>
    %220 = arith.addf %214, %217 : vector<2x32xf32>
    %221 = arith.negf %220 : vector<2x32xf32>
    %222 = math.exp %221 : vector<2x32xf32>
    %cst_47 = arith.constant 1.000000e+00 : f32
    %223 = vector.broadcast %cst_47 : f32 to vector<2x32xf32>
    %224 = arith.addf %223, %222 : vector<2x32xf32>
    %225 = arith.divf %223, %224 : vector<2x32xf32>
    %226 = arith.addf %215, %218 : vector<2x32xf32>
    %227 = arith.negf %226 : vector<2x32xf32>
    %228 = math.exp %227 : vector<2x32xf32>
    %cst_48 = arith.constant 1.000000e+00 : f32
    %229 = vector.broadcast %cst_48 : f32 to vector<2x32xf32>
    %230 = arith.addf %229, %228 : vector<2x32xf32>
    %231 = arith.divf %229, %230 : vector<2x32xf32>
    %232 = arith.mulf %225, %219 : vector<2x32xf32>
    %233 = arith.addf %216, %232 : vector<2x32xf32>
    %234 = math.tanh %233 : vector<2x32xf32>
    %cst_49 = arith.constant 1.000000e+00 : f32
    %235 = vector.broadcast %cst_49 : f32 to vector<2x32xf32>
    %236 = arith.subf %235, %231 : vector<2x32xf32>
    %237 = arith.mulf %236, %234 : vector<2x32xf32>
    %238 = arith.mulf %231, %208 : vector<2x32xf32>
    %239 = arith.addf %237, %238 : vector<2x32xf32>
    %c5 = arith.constant 5 : index
    %c0_50 = arith.constant 0 : index
    %c0_51 = arith.constant 0 : index
    %240 = vector.load %arg1[%c5, %c0_50, %c0_51] : memref<8x2x1xf32, #tpu.memory_space<vmem>>, vector<1x2x1xf32>
    %241 = vector.shape_cast %240 : vector<1x2x1xf32> to vector<2x1xf32>
    %242 = vector.broadcast %241 : vector<2x1xf32> to vector<2x32xf32>
    %243 = arith.mulf %242, %239 : vector<2x32xf32>
    %cst_52 = arith.constant 1.000000e+00 : f32
    %244 = vector.broadcast %cst_52 : f32 to vector<2x1xf32>
    %245 = arith.subf %244, %241 : vector<2x1xf32>
    %246 = vector.broadcast %245 : vector<2x1xf32> to vector<2x32xf32>
    %247 = arith.mulf %246, %208 : vector<2x32xf32>
    %248 = arith.addf %243, %247 : vector<2x32xf32>
    %249 = vector.extract_strided_slice %5 {offsets = [12, 0], sizes = [2, 96], strides = [1, 1]} : vector<16x96xf32> to vector<2x96xf32>
    %250 = arith.truncf %248 : vector<2x32xf32> to vector<2x32xbf16>
    %cst_53 = arith.constant dense<0.000000e+00> : vector<2x96xf32>
    %251 = tpu.matmul %250, %6, %cst_53 {dimension_numbers = #tpu.dot_dimension_numbers<[1], [0], [0], [1], [0, 0, 1, 1], [], []>} : vector<2x32xbf16>, vector<32x96xbf16>, vector<2x96xf32> -> vector<2x96xf32>
    %252 = vector.broadcast %7 : vector<1x96xf32> to vector<2x96xf32>
    %253 = arith.addf %251, %252 : vector<2x96xf32>
    %254 = vector.extract_strided_slice %249 {offsets = [0, 0], sizes = [2, 32], strides = [1, 1]} : vector<2x96xf32> to vector<2x32xf32>
    %255 = vector.extract_strided_slice %249 {offsets = [0, 32], sizes = [2, 32], strides = [1, 1]} : vector<2x96xf32> to vector<2x32xf32>
    %256 = vector.extract_strided_slice %249 {offsets = [0, 64], sizes = [2, 32], strides = [1, 1]} : vector<2x96xf32> to vector<2x32xf32>
    %257 = vector.extract_strided_slice %253 {offsets = [0, 0], sizes = [2, 32], strides = [1, 1]} : vector<2x96xf32> to vector<2x32xf32>
    %258 = vector.extract_strided_slice %253 {offsets = [0, 32], sizes = [2, 32], strides = [1, 1]} : vector<2x96xf32> to vector<2x32xf32>
    %259 = vector.extract_strided_slice %253 {offsets = [0, 64], sizes = [2, 32], strides = [1, 1]} : vector<2x96xf32> to vector<2x32xf32>
    %260 = arith.addf %254, %257 : vector<2x32xf32>
    %261 = arith.negf %260 : vector<2x32xf32>
    %262 = math.exp %261 : vector<2x32xf32>
    %cst_54 = arith.constant 1.000000e+00 : f32
    %263 = vector.broadcast %cst_54 : f32 to vector<2x32xf32>
    %264 = arith.addf %263, %262 : vector<2x32xf32>
    %265 = arith.divf %263, %264 : vector<2x32xf32>
    %266 = arith.addf %255, %258 : vector<2x32xf32>
    %267 = arith.negf %266 : vector<2x32xf32>
    %268 = math.exp %267 : vector<2x32xf32>
    %cst_55 = arith.constant 1.000000e+00 : f32
    %269 = vector.broadcast %cst_55 : f32 to vector<2x32xf32>
    %270 = arith.addf %269, %268 : vector<2x32xf32>
    %271 = arith.divf %269, %270 : vector<2x32xf32>
    %272 = arith.mulf %265, %259 : vector<2x32xf32>
    %273 = arith.addf %256, %272 : vector<2x32xf32>
    %274 = math.tanh %273 : vector<2x32xf32>
    %cst_56 = arith.constant 1.000000e+00 : f32
    %275 = vector.broadcast %cst_56 : f32 to vector<2x32xf32>
    %276 = arith.subf %275, %271 : vector<2x32xf32>
    %277 = arith.mulf %276, %274 : vector<2x32xf32>
    %278 = arith.mulf %271, %248 : vector<2x32xf32>
    %279 = arith.addf %277, %278 : vector<2x32xf32>
    %c6 = arith.constant 6 : index
    %c0_57 = arith.constant 0 : index
    %c0_58 = arith.constant 0 : index
    %280 = vector.load %arg1[%c6, %c0_57, %c0_58] : memref<8x2x1xf32, #tpu.memory_space<vmem>>, vector<1x2x1xf32>
    %281 = vector.shape_cast %280 : vector<1x2x1xf32> to vector<2x1xf32>
    %282 = vector.broadcast %281 : vector<2x1xf32> to vector<2x32xf32>
    %283 = arith.mulf %282, %279 : vector<2x32xf32>
    %cst_59 = arith.constant 1.000000e+00 : f32
    %284 = vector.broadcast %cst_59 : f32 to vector<2x1xf32>
    %285 = arith.subf %284, %281 : vector<2x1xf32>
    %286 = vector.broadcast %285 : vector<2x1xf32> to vector<2x32xf32>
    %287 = arith.mulf %286, %248 : vector<2x32xf32>
    %288 = arith.addf %283, %287 : vector<2x32xf32>
    %289 = vector.extract_strided_slice %5 {offsets = [14, 0], sizes = [2, 96], strides = [1, 1]} : vector<16x96xf32> to vector<2x96xf32>
    %290 = arith.truncf %288 : vector<2x32xf32> to vector<2x32xbf16>
    %cst_60 = arith.constant dense<0.000000e+00> : vector<2x96xf32>
    %291 = tpu.matmul %290, %6, %cst_60 {dimension_numbers = #tpu.dot_dimension_numbers<[1], [0], [0], [1], [0, 0, 1, 1], [], []>} : vector<2x32xbf16>, vector<32x96xbf16>, vector<2x96xf32> -> vector<2x96xf32>
    %292 = vector.broadcast %7 : vector<1x96xf32> to vector<2x96xf32>
    %293 = arith.addf %291, %292 : vector<2x96xf32>
    %294 = vector.extract_strided_slice %289 {offsets = [0, 0], sizes = [2, 32], strides = [1, 1]} : vector<2x96xf32> to vector<2x32xf32>
    %295 = vector.extract_strided_slice %289 {offsets = [0, 32], sizes = [2, 32], strides = [1, 1]} : vector<2x96xf32> to vector<2x32xf32>
    %296 = vector.extract_strided_slice %289 {offsets = [0, 64], sizes = [2, 32], strides = [1, 1]} : vector<2x96xf32> to vector<2x32xf32>
    %297 = vector.extract_strided_slice %293 {offsets = [0, 0], sizes = [2, 32], strides = [1, 1]} : vector<2x96xf32> to vector<2x32xf32>
    %298 = vector.extract_strided_slice %293 {offsets = [0, 32], sizes = [2, 32], strides = [1, 1]} : vector<2x96xf32> to vector<2x32xf32>
    %299 = vector.extract_strided_slice %293 {offsets = [0, 64], sizes = [2, 32], strides = [1, 1]} : vector<2x96xf32> to vector<2x32xf32>
    %300 = arith.addf %294, %297 : vector<2x32xf32>
    %301 = arith.negf %300 : vector<2x32xf32>
    %302 = math.exp %301 : vector<2x32xf32>
    %cst_61 = arith.constant 1.000000e+00 : f32
    %303 = vector.broadcast %cst_61 : f32 to vector<2x32xf32>
    %304 = arith.addf %303, %302 : vector<2x32xf32>
    %305 = arith.divf %303, %304 : vector<2x32xf32>
    %306 = arith.addf %295, %298 : vector<2x32xf32>
    %307 = arith.negf %306 : vector<2x32xf32>
    %308 = math.exp %307 : vector<2x32xf32>
    %cst_62 = arith.constant 1.000000e+00 : f32
    %309 = vector.broadcast %cst_62 : f32 to vector<2x32xf32>
    %310 = arith.addf %309, %308 : vector<2x32xf32>
    %311 = arith.divf %309, %310 : vector<2x32xf32>
    %312 = arith.mulf %305, %299 : vector<2x32xf32>
    %313 = arith.addf %296, %312 : vector<2x32xf32>
    %314 = math.tanh %313 : vector<2x32xf32>
    %cst_63 = arith.constant 1.000000e+00 : f32
    %315 = vector.broadcast %cst_63 : f32 to vector<2x32xf32>
    %316 = arith.subf %315, %311 : vector<2x32xf32>
    %317 = arith.mulf %316, %314 : vector<2x32xf32>
    %318 = arith.mulf %311, %288 : vector<2x32xf32>
    %319 = arith.addf %317, %318 : vector<2x32xf32>
    %c7 = arith.constant 7 : index
    %c0_64 = arith.constant 0 : index
    %c0_65 = arith.constant 0 : index
    %320 = vector.load %arg1[%c7, %c0_64, %c0_65] : memref<8x2x1xf32, #tpu.memory_space<vmem>>, vector<1x2x1xf32>
    %321 = vector.shape_cast %320 : vector<1x2x1xf32> to vector<2x1xf32>
    %322 = vector.broadcast %321 : vector<2x1xf32> to vector<2x32xf32>
    %323 = arith.mulf %322, %319 : vector<2x32xf32>
    %cst_66 = arith.constant 1.000000e+00 : f32
    %324 = vector.broadcast %cst_66 : f32 to vector<2x1xf32>
    %325 = arith.subf %324, %321 : vector<2x1xf32>
    %326 = vector.broadcast %325 : vector<2x1xf32> to vector<2x32xf32>
    %327 = arith.mulf %326, %288 : vector<2x32xf32>
    %328 = arith.addf %323, %327 : vector<2x32xf32>
    %329 = arith.truncf %328 : vector<2x32xf32> to vector<2x32xbf16>
    %c0_67 = arith.constant 0 : index
    %c0_68 = arith.constant 0 : index
    %330 = vector.load %arg6[%c0_67, %c0_68] : memref<32x64xbf16, #tpu.memory_space<vmem>>, vector<32x64xbf16>
    %cst_69 = arith.constant dense<0.000000e+00> : vector<2x64xf32>
    %331 = tpu.matmul %329, %330, %cst_69 {dimension_numbers = #tpu.dot_dimension_numbers<[1], [0], [0], [1], [0, 0, 1, 1], [], []>} : vector<2x32xbf16>, vector<32x64xbf16>, vector<2x64xf32> -> vector<2x64xf32>
    %c0_70 = arith.constant 0 : index
    %c0_71 = arith.constant 0 : index
    %332 = vector.load %arg7[%c0_70, %c0_71] : memref<1x64xf32, #tpu.memory_space<vmem>>, vector<1x64xf32>
    %333 = vector.broadcast %332 : vector<1x64xf32> to vector<2x64xf32>
    %334 = arith.addf %331, %333 : vector<2x64xf32>
    %c0_72 = arith.constant 0 : index
    %c0_73 = arith.constant 0 : index
    %335 = vector.load %arg9[%c0_72, %c0_73] : memref<16x1xf32, #tpu.memory_space<vmem>>, vector<16x1xf32>
    %c0_74 = arith.constant 0 : index
    %c0_75 = arith.constant 0 : index
    %336 = vector.load %arg10[%c0_74, %c0_75] : memref<16x1xf32, #tpu.memory_space<vmem>>, vector<16x1xf32>
    %c0_76 = arith.constant 0 : index
    %c0_77 = arith.constant 0 : index
    %337 = vector.load %arg11[%c0_76, %c0_77] : memref<16x2xf32, #tpu.memory_space<vmem>>, vector<16x2xf32>
    %c0_78 = arith.constant 0 : index
    %c0_79 = arith.constant 0 : index
    %338 = vector.load %arg12[%c0_78, %c0_79] : memref<16x128xf32, #tpu.memory_space<vmem>>, vector<16x128xf32>
    %c0_80 = arith.constant 0 : index
    %c0_81 = arith.constant 0 : index
    %339 = vector.load %arg13[%c0_80, %c0_81] : memref<128x16xf32, #tpu.memory_space<vmem>>, vector<128x16xf32>
    %c0_82 = arith.constant 0 : index
    %c0_83 = arith.constant 0 : index
    %340 = vector.load %arg8[%c0_82, %c0_83] : memref<16x32xf32, #tpu.memory_space<vmem>>, vector<16x32xf32>
    %c0_84 = arith.constant 0 : index
    %c0_85 = arith.constant 0 : index
    %341 = vector.load %arg15[%c0_84, %c0_85] : memref<1x128xf32, #tpu.memory_space<vmem>>, vector<1x128xf32>
    %342 = arith.truncf %340 : vector<16x32xf32> to vector<16x32xbf16>
    %c1_86 = arith.constant 1 : index
    %c0_87 = arith.constant 0 : index
    %c0_88 = arith.constant 0 : index
    %343 = vector.load %arg14[%c1_86, %c0_87, %c0_88] : memref<3x32x128xbf16, #tpu.memory_space<vmem>>, vector<1x32x128xbf16>
    %344 = vector.shape_cast %343 : vector<1x32x128xbf16> to vector<32x128xbf16>
    %cst_89 = arith.constant dense<0.000000e+00> : vector<16x128xf32>
    %345 = tpu.matmul %342, %344, %cst_89 {dimension_numbers = #tpu.dot_dimension_numbers<[1], [0], [0], [1], [0, 0, 1, 1], [], []>} : vector<16x32xbf16>, vector<32x128xbf16>, vector<16x128xf32> -> vector<16x128xf32>
    %c1_i32 = arith.constant 1 : i32
    %346 = tpu.dynamic_rotate %340 by %c1_i32 dim 0 : vector<16x32xf32>, i32 -> vector<16x32xf32>
    %347 = vector.broadcast %335 : vector<16x1xf32> to vector<16x32xf32>
    %348 = arith.mulf %346, %347 : vector<16x32xf32>
    %349 = arith.truncf %348 : vector<16x32xf32> to vector<16x32xbf16>
    %c0_90 = arith.constant 0 : index
    %c0_91 = arith.constant 0 : index
    %c0_92 = arith.constant 0 : index
    %350 = vector.load %arg14[%c0_90, %c0_91, %c0_92] : memref<3x32x128xbf16, #tpu.memory_space<vmem>>, vector<1x32x128xbf16>
    %351 = vector.shape_cast %350 : vector<1x32x128xbf16> to vector<32x128xbf16>
    %cst_93 = arith.constant dense<0.000000e+00> : vector<16x128xf32>
    %352 = tpu.matmul %349, %351, %cst_93 {dimension_numbers = #tpu.dot_dimension_numbers<[1], [0], [0], [1], [0, 0, 1, 1], [], []>} : vector<16x32xbf16>, vector<32x128xbf16>, vector<16x128xf32> -> vector<16x128xf32>
    %353 = arith.addf %345, %352 : vector<16x128xf32>
    %c15_i32 = arith.constant 15 : i32
    %354 = tpu.dynamic_rotate %340 by %c15_i32 dim 0 : vector<16x32xf32>, i32 -> vector<16x32xf32>
    %355 = vector.broadcast %336 : vector<16x1xf32> to vector<16x32xf32>
    %356 = arith.mulf %354, %355 : vector<16x32xf32>
    %357 = arith.truncf %356 : vector<16x32xf32> to vector<16x32xbf16>
    %c2_94 = arith.constant 2 : index
    %c0_95 = arith.constant 0 : index
    %c0_96 = arith.constant 0 : index
    %358 = vector.load %arg14[%c2_94, %c0_95, %c0_96] : memref<3x32x128xbf16, #tpu.memory_space<vmem>>, vector<1x32x128xbf16>
    %359 = vector.shape_cast %358 : vector<1x32x128xbf16> to vector<32x128xbf16>
    %cst_97 = arith.constant dense<0.000000e+00> : vector<16x128xf32>
    %360 = tpu.matmul %357, %359, %cst_97 {dimension_numbers = #tpu.dot_dimension_numbers<[1], [0], [0], [1], [0, 0, 1, 1], [], []>} : vector<16x32xbf16>, vector<32x128xbf16>, vector<16x128xf32> -> vector<16x128xf32>
    %361 = arith.addf %353, %360 : vector<16x128xf32>
    %362 = vector.broadcast %341 : vector<1x128xf32> to vector<16x128xf32>
    %363 = arith.addf %361, %362 : vector<16x128xf32>
    %cst_98 = arith.constant 0.000000e+00 : f32
    %364 = vector.broadcast %cst_98 : f32 to vector<16x128xf32>
    %365 = arith.maximumf %363, %364 : vector<16x128xf32>
    %366 = vector.extract_strided_slice %334 {offsets = [0, 0], sizes = [2, 16], strides = [1, 1]} : vector<2x64xf32> to vector<2x16xf32>
    %cst_99 = arith.constant 1.000000e+00 : f32
    %367 = vector.broadcast %cst_99 : f32 to vector<2x16xf32>
    %368 = arith.addf %366, %367 : vector<2x16xf32>
    %369 = vector.extract_strided_slice %334 {offsets = [0, 16], sizes = [2, 16], strides = [1, 1]} : vector<2x64xf32> to vector<2x16xf32>
    %cst_100 = arith.constant dense<0.000000e+00> : vector<16x16xf32>
    %370 = tpu.matmul %337, %368, %cst_100 {dimension_numbers = #tpu.dot_dimension_numbers<[1], [0], [0], [1], [0, 0, 1, 1], [], []>} : vector<16x2xf32>, vector<2x16xf32>, vector<16x16xf32> -> vector<16x16xf32>
    %cst_101 = arith.constant dense<0.000000e+00> : vector<16x128xf32>
    %371 = tpu.matmul %370, %338, %cst_101 {dimension_numbers = #tpu.dot_dimension_numbers<[1], [0], [0], [1], [0, 0, 1, 1], [], []>} : vector<16x16xf32>, vector<16x128xf32>, vector<16x128xf32> -> vector<16x128xf32>
    %cst_102 = arith.constant dense<0.000000e+00> : vector<16x16xf32>
    %372 = tpu.matmul %337, %369, %cst_102 {dimension_numbers = #tpu.dot_dimension_numbers<[1], [0], [0], [1], [0, 0, 1, 1], [], []>} : vector<16x2xf32>, vector<2x16xf32>, vector<16x16xf32> -> vector<16x16xf32>
    %cst_103 = arith.constant dense<0.000000e+00> : vector<16x128xf32>
    %373 = tpu.matmul %372, %338, %cst_103 {dimension_numbers = #tpu.dot_dimension_numbers<[1], [0], [0], [1], [0, 0, 1, 1], [], []>} : vector<16x16xf32>, vector<16x128xf32>, vector<16x128xf32> -> vector<16x128xf32>
    %374 = arith.truncf %365 : vector<16x128xf32> to vector<16x128xbf16>
    %c0_104 = arith.constant 0 : index
    %c0_105 = arith.constant 0 : index
    %c0_106 = arith.constant 0 : index
    %375 = vector.load %arg16[%c0_104, %c0_105, %c0_106] : memref<2x128x128xbf16, #tpu.memory_space<vmem>>, vector<1x128x128xbf16>
    %376 = vector.shape_cast %375 : vector<1x128x128xbf16> to vector<128x128xbf16>
    %cst_107 = arith.constant dense<0.000000e+00> : vector<16x128xf32>
    %377 = tpu.matmul %374, %376, %cst_107 {dimension_numbers = #tpu.dot_dimension_numbers<[1], [0], [0], [1], [0, 0, 1, 1], [], []>} : vector<16x128xbf16>, vector<128x128xbf16>, vector<16x128xf32> -> vector<16x128xf32>
    %c0_108 = arith.constant 0 : index
    %c0_109 = arith.constant 0 : index
    %378 = vector.load %arg17[%c0_108, %c0_109] : memref<2x128xf32, #tpu.memory_space<vmem>>, vector<1x128xf32>
    %379 = vector.broadcast %378 : vector<1x128xf32> to vector<16x128xf32>
    %380 = arith.addf %377, %379 : vector<16x128xf32>
    %cst_110 = arith.constant 0.000000e+00 : f32
    %381 = vector.broadcast %cst_110 : f32 to vector<16x128xf32>
    %382 = arith.maximumf %380, %381 : vector<16x128xf32>
    %c0_111 = arith.constant 0 : index
    %c0_112 = arith.constant 0 : index
    %383 = vector.load %arg19[%c0_111, %c0_112] : memref<2x128xf32, #tpu.memory_space<vmem>>, vector<1x128xf32>
    %384 = arith.truncf %382 : vector<16x128xf32> to vector<16x128xbf16>
    %c1_113 = arith.constant 1 : index
    %c0_114 = arith.constant 0 : index
    %c0_115 = arith.constant 0 : index
    %385 = vector.load %arg18[%c1_113, %c0_114, %c0_115] : memref<6x128x128xbf16, #tpu.memory_space<vmem>>, vector<1x128x128xbf16>
    %386 = vector.shape_cast %385 : vector<1x128x128xbf16> to vector<128x128xbf16>
    %cst_116 = arith.constant dense<0.000000e+00> : vector<16x128xf32>
    %387 = tpu.matmul %384, %386, %cst_116 {dimension_numbers = #tpu.dot_dimension_numbers<[1], [0], [0], [1], [0, 0, 1, 1], [], []>} : vector<16x128xbf16>, vector<128x128xbf16>, vector<16x128xf32> -> vector<16x128xf32>
    %c1_i32_117 = arith.constant 1 : i32
    %388 = tpu.dynamic_rotate %382 by %c1_i32_117 dim 0 : vector<16x128xf32>, i32 -> vector<16x128xf32>
    %389 = vector.broadcast %335 : vector<16x1xf32> to vector<16x128xf32>
    %390 = arith.mulf %388, %389 : vector<16x128xf32>
    %391 = arith.truncf %390 : vector<16x128xf32> to vector<16x128xbf16>
    %c0_118 = arith.constant 0 : index
    %c0_119 = arith.constant 0 : index
    %c0_120 = arith.constant 0 : index
    %392 = vector.load %arg18[%c0_118, %c0_119, %c0_120] : memref<6x128x128xbf16, #tpu.memory_space<vmem>>, vector<1x128x128xbf16>
    %393 = vector.shape_cast %392 : vector<1x128x128xbf16> to vector<128x128xbf16>
    %cst_121 = arith.constant dense<0.000000e+00> : vector<16x128xf32>
    %394 = tpu.matmul %391, %393, %cst_121 {dimension_numbers = #tpu.dot_dimension_numbers<[1], [0], [0], [1], [0, 0, 1, 1], [], []>} : vector<16x128xbf16>, vector<128x128xbf16>, vector<16x128xf32> -> vector<16x128xf32>
    %395 = arith.addf %387, %394 : vector<16x128xf32>
    %c15_i32_122 = arith.constant 15 : i32
    %396 = tpu.dynamic_rotate %382 by %c15_i32_122 dim 0 : vector<16x128xf32>, i32 -> vector<16x128xf32>
    %397 = vector.broadcast %336 : vector<16x1xf32> to vector<16x128xf32>
    %398 = arith.mulf %396, %397 : vector<16x128xf32>
    %399 = arith.truncf %398 : vector<16x128xf32> to vector<16x128xbf16>
    %c2_123 = arith.constant 2 : index
    %c0_124 = arith.constant 0 : index
    %c0_125 = arith.constant 0 : index
    %400 = vector.load %arg18[%c2_123, %c0_124, %c0_125] : memref<6x128x128xbf16, #tpu.memory_space<vmem>>, vector<1x128x128xbf16>
    %401 = vector.shape_cast %400 : vector<1x128x128xbf16> to vector<128x128xbf16>
    %cst_126 = arith.constant dense<0.000000e+00> : vector<16x128xf32>
    %402 = tpu.matmul %399, %401, %cst_126 {dimension_numbers = #tpu.dot_dimension_numbers<[1], [0], [0], [1], [0, 0, 1, 1], [], []>} : vector<16x128xbf16>, vector<128x128xbf16>, vector<16x128xf32> -> vector<16x128xf32>
    %403 = arith.addf %395, %402 : vector<16x128xf32>
    %404 = vector.broadcast %383 : vector<1x128xf32> to vector<16x128xf32>
    %405 = arith.addf %403, %404 : vector<16x128xf32>
    %cst_127 = arith.constant dense<0.000000e+00> : vector<128xf32>
    %406 = vector.multi_reduction <add>, %405, %cst_127 [0] : vector<16x128xf32> to vector<128xf32>
    %407 = vector.shape_cast %406 : vector<128xf32> to vector<1x128xf32>
    %408 = arith.mulf %405, %405 : vector<16x128xf32>
    %cst_128 = arith.constant dense<0.000000e+00> : vector<128xf32>
    %409 = vector.multi_reduction <add>, %408, %cst_128 [0] : vector<16x128xf32> to vector<128xf32>
    %410 = vector.shape_cast %409 : vector<128xf32> to vector<1x128xf32>
    %cst_129 = arith.constant dense<0.000000e+00> : vector<1x16xf32>
    %411 = tpu.matmul %407, %339, %cst_129 {dimension_numbers = #tpu.dot_dimension_numbers<[1], [0], [0], [1], [0, 0, 1, 1], [], []>} : vector<1x128xf32>, vector<128x16xf32>, vector<1x16xf32> -> vector<1x16xf32>
    %cst_130 = arith.constant 7.812500e-03 : f32
    %412 = vector.broadcast %cst_130 : f32 to vector<1x16xf32>
    %413 = arith.mulf %411, %412 : vector<1x16xf32>
    %cst_131 = arith.constant dense<0.000000e+00> : vector<1x16xf32>
    %414 = tpu.matmul %410, %339, %cst_131 {dimension_numbers = #tpu.dot_dimension_numbers<[1], [0], [0], [1], [0, 0, 1, 1], [], []>} : vector<1x128xf32>, vector<128x16xf32>, vector<1x16xf32> -> vector<1x16xf32>
    %cst_132 = arith.constant 7.812500e-03 : f32
    %415 = vector.broadcast %cst_132 : f32 to vector<1x16xf32>
    %416 = arith.mulf %414, %415 : vector<1x16xf32>
    %417 = arith.mulf %413, %413 : vector<1x16xf32>
    %418 = arith.subf %416, %417 : vector<1x16xf32>
    %cst_133 = arith.constant 0.000000e+00 : f32
    %419 = vector.broadcast %cst_133 : f32 to vector<1x16xf32>
    %420 = arith.maximumf %418, %419 : vector<1x16xf32>
    %cst_134 = arith.constant 9.99999974E-6 : f32
    %421 = vector.broadcast %cst_134 : f32 to vector<1x16xf32>
    %422 = arith.addf %420, %421 : vector<1x16xf32>
    %423 = math.rsqrt %422 : vector<1x16xf32>
    %cst_135 = arith.constant dense<0.000000e+00> : vector<1x128xf32>
    %424 = tpu.matmul %413, %338, %cst_135 {dimension_numbers = #tpu.dot_dimension_numbers<[1], [0], [0], [1], [0, 0, 1, 1], [], []>} : vector<1x16xf32>, vector<16x128xf32>, vector<1x128xf32> -> vector<1x128xf32>
    %cst_136 = arith.constant dense<0.000000e+00> : vector<1x128xf32>
    %425 = tpu.matmul %423, %338, %cst_136 {dimension_numbers = #tpu.dot_dimension_numbers<[1], [0], [0], [1], [0, 0, 1, 1], [], []>} : vector<1x16xf32>, vector<16x128xf32>, vector<1x128xf32> -> vector<1x128xf32>
    %426 = vector.broadcast %424 : vector<1x128xf32> to vector<16x128xf32>
    %427 = arith.subf %405, %426 : vector<16x128xf32>
    %428 = vector.broadcast %425 : vector<1x128xf32> to vector<16x128xf32>
    %429 = arith.mulf %427, %428 : vector<16x128xf32>
    %430 = arith.mulf %371, %429 : vector<16x128xf32>
    %431 = arith.addf %430, %373 : vector<16x128xf32>
    %cst_137 = arith.constant 0.000000e+00 : f32
    %432 = vector.broadcast %cst_137 : f32 to vector<16x128xf32>
    %433 = arith.maximumf %431, %432 : vector<16x128xf32>
    %434 = arith.addf %433, %365 : vector<16x128xf32>
    %435 = vector.extract_strided_slice %334 {offsets = [0, 32], sizes = [2, 16], strides = [1, 1]} : vector<2x64xf32> to vector<2x16xf32>
    %cst_138 = arith.constant 1.000000e+00 : f32
    %436 = vector.broadcast %cst_138 : f32 to vector<2x16xf32>
    %437 = arith.addf %435, %436 : vector<2x16xf32>
    %438 = vector.extract_strided_slice %334 {offsets = [0, 48], sizes = [2, 16], strides = [1, 1]} : vector<2x64xf32> to vector<2x16xf32>
    %cst_139 = arith.constant dense<0.000000e+00> : vector<16x16xf32>
    %439 = tpu.matmul %337, %437, %cst_139 {dimension_numbers = #tpu.dot_dimension_numbers<[1], [0], [0], [1], [0, 0, 1, 1], [], []>} : vector<16x2xf32>, vector<2x16xf32>, vector<16x16xf32> -> vector<16x16xf32>
    %cst_140 = arith.constant dense<0.000000e+00> : vector<16x128xf32>
    %440 = tpu.matmul %439, %338, %cst_140 {dimension_numbers = #tpu.dot_dimension_numbers<[1], [0], [0], [1], [0, 0, 1, 1], [], []>} : vector<16x16xf32>, vector<16x128xf32>, vector<16x128xf32> -> vector<16x128xf32>
    %cst_141 = arith.constant dense<0.000000e+00> : vector<16x16xf32>
    %441 = tpu.matmul %337, %438, %cst_141 {dimension_numbers = #tpu.dot_dimension_numbers<[1], [0], [0], [1], [0, 0, 1, 1], [], []>} : vector<16x2xf32>, vector<2x16xf32>, vector<16x16xf32> -> vector<16x16xf32>
    %cst_142 = arith.constant dense<0.000000e+00> : vector<16x128xf32>
    %442 = tpu.matmul %441, %338, %cst_142 {dimension_numbers = #tpu.dot_dimension_numbers<[1], [0], [0], [1], [0, 0, 1, 1], [], []>} : vector<16x16xf32>, vector<16x128xf32>, vector<16x128xf32> -> vector<16x128xf32>
    %443 = arith.truncf %434 : vector<16x128xf32> to vector<16x128xbf16>
    %c1_143 = arith.constant 1 : index
    %c0_144 = arith.constant 0 : index
    %c0_145 = arith.constant 0 : index
    %444 = vector.load %arg16[%c1_143, %c0_144, %c0_145] : memref<2x128x128xbf16, #tpu.memory_space<vmem>>, vector<1x128x128xbf16>
    %445 = vector.shape_cast %444 : vector<1x128x128xbf16> to vector<128x128xbf16>
    %cst_146 = arith.constant dense<0.000000e+00> : vector<16x128xf32>
    %446 = tpu.matmul %443, %445, %cst_146 {dimension_numbers = #tpu.dot_dimension_numbers<[1], [0], [0], [1], [0, 0, 1, 1], [], []>} : vector<16x128xbf16>, vector<128x128xbf16>, vector<16x128xf32> -> vector<16x128xf32>
    %c1_147 = arith.constant 1 : index
    %c0_148 = arith.constant 0 : index
    %447 = vector.load %arg17[%c1_147, %c0_148] : memref<2x128xf32, #tpu.memory_space<vmem>>, vector<1x128xf32>
    %448 = vector.broadcast %447 : vector<1x128xf32> to vector<16x128xf32>
    %449 = arith.addf %446, %448 : vector<16x128xf32>
    %cst_149 = arith.constant 0.000000e+00 : f32
    %450 = vector.broadcast %cst_149 : f32 to vector<16x128xf32>
    %451 = arith.maximumf %449, %450 : vector<16x128xf32>
    %c1_150 = arith.constant 1 : index
    %c0_151 = arith.constant 0 : index
    %452 = vector.load %arg19[%c1_150, %c0_151] : memref<2x128xf32, #tpu.memory_space<vmem>>, vector<1x128xf32>
    %453 = arith.truncf %451 : vector<16x128xf32> to vector<16x128xbf16>
    %c4_152 = arith.constant 4 : index
    %c0_153 = arith.constant 0 : index
    %c0_154 = arith.constant 0 : index
    %454 = vector.load %arg18[%c4_152, %c0_153, %c0_154] : memref<6x128x128xbf16, #tpu.memory_space<vmem>>, vector<1x128x128xbf16>
    %455 = vector.shape_cast %454 : vector<1x128x128xbf16> to vector<128x128xbf16>
    %cst_155 = arith.constant dense<0.000000e+00> : vector<16x128xf32>
    %456 = tpu.matmul %453, %455, %cst_155 {dimension_numbers = #tpu.dot_dimension_numbers<[1], [0], [0], [1], [0, 0, 1, 1], [], []>} : vector<16x128xbf16>, vector<128x128xbf16>, vector<16x128xf32> -> vector<16x128xf32>
    %c1_i32_156 = arith.constant 1 : i32
    %457 = tpu.dynamic_rotate %451 by %c1_i32_156 dim 0 : vector<16x128xf32>, i32 -> vector<16x128xf32>
    %458 = vector.broadcast %335 : vector<16x1xf32> to vector<16x128xf32>
    %459 = arith.mulf %457, %458 : vector<16x128xf32>
    %460 = arith.truncf %459 : vector<16x128xf32> to vector<16x128xbf16>
    %c3_157 = arith.constant 3 : index
    %c0_158 = arith.constant 0 : index
    %c0_159 = arith.constant 0 : index
    %461 = vector.load %arg18[%c3_157, %c0_158, %c0_159] : memref<6x128x128xbf16, #tpu.memory_space<vmem>>, vector<1x128x128xbf16>
    %462 = vector.shape_cast %461 : vector<1x128x128xbf16> to vector<128x128xbf16>
    %cst_160 = arith.constant dense<0.000000e+00> : vector<16x128xf32>
    %463 = tpu.matmul %460, %462, %cst_160 {dimension_numbers = #tpu.dot_dimension_numbers<[1], [0], [0], [1], [0, 0, 1, 1], [], []>} : vector<16x128xbf16>, vector<128x128xbf16>, vector<16x128xf32> -> vector<16x128xf32>
    %464 = arith.addf %456, %463 : vector<16x128xf32>
    %c15_i32_161 = arith.constant 15 : i32
    %465 = tpu.dynamic_rotate %451 by %c15_i32_161 dim 0 : vector<16x128xf32>, i32 -> vector<16x128xf32>
    %466 = vector.broadcast %336 : vector<16x1xf32> to vector<16x128xf32>
    %467 = arith.mulf %465, %466 : vector<16x128xf32>
    %468 = arith.truncf %467 : vector<16x128xf32> to vector<16x128xbf16>
    %c5_162 = arith.constant 5 : index
    %c0_163 = arith.constant 0 : index
    %c0_164 = arith.constant 0 : index
    %469 = vector.load %arg18[%c5_162, %c0_163, %c0_164] : memref<6x128x128xbf16, #tpu.memory_space<vmem>>, vector<1x128x128xbf16>
    %470 = vector.shape_cast %469 : vector<1x128x128xbf16> to vector<128x128xbf16>
    %cst_165 = arith.constant dense<0.000000e+00> : vector<16x128xf32>
    %471 = tpu.matmul %468, %470, %cst_165 {dimension_numbers = #tpu.dot_dimension_numbers<[1], [0], [0], [1], [0, 0, 1, 1], [], []>} : vector<16x128xbf16>, vector<128x128xbf16>, vector<16x128xf32> -> vector<16x128xf32>
    %472 = arith.addf %464, %471 : vector<16x128xf32>
    %473 = vector.broadcast %452 : vector<1x128xf32> to vector<16x128xf32>
    %474 = arith.addf %472, %473 : vector<16x128xf32>
    %cst_166 = arith.constant dense<0.000000e+00> : vector<128xf32>
    %475 = vector.multi_reduction <add>, %474, %cst_166 [0] : vector<16x128xf32> to vector<128xf32>
    %476 = vector.shape_cast %475 : vector<128xf32> to vector<1x128xf32>
    %477 = arith.mulf %474, %474 : vector<16x128xf32>
    %cst_167 = arith.constant dense<0.000000e+00> : vector<128xf32>
    %478 = vector.multi_reduction <add>, %477, %cst_167 [0] : vector<16x128xf32> to vector<128xf32>
    %479 = vector.shape_cast %478 : vector<128xf32> to vector<1x128xf32>
    %cst_168 = arith.constant dense<0.000000e+00> : vector<1x16xf32>
    %480 = tpu.matmul %476, %339, %cst_168 {dimension_numbers = #tpu.dot_dimension_numbers<[1], [0], [0], [1], [0, 0, 1, 1], [], []>} : vector<1x128xf32>, vector<128x16xf32>, vector<1x16xf32> -> vector<1x16xf32>
    %cst_169 = arith.constant 7.812500e-03 : f32
    %481 = vector.broadcast %cst_169 : f32 to vector<1x16xf32>
    %482 = arith.mulf %480, %481 : vector<1x16xf32>
    %cst_170 = arith.constant dense<0.000000e+00> : vector<1x16xf32>
    %483 = tpu.matmul %479, %339, %cst_170 {dimension_numbers = #tpu.dot_dimension_numbers<[1], [0], [0], [1], [0, 0, 1, 1], [], []>} : vector<1x128xf32>, vector<128x16xf32>, vector<1x16xf32> -> vector<1x16xf32>
    %cst_171 = arith.constant 7.812500e-03 : f32
    %484 = vector.broadcast %cst_171 : f32 to vector<1x16xf32>
    %485 = arith.mulf %483, %484 : vector<1x16xf32>
    %486 = arith.mulf %482, %482 : vector<1x16xf32>
    %487 = arith.subf %485, %486 : vector<1x16xf32>
    %cst_172 = arith.constant 0.000000e+00 : f32
    %488 = vector.broadcast %cst_172 : f32 to vector<1x16xf32>
    %489 = arith.maximumf %487, %488 : vector<1x16xf32>
    %cst_173 = arith.constant 9.99999974E-6 : f32
    %490 = vector.broadcast %cst_173 : f32 to vector<1x16xf32>
    %491 = arith.addf %489, %490 : vector<1x16xf32>
    %492 = math.rsqrt %491 : vector<1x16xf32>
    %cst_174 = arith.constant dense<0.000000e+00> : vector<1x128xf32>
    %493 = tpu.matmul %482, %338, %cst_174 {dimension_numbers = #tpu.dot_dimension_numbers<[1], [0], [0], [1], [0, 0, 1, 1], [], []>} : vector<1x16xf32>, vector<16x128xf32>, vector<1x128xf32> -> vector<1x128xf32>
    %cst_175 = arith.constant dense<0.000000e+00> : vector<1x128xf32>
    %494 = tpu.matmul %492, %338, %cst_175 {dimension_numbers = #tpu.dot_dimension_numbers<[1], [0], [0], [1], [0, 0, 1, 1], [], []>} : vector<1x16xf32>, vector<16x128xf32>, vector<1x128xf32> -> vector<1x128xf32>
    %495 = vector.broadcast %493 : vector<1x128xf32> to vector<16x128xf32>
    %496 = arith.subf %474, %495 : vector<16x128xf32>
    %497 = vector.broadcast %494 : vector<1x128xf32> to vector<16x128xf32>
    %498 = arith.mulf %496, %497 : vector<16x128xf32>
    %499 = arith.mulf %440, %498 : vector<16x128xf32>
    %500 = arith.addf %499, %442 : vector<16x128xf32>
    %cst_176 = arith.constant 0.000000e+00 : f32
    %501 = vector.broadcast %cst_176 : f32 to vector<16x128xf32>
    %502 = arith.maximumf %500, %501 : vector<16x128xf32>
    %503 = arith.addf %502, %434 : vector<16x128xf32>
    %504 = arith.truncf %503 : vector<16x128xf32> to vector<16x128xbf16>
    %c0_177 = arith.constant 0 : index
    %c0_178 = arith.constant 0 : index
    %505 = vector.load %arg20[%c0_177, %c0_178] : memref<128x256xbf16, #tpu.memory_space<vmem>>, vector<128x256xbf16>
    %cst_179 = arith.constant dense<0.000000e+00> : vector<16x256xf32>
    %506 = tpu.matmul %504, %505, %cst_179 {dimension_numbers = #tpu.dot_dimension_numbers<[1], [0], [0], [1], [0, 0, 1, 1], [], []>} : vector<16x128xbf16>, vector<128x256xbf16>, vector<16x256xf32> -> vector<16x256xf32>
    %c0_180 = arith.constant 0 : index
    %c0_181 = arith.constant 0 : index
    %507 = vector.load %arg21[%c0_180, %c0_181] : memref<1x256xf32, #tpu.memory_space<vmem>>, vector<1x256xf32>
    %508 = vector.broadcast %507 : vector<1x256xf32> to vector<16x256xf32>
    %509 = arith.addf %506, %508 : vector<16x256xf32>
    %cst_182 = arith.constant 0.000000e+00 : f32
    %510 = vector.broadcast %cst_182 : f32 to vector<16x256xf32>
    %511 = arith.maximumf %509, %510 : vector<16x256xf32>
    %512 = vector.extract_strided_slice %511 {offsets = [0, 0], sizes = [16, 128], strides = [1, 1]} : vector<16x256xf32> to vector<16x128xf32>
    %513 = vector.extract_strided_slice %511 {offsets = [0, 128], sizes = [16, 128], strides = [1, 1]} : vector<16x256xf32> to vector<16x128xf32>
    %514 = arith.maximumf %512, %513 : vector<16x128xf32>
    %515 = vector.extract_strided_slice %514 {offsets = [0, 0], sizes = [16, 64], strides = [1, 1]} : vector<16x128xf32> to vector<16x64xf32>
    %516 = vector.extract_strided_slice %514 {offsets = [0, 64], sizes = [16, 64], strides = [1, 1]} : vector<16x128xf32> to vector<16x64xf32>
    %517 = arith.maximumf %515, %516 : vector<16x64xf32>
    %518 = vector.extract_strided_slice %517 {offsets = [0, 0], sizes = [16, 32], strides = [1, 1]} : vector<16x64xf32> to vector<16x32xf32>
    %519 = vector.extract_strided_slice %517 {offsets = [0, 32], sizes = [16, 32], strides = [1, 1]} : vector<16x64xf32> to vector<16x32xf32>
    %520 = arith.maximumf %518, %519 : vector<16x32xf32>
    %521 = vector.shape_cast %520 : vector<16x32xf32> to vector<2x8x32xf32>
    %cst_183 = arith.constant dense<0xFF800000> : vector<2x32xf32>
    %522 = vector.multi_reduction <maximumf>, %521, %cst_183 [1] : vector<2x8x32xf32> to vector<2x32xf32>
    %523 = arith.truncf %522 : vector<2x32xf32> to vector<2x32xbf16>
    %c0_184 = arith.constant 0 : index
    %c0_185 = arith.constant 0 : index
    %524 = vector.load %arg22[%c0_184, %c0_185] : memref<32x32xbf16, #tpu.memory_space<vmem>>, vector<32x32xbf16>
    %cst_186 = arith.constant dense<0.000000e+00> : vector<2x32xf32>
    %525 = tpu.matmul %523, %524, %cst_186 {dimension_numbers = #tpu.dot_dimension_numbers<[1], [0], [0], [1], [0, 0, 1, 1], [], []>} : vector<2x32xbf16>, vector<32x32xbf16>, vector<2x32xf32> -> vector<2x32xf32>
    %c0_187 = arith.constant 0 : index
    %c0_188 = arith.constant 0 : index
    %526 = vector.load %arg23[%c0_187, %c0_188] : memref<1x32xf32, #tpu.memory_space<vmem>>, vector<1x32xf32>
    %527 = vector.broadcast %526 : vector<1x32xf32> to vector<2x32xf32>
    %528 = arith.addf %525, %527 : vector<2x32xf32>
    %cst_189 = arith.constant 0.000000e+00 : f32
    %529 = vector.broadcast %cst_189 : f32 to vector<2x32xf32>
    %530 = arith.maximumf %528, %529 : vector<2x32xf32>
    %531 = arith.truncf %530 : vector<2x32xf32> to vector<2x32xbf16>
    %c0_190 = arith.constant 0 : index
    %c0_191 = arith.constant 0 : index
    %532 = vector.load %arg24[%c0_190, %c0_191] : memref<32x128xbf16, #tpu.memory_space<vmem>>, vector<32x128xbf16>
    %cst_192 = arith.constant dense<0.000000e+00> : vector<2x128xf32>
    %533 = tpu.matmul %531, %532, %cst_192 {dimension_numbers = #tpu.dot_dimension_numbers<[1], [0], [0], [1], [0, 0, 1, 1], [], []>} : vector<2x32xbf16>, vector<32x128xbf16>, vector<2x128xf32> -> vector<2x128xf32>
    %c0_193 = arith.constant 0 : index
    %c0_194 = arith.constant 0 : index
    %534 = vector.load %arg25[%c0_193, %c0_194] : memref<1x128xf32, #tpu.memory_space<vmem>>, vector<1x128xf32>
    %535 = vector.broadcast %534 : vector<1x128xf32> to vector<2x128xf32>
    %536 = arith.addf %533, %535 : vector<2x128xf32>
    %c0_195 = arith.constant 0 : index
    %c0_196 = arith.constant 0 : index
    %537 = vector.load %arg26[%c0_195, %c0_196] : memref<2x128xf32, #tpu.memory_space<vmem>>, vector<2x128xf32>
    tpu.vector_store %arg26[%c0_195, %c0_196], %536 {strides = array<i32>} : memref<2x128xf32, #tpu.memory_space<vmem>>, vector<2x128xf32>,
    return
  }
}

</mosaic_0001>

<bundles_post_ra>
// kernel: tile.14
= control target key start
LH: loop header
LB: loop body
LE: loop exit
PB: predicated region body
PF: predicated region fallthrough
CT: control target
= control target key end

     0   :  { %vm4_vm0 = vcmask 1047556   ;;  %s209_s14 = smov 96   ;;  %s210_s19 = smov 112   ;;  %vm6_vm1 = vcmask 130048   ;;  %vm25_vm2 = vcmask 1048448   ;;  %vm46_vm3 = vcmask 917248   ;;  %s388_s0 = inlined_call_operand.vmem [shape: f32[16,8,16], index: 0, kind: input, shape index: {}]   ;;  %s389_s1 = inlined_call_operand.vmem [shape: f32[16,128], index: 1, kind: output, shape index: {}]  }
   0x1   :  { %v172_v0 = vld [vmem:[%s388_s0 + $0x6] ss:$8 sm:$0xf]   ;;  %v167_v3 = vld [vmem:[%s388_s0 + $0x7] ss:$8 sm:$0xf]  }
   0x2   :  { %v173_v1 = vld [vmem:[%s388_s0 + $0x6] ss:$8 sm:$0xf0]   ;;  %v168_v4 = vld [vmem:[%s388_s0 + $0x7] ss:$8 sm:$0xf0]  }
   0x3   :  { %v43_v2 = vsel %vm4_vm0, %v173_v1, %v172_v0  ;;  %v22_v5 = vsel %vm4_vm0, %v168_v4, %v167_v3  ;;  %v174_v6 = vld [vmem:[%s388_s0 + $0x46] ss:$8 sm:$0xf]   ;;  %v169_v9 = vld [vmem:[%s388_s0 + $0x47] ss:$8 sm:$0xf]  }
   0x4   :  { %44 = vrot.lane.b32.xlu1 %v43_v2, %s209_s14  ;;  %v175_v7 = vld [vmem:[%s388_s0 + $0x46] ss:$8 sm:$0xf0]   ;;  %23 = vrot.lane.b32.xlu0 %v22_v5, %s210_s19  ;;  %v170_v10 = vld [vmem:[%s388_s0 + $0x47] ss:$8 sm:$0xf0]  }
   0x5   :  { %v53_v8 = vsel %vm4_vm0, %v175_v7, %v174_v6  ;;  %v32_v11 = vsel %vm4_vm0, %v170_v10, %v169_v9  ;;  %v179_v12 = vld [vmem:[%s388_s0 + $0x45] ss:$8 sm:$0xf]   ;;  %v184_v18 = vld [vmem:[%s388_s0 + $0x44] ss:$8 sm:$0xf]  }
   0x6   :  { %v180_v13 = vld [vmem:[%s388_s0 + $0x45] ss:$8 sm:$0xf0]   ;;  %v185_v19 = vld [vmem:[%s388_s0 + $0x44] ss:$8 sm:$0xf0]  }
   0x7   :  { %v177_v14 = vld [vmem:[%s388_s0 + $0x5] ss:$8 sm:$0xf]   ;;  %v74_v16 = vsel %vm4_vm0, %v180_v13, %v179_v12  ;;  %v182_v20 = vld [vmem:[%s388_s0 + $0x4] ss:$8 sm:$0xf]   ;;  %v95_v22 = vsel %vm4_vm0, %v185_v19, %v184_v18 }
   0x8   :  { %54 = vrot.lane.b32.xlu1 %v53_v8, %s209_s14  ;;  %v178_v15 = vld [vmem:[%s388_s0 + $0x5] ss:$8 sm:$0xf0]   ;;  %33 = vrot.lane.b32.xlu0 %v32_v11, %s210_s19  ;;  %v183_v21 = vld [vmem:[%s388_s0 + $0x4] ss:$8 sm:$0xf0]  }
   0x9   :  { %v64_v17 = vsel %vm4_vm0, %v178_v15, %v177_v14  ;;  %s211_s11 = smov 80   ;;  %v85_v23 = vsel %vm4_vm0, %v183_v21, %v182_v20  ;;  %v189_v24 = vld [vmem:[%s388_s0 + $0x43] ss:$8 sm:$0xf]   ;;  %s212_s20 = smov 64   ;;  %vm67_vm4 = vcmask 786048  }
   0xa   :  { %v190_v25 = vld [vmem:[%s388_s0 + $0x43] ss:$8 sm:$0xf0]   ;;  %v194_v28 = vld [vmem:[%s388_s0 + $0x42] ss:$8 sm:$0xf]  }
   0xb   :  { %v187_v26 = vld [vmem:[%s388_s0 + $0x3] ss:$8 sm:$0xf]   ;;  %v195_v29 = vld [vmem:[%s388_s0 + $0x42] ss:$8 sm:$0xf0]   ;;  %v116_v30 = vsel %vm4_vm0, %v190_v25, %v189_v24 }
   0xc   :  { %75 = vrot.lane.b32.xlu1 %v74_v16, %s211_s11  ;;  %65 = vrot.lane.b32.xlu0 %v64_v17, %s211_s11  ;;  %v188_v27 = vld [vmem:[%s388_s0 + $0x3] ss:$8 sm:$0xf0]   ;;  %v192_v31 = vld [vmem:[%s388_s0 + $0x2] ss:$8 sm:$0xf]   ;;  %v137_v40 = vsel %vm4_vm0, %v195_v29, %v194_v28 }
   0xd   :  { %v2_v32 = vld [vmem:[%s388_s0] ss:$8 sm:$0xf]   ;;  %v106_v33 = vsel %vm4_vm0, %v188_v27, %v187_v26  ;;  %v193_v36 = vld [vmem:[%s388_s0 + $0x2] ss:$8 sm:$0xf0]  }
   0xe   :  { %v3_v34 = vld [vmem:[%s388_s0] ss:$8 sm:$0xf0]   ;;  %s213_s8 = smov 48   ;;  %v127_v41 = vsel %vm4_vm0, %v193_v36, %v192_v31  ;;  %s215_s21 = smov 16   ;;  %vm88_vm5 = vcmask 654848  }
   0xf   :  { %v164_v35 = vld [vmem:[%s388_s0 + $0x40] ss:$8 sm:$0xf]   ;;  %v5_v37 = vsel %vm4_vm0, %v3_v34, %v2_v32  ;;  %v199_v42 = vld [vmem:[%s388_s0 + $0x41] ss:$8 sm:$0xf]  }
  0x10   :  { %96 = vrot.lane.b32.xlu1 %v95_v22, %s212_s20  ;;  %86 = vrot.lane.b32.xlu0 %v85_v23, %s212_s20  ;;  %v165_v38 = vld [vmem:[%s388_s0 + $0x40] ss:$8 sm:$0xf0]   ;;  %7 = vst.msk [vmem:[%s389_s1] sm:$0xff] %vm6_vm1, %v5_v37   ;;  %vm109_vm6 = vcmask 523648   ;;  %vm130_vm7 = vcmask 392448  }
  0x11   :  { %v13_v39 = vsel %vm4_vm0, %v165_v38, %v164_v35  ;;  %v200_v43 = vld [vmem:[%s388_s0 + $0x41] ss:$8 sm:$0xf0]   ;;  %vm151_vm8 = vcmask 261248  }
  0x12   :  { %166 = vst.msk [vmem:[%s389_s1 + $0x8] sm:$0xff] %vm6_vm1, %v13_v39   ;;  %v197_v44 = vld [vmem:[%s388_s0 + $0x1] ss:$8 sm:$0xf]   ;;  %v158_v46 = vsel %vm4_vm0, %v200_v43, %v199_v42 }
  0x13   :  { %v198_v45 = vld [vmem:[%s388_s0 + $0x1] ss:$8 sm:$0xf0]   ;;  %s214_s0 = smov 32  }
  0x14   :  { %117 = vrot.lane.b32.xlu1 %v116_v30, %s213_s8  ;;  %107 = vrot.lane.b32.xlu0 %v106_v33, %s213_s8  ;;  %v148_v47 = vsel %vm4_vm0, %v198_v45, %v197_v44 }
  0x18   :  { %138 = vrot.lane.b32.xlu1 %v137_v40, %s214_s0  ;;  %128 = vrot.lane.b32.xlu0 %v127_v41, %s214_s0 }
  0x1c   :  { %159 = vrot.lane.b32.xlu1 %v158_v46, %s215_s21  ;;  %149 = vrot.lane.b32.xlu0 %v148_v47, %s215_s21 }
  0x76   :  { %v45_v48 = vpop.permute.xlu1 %44   ;;  %v24_v49 = vpop.permute.xlu0 %23  }
  0x77   :  { %26 = vst.msk [vmem:[%s389_s1] sm:$0xff] %vm25_vm2, %v24_v49  }
  0x78   :  { %47 = vst.msk [vmem:[%s389_s1] sm:$0xff] %vm46_vm3, %v45_v48  }
  0x7a   :  { %v55_v50 = vpop.permute.xlu1 %54   ;;  %v34_v51 = vpop.permute.xlu0 %33  }
  0x7b   :  { %171 = vst.msk [vmem:[%s389_s1 + $0x8] sm:$0xff] %vm25_vm2, %v34_v51  }
  0x7c   :  { %176 = vst.msk [vmem:[%s389_s1 + $0x8] sm:$0xff] %vm46_vm3, %v55_v50  }
  0x7e   :  { %v76_v52 = vpop.permute.xlu1 %75   ;;  %v66_v53 = vpop.permute.xlu0 %65  }
  0x7f   :  { %181 = vst.msk [vmem:[%s389_s1 + $0x8] sm:$0xff] %vm67_vm4, %v76_v52   ;;  %68 = vst.msk [vmem:[%s389_s1] sm:$0xff] %vm67_vm4, %v66_v53  }
  0x82   :  { %v97_v54 = vpop.permute.xlu1 %96   ;;  %v87_v55 = vpop.permute.xlu0 %86  }
  0x83   :  { %186 = vst.msk [vmem:[%s389_s1 + $0x8] sm:$0xff] %vm88_vm5, %v97_v54   ;;  %89 = vst.msk [vmem:[%s389_s1] sm:$0xff] %vm88_vm5, %v87_v55  }
  0x86   :  { %v118_v56 = vpop.permute.xlu1 %117   ;;  %v108_v57 = vpop.permute.xlu0 %107  }
  0x87   :  { %191 = vst.msk [vmem:[%s389_s1 + $0x8] sm:$0xff] %vm109_vm6, %v118_v56   ;;  %110 = vst.msk [vmem:[%s389_s1] sm:$0xff] %vm109_vm6, %v108_v57  }
  0x8a   :  { %v139_v58 = vpop.permute.xlu1 %138   ;;  %v129_v59 = vpop.permute.xlu0 %128  }
  0x8b   :  { %196 = vst.msk [vmem:[%s389_s1 + $0x8] sm:$0xff] %vm130_vm7, %v139_v58   ;;  %131 = vst.msk [vmem:[%s389_s1] sm:$0xff] %vm130_vm7, %v129_v59  }
  0x8e   :  { %v160_v60 = vpop.permute.xlu1 %159   ;;  %v150_v61 = vpop.permute.xlu0 %149  }
  0x8f   :  { %201 = vst.msk [vmem:[%s389_s1 + $0x8] sm:$0xff] %vm151_vm8, %v160_v60   ;;  %152 = vst.msk [vmem:[%s389_s1] sm:$0xff] %vm151_vm8, %v150_v61  }

// kernel: film_forward.1
= control target key start
LH: loop header
LB: loop body
LE: loop exit
PB: predicated region body
PF: predicated region fallthrough
CT: control target
= control target key end

     0   :  { %s6272_s0 = inlined_call_operand.vmem [shape: bf16[16,16], index: 0, kind: input, shape index: {}]   ;;  %s6273_s1 = inlined_call_operand.vmem [shape: f32[8,2,1], index: 1, kind: input, shape index: {}]   ;;  %s6274_s2 = inlined_call_operand.vmem [shape: bf16[16,96], index: 2, kind: input, shape index: {}]   ;;  %s6275_s3 = inlined_call_operand.vmem [shape: bf16[32,96], index: 3, kind: input, shape index: {}]   ;;  %s6276_s4 = inlined_call_operand.vmem [shape: f32[1,96], index: 4, kind: input, shape index: {}]   ;;  %s6277_s5 = inlined_call_operand.vmem [shape: f32[1,96], index: 5, kind: input, shape index: {}]   ;;  %s6278_s6 = inlined_call_operand.vmem [shape: bf16[32,64], index: 6, kind: input, shape index: {}]   ;;  %s6279_s7 = inlined_call_operand.vmem [shape: f32[1,64], index: 7, kind: input, shape index: {}]   ;;  %s6280_s8 = inlined_call_operand.vmem [shape: f32[16,32], index: 8, kind: input, shape index: {}]   ;;  %s6281_s9 = inlined_call_operand.vmem [shape: f32[16,1], index: 9, kind: input, shape index: {}]   ;;  %s6282_s10 = inlined_call_operand.vmem [shape: f32[16,1], index: 10, kind: input, shape index: {}]   ;;  %s6283_s11 = inlined_call_operand.vmem [shape: f32[16,2], index: 11, kind: input, shape index: {}]   ;;  %s6284_s12 = inlined_call_operand.vmem [shape: f32[16,128], index: 12, kind: input, shape index: {}]   ;;  %s6285_s13 = inlined_call_operand.vmem [shape: f32[128,16], index: 13, kind: input, shape index: {}]   ;;  %s6286_s14 = inlined_call_operand.vmem [shape: bf16[3,32,128], index: 14, kind: input, shape index: {}]   ;;  %s6287_s15 = inlined_call_operand.vmem [shape: f32[1,128], index: 15, kind: input, shape index: {}]   ;;  %s6288_s16 = inlined_call_operand.vmem [shape: bf16[2,128,128], index: 16, kind: input, shape index: {}]   ;;  %s6289_s17 = inlined_call_operand.vmem [shape: f32[2,128], index: 17, kind: input, shape index: {}]   ;;  %s6290_s18 = inlined_call_operand.vmem [shape: bf16[6,128,128], index: 18, kind: input, shape index: {}]   ;;  %s6291_s19 = inlined_call_operand.vmem [shape: f32[2,128], index: 19, kind: input, shape index: {}]   ;;  %s6292_s20 = inlined_call_operand.vmem [shape: bf16[128,256], index: 20, kind: input, shape index: {}]   ;;  %s6293_s21 = inlined_call_operand.vmem [shape: f32[1,256], index: 21, kind: input, shape index: {}]   ;;  %s6294_s22 = inlined_call_operand.vmem [shape: bf16[32,32], index: 22, kind: input, shape index: {}]   ;;  %s6295_s23 = inlined_call_operand.vmem [shape: f32[1,32], index: 23, kind: input, shape index: {}]   ;;  %s6296_s24 = inlined_call_operand.vmem [shape: bf16[32,128], index: 24, kind: input, shape index: {}]   ;;  %s6297_s25 = inlined_call_operand.vmem [shape: f32[1,128], index: 25, kind: input, shape index: {}]   ;;  %s6298_s26 = inlined_call_operand.hbm [shape: f32[2,128], index: 26, kind: output, shape index: {}]  }
   0x1   :  { %6305 = sst [smem:[#allocation5_spill]] %s6272_s0 }
   0x2   :  { %6306 = sst [smem:[#allocation6_spill]] %s6273_s1 }
   0x3   :  { %6307 = sst [smem:[#allocation7_spill]] %s6274_s2 }
   0x4   :  { %6308 = sst [smem:[#allocation8_spill]] %s6275_s3 }
   0x5   :  { %6309 = sst [smem:[#allocation9_spill]] %s6276_s4 }
   0x6   :  { %6310 = sst [smem:[#allocation10_spill]] %s6277_s5 }
   0x7   :  { %6311 = sst [smem:[#allocation11_spill]] %s6278_s6 }
   0x8   :  { %6312 = sst [smem:[#allocation12_spill]] %s6279_s7 }
   0x9   :  { %6313 = sst [smem:[#allocation13_spill]] %s6280_s8 }
   0xa   :  { %6314 = sst [smem:[#allocation14_spill]] %s6281_s9 }
   0xb   :  { %6315 = sst [smem:[#allocation15_spill]] %s6282_s10 }
   0xc   :  { %s6316_s7 = sld [smem:[#allocation7_spill]]  ;;  %v5153_v1 = vmov 0.0   ;;  %s6317_s4 = sld [smem:[#allocation5_spill]]  ;;  %vm5154_vm0 = vmmov 0   ;;  %vm107_vm1 = vcmask 130048   ;;  %v5155_v5 = vmov 0  }
   0xd   :  { %4333 = vmatprep.subr.bf16.mxu0 %v5153_v1  ;;  %4355 = vmatprep.subr.bf16.mxu1 %v5153_v1  ;;  %s6318_s9 = sld [smem:[#allocation8_spill]] }
   0xe   :  { %4335 = vmatprep.mubr.msk.bf16.mxu0 %vm5154_vm0, %v5153_v1  ;;  %4359 = vmatprep.mubr.msk.bf16.mxu1 %vm5154_vm0, %v5153_v1 }
   0xf   :  { %4961 = vset.pattern.permute.xlu1 %v5155_v5  ;;  %4962 = vset.pattern.permute.xlu0 %v5155_v5 }
  0x12   :  { %v4973_v0 = vld [vmem:[%s6316_s7] sm:$0xff]  }
  0x13   :  { %v4974_v2 = vld [vmem:[%s6317_s4] sm:$0xff]   ;;  %4334 = vmatpush3.bf16.msra.mxu0 %v4973_v0  ;;  %v5319_v4 = vld [vmem:[%s6318_s9 + $0x8] sm:$0xff]  }
  0x14   :  { %v5311_v3 = vld [vmem:[%s6318_s9] sm:$0xff]   ;;  %4339 = vmatprep.subr.bf16.mxu0 %v5153_v1 }
  0x15   :  { %4356 = vmatpush3.bf16.msra.mxu1 %v5311_v3 }
  0x16   :  { %4336 = vmatmul.mubr.msk.bf16.vlgmr.msra.gmra.mrb[0].mxu0 %vm107_vm1, %v4974_v2  ;;  %4357 = vmatprep.subr.bf16.mxu1 %v5153_v1 }
  0x17   :  { %4340 = vmatpush3.bf16.msra.mxu0 %v5311_v3  ;;  %4343 = vmatprep.mubr.msk.bf16.mxu0 %vm5154_vm0, %v5153_v1 }
  0x18   :  { %4341 = vmatprep.subr.bf16.mxu0 %v5153_v1 }
  0x19   :  { %4358 = vmatpush3.bf16.msra.mxu1 %v5319_v4 }
  0x1a   :  { %4371 = vmatprep.subr.bf16.mxu1 %v5153_v1 }
  0x1b   :  { %4342 = vmatpush3.bf16.msra.mxu0 %v5319_v4 }
  0x1c   :  { %4347 = vmatprep.subr.bf16.mxu0 %v5153_v1 }
  0x1e   :  { %4344 = vmatmul.mubr.bf16.vlgmr.msra.gmra.mrb[4].mxu0 %v5155_v5 }
  0x1f   :  { %4348 = vmatpush3.bf16.msra.mxu0 %v5311_v3  ;;  %4351 = vmatprep.mubr.msk.bf16.mxu0 %vm5154_vm0, %v5153_v1 }
  0x20   :  { %4349 = vmatprep.subr.bf16.mxu0 %v5153_v1 }
  0x23   :  { %4350 = vmatpush3.bf16.msra.mxu0 %v5319_v4 }
  0x24   :  { %4363 = vmatprep.subr.bf16.mxu0 %v5153_v1 }
  0x25   :  { %31 = vsyncpa [#allocation3], 0  ;;  %s6319_s6 = sld [smem:[#allocation6_spill]]  ;;  %s6320_s3 = sld [smem:[#allocation9_spill]]  ;;  %vm175_vm2 = vcmask 261120   ;;  %vm1280_vm5 = vcmask 15360  }
  0x26   :  { %s6321_s8 = sld [smem:[#allocation10_spill]]  ;;  %s5156_s4 = smov 64   ;;  %vm1287_vm6 = vcmask 1041408   ;;  %vm3705_vm7 = vcmask 1041409  }
  0x27   :  { %s5157_s29 = smov 96   ;;  %s5158_s5 = smov 32  }
  0x28   :  { %s6322_s1 = sld [smem:[#allocation14_spill]]  ;;  %s6323_s7 = sld [smem:[#allocation15_spill]] }
  0x29   :  { %s6324_s28 = sld [smem:[#allocation11_spill]]  ;;  %s6325_s0 = sld [smem:[#allocation13_spill]] }
  0x2a   :  { %s5160_s2 = smov 80  }
  0x2b   :  { %v245_v7 = vld [vmem:[%s6319_s6] sm:$0x3]  ;;  %v3856_v47 = vld [vmem:[%s6319_s6 + $0x2] sm:$0x3] }
  0x2c   :  { %v252_v9 = vsub.f32 1.0, %v245_v7  ;;  %248 = vperm.xlu1 %4961, %v245_v7   ;;  %v3846_v10 = vld [vmem:[%s6320_s3] ss:$0 sm:$0xff]  ;;  %v351_v50 = vsub.f32 1.0, %v3856_v47 }
  0x2d   :  { %v5352_v14 = vld [vmem:[%s6321_s8] ss:$0 sm:$0xff]  ;;  %s6326_s8 = sld [smem:[#allocation12_spill]] }
  0x30   :  { %255 = vperm.xlu1 %4961, %v252_v9  }
  0xab   :  { %v249_v31 = vpop.permute.xlu1 %248 }
  0xaf   :  { %v256_v36 = vpop.permute.xlu1 %255 }
  0xb0   :  { %v258_v38 = vmul.f32 0.0, %v256_v36 }
  0xe9   :  { %v145_v6 = vpop.f32.mrb[0].mxu0 }
  0xea   :  { %v4337_v8 = vpop.f32.mrb[1].mxu0  ;;  %v5356_v20 = vadd.f32 %v3846_v10, %v145_v6 }
  0xeb   :  { %v148_v11 = vpop.f32.mrb[2].mxu0 }
  0xec   :  { %v5347_v12 = vadd.f32 %v3846_v10, %v148_v11  ;;  %v4338_v13 = vpop.f32.mrb[3].mxu0 }
  0xf1   :  { %v213_v15 = vpop.f32.mrb[4].mxu0 }
  0xf2   :  { %v214_v16 = vadd.f32 %v5352_v14, %v213_v15  ;;  %v4345_v17 = vpop.f32.mrb[5].mxu0 }
  0xf3   :  { %v216_v18 = vpop.f32.mrb[6].mxu0 }
  0xf4   :  { %227 = vrot.lane.b32.xlu0 %v214_v16, %s5156_s4  ;;  %v4346_v19 = vpop.f32.mrb[7].mxu0  ;;  %v219_v21 = vadd.f32 %v214_v16, %v5356_v20 }
  0xf6   :  { %v3853_v22 = vmul.f32 -1.442695, %v219_v21 }
  0xf8   :  { %5077 = vpow2.f32 %v3853_v22 }
 0x102   :  { %v5078_v23 = vpop.eup %5077 }
 0x103   :  { %v223_v24 = vadd.f32 1.0, %v5078_v23 }
 0x105   :  { %5079 = vrcp.f32 %v223_v24 }
 0x10f   :  { %v5080_v25 = vpop.eup %5079 }
 0x110   :  { %v237_v32 = vsub.f32 1.0, %v5080_v25  ;;  %v243_v34 = vmul.f32 0.0, %v5080_v25 }
 0x166   :  { %v228_v26 = vpop.permute.xlu0 %227 }
 0x167   :  { %v230_v27 = vmul.f32 %v5080_v25, %v228_v26 }
 0x169   :  { %232 = vrot.lane.b32.xlu0 %v230_v27, %s5156_s4 }
 0x1db   :  { %v233_v28 = vpop.permute.xlu0 %232 }
 0x1dc   :  { %v235_v29 = vadd.f32 %v233_v28, %v5356_v20 }
 0x1de   :  { %5081 = vtanh.f32 %v235_v29 }
 0x1e8   :  { %v5082_v30 = vpop.eup %5081 }
 0x1e9   :  { %239 = vrot.lane.b32.xlu0 %v5082_v30, %s5157_s29 }
 0x25b   :  { %v240_v33 = vpop.permute.xlu0 %239 }
 0x25c   :  { %v242_v35 = vmul.f32 %v240_v33, %v237_v32  ;;  %v3859_v32 = vld [vmem:[%s6319_s6 + $0x4] sm:$0x3] }
 0x25e   :  { %v244_v37 = vadd.f32 %v243_v34, %v242_v35  ;;  %v453_v34 = vsub.f32 1.0, %v3859_v32 }
 0x260   :  { %v251_v39 = vmul.f32 %v249_v31, %v244_v37 }
 0x262   :  { %v259_v40 = vadd.f32 %v258_v38, %v251_v39 }
 0x264   :  { %v260_v41 = vpack.c.bf16 %v259_v40, %v259_v40  ;;  %v334_v0 = vrot.slane %v259_v40, 6 }
 0x266   :  { %262 = vrot.lane.b32.xlu1 %v260_v41, %s5157_s29 }
 0x2d8   :  { %v263_v42 = vpop.permute.xlu1 %262 }
 0x2d9   :  { %4352 = vmatmul.mubr.msk.bf16.vlgmr.msra.gmra.mrb[8].mxu0 %vm175_vm2, %v263_v42 }
 0x2da   :  { %4364 = vmatpush3.bf16.msra.mxu0 %v5311_v3  ;;  %4367 = vmatprep.mubr.msk.bf16.mxu0 %vm5154_vm0, %v5153_v1 }
 0x2db   :  { %4365 = vmatprep.subr.bf16.mxu0 %v5153_v1 }
 0x2de   :  { %4366 = vmatpush3.bf16.msra.mxu0 %v5319_v4 }
 0x2df   :  { %4379 = vmatprep.subr.bf16.mxu0 %v5153_v1 }
 0x3ac   :  { %v301_v43 = vpop.f32.mrb[8].mxu0 }
 0x3ad   :  { %v302_v44 = vadd.f32 %v5352_v14, %v301_v43  ;;  %v4353_v45 = vpop.f32.mrb[9].mxu0 }
 0x3ae   :  { %v304_v46 = vpop.f32.mrb[10].mxu0 }
 0x3af   :  { %v308_v48 = vrot.slane %v302_v44, 6  ;;  %v4354_v49 = vpop.f32.mrb[11].mxu0 }
 0x3b1   :  { %317 = vrot.lane.b32.xlu0 %v308_v48, %s5156_s4  ;;  %v310_v51 = vadd.f32 %v308_v48, %v5356_v20 }
 0x3b3   :  { %v3855_v52 = vmul.f32 -1.442695, %v310_v51 }
 0x3b5   :  { %354 = vperm.xlu0 %4962, %v351_v50   ;;  %5083 = vpow2.f32 %v3855_v52 }
 0x3bf   :  { %v5084_v53 = vpop.eup %5083 }
 0x3c0   :  { %v314_v54 = vadd.f32 1.0, %v5084_v53 }
 0x3c2   :  { %5085 = vrcp.f32 %v314_v54 }
 0x3cc   :  { %v5086_v55 = vpop.eup %5085 }
 0x3cd   :  { %v327_v63 = vsub.f32 1.0, %v5086_v55  ;;  %v336_v6 = vmul.f32 %v5086_v55, %v334_v0 }
 0x423   :  { %v318_v56 = vpop.permute.xlu0 %317 }
 0x424   :  { %v320_v57 = vmul.f32 %v5086_v55, %v318_v56 }
 0x426   :  { %322 = vrot.lane.b32.xlu1 %v320_v57, %s5156_s4 }
 0x434   :  { %v355_v61 = vpop.permute.xlu0 %354 }
 0x435   :  { %v357_v62 = vmul.f32 %v355_v61, %v259_v40 }
 0x498   :  { %v323_v58 = vpop.permute.xlu1 %322 }
 0x499   :  { %v325_v59 = vadd.f32 %v323_v58, %v5356_v20 }
 0x49b   :  { %5087 = vtanh.f32 %v325_v59 }
 0x4a5   :  { %v5088_v60 = vpop.eup %5087 }
 0x4a6   :  { %329 = vrot.lane.b32.xlu1 %v5088_v60, %s5157_s29 }
 0x4aa   :  { %342 = vperm.xlu1 %4961, %v3856_v47  }
 0x4ae   :  { %359 = vrot.lane.b32.xlu1 %v357_v62, %s5157_s29 }
 0x518   :  { %v330_v2 = vpop.permute.xlu1 %329 }
 0x519   :  { %v332_v7 = vmul.f32 %v330_v2, %v327_v63  ;;  %v3862_v2 = vld [vmem:[%s6319_s6 + $0x6] sm:$0x3] }
 0x51b   :  { %v337_v8 = vadd.f32 %v336_v6, %v332_v7  ;;  %v551_v7 = vsub.f32 1.0, %v3862_v2 }
 0x51d   :  { %v346_v9 = vrot.slane %v337_v8, 2 }
 0x51f   :  { %347 = vrot.lane.b32.xlu0 %v346_v9, %s5157_s29 }
 0x529   :  { %v343_v10 = vpop.permute.xlu1 %342 }
 0x52d   :  { %v360_v15 = vpop.permute.xlu1 %359 }
 0x591   :  { %v348_v11 = vpop.permute.xlu0 %347 }
 0x592   :  { %v350_v13 = vmul.f32 %v348_v11, %v343_v10 }
 0x594   :  { %v362_v16 = vadd.f32 %v360_v15, %v350_v13 }
 0x596   :  { %v363_v17 = vpack.c.bf16 %v362_v16, %v362_v16  ;;  %v434_v33 = vrot.slane %v362_v16, 4 }
 0x598   :  { %4360 = vmatmul.mubr.msk.bf16.vlgmr.msra.gmra.mrb[0].mxu1 %vm175_vm2, %v363_v17 }
 0x599   :  { %4372 = vmatpush3.bf16.msra.mxu1 %v5311_v3  ;;  %4375 = vmatprep.mubr.msk.bf16.mxu1 %vm5154_vm0, %v5153_v1 }
 0x59a   :  { %4373 = vmatprep.subr.bf16.mxu1 %v5153_v1 }
 0x59d   :  { %4374 = vmatpush3.bf16.msra.mxu1 %v5319_v4 }
 0x59e   :  { %4387 = vmatprep.subr.bf16.mxu1 %v5153_v1 }
 0x66b   :  { %v401_v18 = vpop.f32.mrb[0].mxu1 }
 0x66c   :  { %v402_v19 = vadd.f32 %v5352_v14, %v401_v18  ;;  %v4361_v21 = vpop.f32.mrb[1].mxu1 }
 0x66d   :  { %v404_v22 = vpop.f32.mrb[2].mxu1 }
 0x66e   :  { %v408_v23 = vrot.slane %v402_v19, 4  ;;  %v4362_v24 = vpop.f32.mrb[3].mxu1 }
 0x670   :  { %417 = vrot.lane.b32.xlu0 %v408_v23, %s5156_s4  ;;  %v410_v25 = vadd.f32 %v408_v23, %v5356_v20 }
 0x672   :  { %v3858_v26 = vmul.f32 -1.442695, %v410_v25 }
 0x674   :  { %5089 = vpow2.f32 %v3858_v26 }
 0x67e   :  { %v5090_v27 = vpop.eup %5089 }
 0x67f   :  { %v414_v28 = vadd.f32 1.0, %v5090_v27 }
 0x681   :  { %5091 = vrcp.f32 %v414_v28  ;;  %v3865_v28 = vld [vmem:[%s6319_s6 + $0x8] sm:$0x3] }
 0x68b   :  { %v5092_v29 = vpop.eup %5091 }
 0x68c   :  { %v427_v39 = vsub.f32 1.0, %v5092_v29 }
 0x6e2   :  { %v418_v30 = vpop.permute.xlu0 %417 }
 0x6e3   :  { %v420_v31 = vmul.f32 %v5092_v29, %v418_v30 }
 0x6e5   :  { %422 = vrot.lane.b32.xlu1 %v420_v31, %s5156_s4 }
 0x6e9   :  { %435 = vrot.lane.b32.xlu1 %v434_v33, %s5158_s5  ;;  %v641_v33 = vsub.f32 1.0, %v3865_v28 }
 0x6ed   :  { %456 = vperm.xlu1 %4961, %v453_v34  }
 0x757   :  { %v423_v35 = vpop.permute.xlu1 %422 }
 0x758   :  { %v425_v36 = vadd.f32 %v423_v35, %v5356_v20 }
 0x75a   :  { %5093 = vtanh.f32 %v425_v36 }
 0x75b   :  { %v436_v38 = vpop.permute.xlu1 %435 }
 0x75c   :  { %v438_v41 = vmul.f32 %v5092_v29, %v436_v38 }
 0x764   :  { %v5094_v37 = vpop.eup %5093 }
 0x765   :  { %429 = vrot.lane.b32.xlu0 %v5094_v37, %s5157_s29 }
 0x769   :  { %444 = vperm.xlu0 %4962, %v3859_v32  }
 0x76c   :  { %v457_v46 = vpop.permute.xlu1 %456 }
 0x76d   :  { %v459_v48 = vmul.f32 %v457_v46, %v362_v16 }
 0x7d7   :  { %v430_v40 = vpop.permute.xlu0 %429 }
 0x7d8   :  { %v432_v42 = vmul.f32 %v430_v40, %v427_v39 }
 0x7da   :  { %v439_v43 = vadd.f32 %v438_v41, %v432_v42 }
 0x7dc   :  { %v448_v44 = vrot.slane %v439_v43, 4 }
 0x7de   :  { %449 = vrot.lane.b32.xlu0 %v448_v44, %s5157_s29 }
 0x7e8   :  { %v445_v45 = vpop.permute.xlu0 %444 }
 0x850   :  { %v450_v47 = vpop.permute.xlu0 %449 }
 0x851   :  { %v452_v49 = vmul.f32 %v450_v47, %v445_v45 }
 0x853   :  { %v460_v50 = vadd.f32 %v459_v48, %v452_v49 }
 0x855   :  { %v461_v51 = vpack.c.bf16 %v460_v50, %v460_v50  ;;  %v532_v6 = vrot.slane %v460_v50, 2 }
 0x857   :  { %4368 = vmatmul.mubr.msk.bf16.vlgmr.msra.gmra.mrb[12].mxu0 %vm175_vm2, %v461_v51 }
 0x858   :  { %4380 = vmatpush3.bf16.msra.mxu0 %v5311_v3  ;;  %4383 = vmatprep.mubr.msk.bf16.mxu0 %vm5154_vm0, %v5153_v1 }
 0x859   :  { %4381 = vmatprep.subr.bf16.mxu0 %v5153_v1 }
 0x85c   :  { %4382 = vmatpush3.bf16.msra.mxu0 %v5319_v4 }
 0x85d   :  { %4395 = vmatprep.subr.bf16.mxu0 %v5153_v1 }
 0x92a   :  { %v499_v52 = vpop.f32.mrb[12].mxu0 }
 0x92b   :  { %v500_v53 = vadd.f32 %v5352_v14, %v499_v52  ;;  %v4369_v54 = vpop.f32.mrb[13].mxu0 }
 0x92c   :  { %v502_v55 = vpop.f32.mrb[14].mxu0 }
 0x92d   :  { %v506_v56 = vrot.slane %v500_v53, 2  ;;  %v4370_v57 = vpop.f32.mrb[15].mxu0 }
 0x92f   :  { %515 = vrot.lane.b32.xlu1 %v506_v56, %s5156_s4  ;;  %v508_v58 = vadd.f32 %v506_v56, %v5356_v20 }
 0x931   :  { %v3861_v59 = vmul.f32 -1.442695, %v508_v58 }
 0x933   :  { %5095 = vpow2.f32 %v3861_v59 }
 0x93d   :  { %v5096_v60 = vpop.eup %5095 }
 0x93e   :  { %v512_v61 = vadd.f32 1.0, %v5096_v60 }
 0x940   :  { %5097 = vrcp.f32 %v512_v61 }
 0x94a   :  { %v5098_v62 = vpop.eup %5097 }
 0x94b   :  { %v525_v13 = vsub.f32 1.0, %v5098_v62 }
 0x9a1   :  { %v516_v63 = vpop.permute.xlu1 %515 }
 0x9a2   :  { %v518_v0 = vmul.f32 %v5098_v62, %v516_v63 }
 0x9a4   :  { %520 = vrot.lane.b32.xlu0 %v518_v0, %s5156_s4 }
 0x9a8   :  { %533 = vrot.lane.b32.xlu0 %v532_v6, %s5158_s5 }
 0x9ac   :  { %554 = vperm.xlu0 %4962, %v551_v7  }
 0xa16   :  { %v521_v8 = vpop.permute.xlu0 %520 }
 0xa17   :  { %v523_v9 = vadd.f32 %v521_v8, %v5356_v20 }
 0xa19   :  { %5099 = vtanh.f32 %v523_v9 }
 0xa1a   :  { %v534_v11 = vpop.permute.xlu0 %533 }
 0xa1b   :  { %v536_v16 = vmul.f32 %v5098_v62, %v534_v11  ;;  %v3868_v62 = vld [vmem:[%s6319_s6 + $0xa] sm:$0x3] }
 0xa1c   :  { %v744_v0 = vsub.f32 1.0, %v3868_v62 }
 0xa23   :  { %v5100_v10 = vpop.eup %5099 }
 0xa24   :  { %527 = vrot.lane.b32.xlu1 %v5100_v10, %s5157_s29 }
 0xa28   :  { %542 = vperm.xlu1 %4961, %v3862_v2  }
 0xa2b   :  { %v555_v22 = vpop.permute.xlu0 %554 }
 0xa2c   :  { %v557_v24 = vmul.f32 %v555_v22, %v460_v50 }
 0xa96   :  { %v528_v15 = vpop.permute.xlu1 %527 }
 0xa97   :  { %v530_v17 = vmul.f32 %v528_v15, %v525_v13 }
 0xa99   :  { %v537_v18 = vadd.f32 %v536_v16, %v530_v17 }
 0xa9b   :  { %v546_v19 = vrot.slane %v537_v18, 6 }
 0xa9d   :  { %547 = vrot.lane.b32.xlu1 %v546_v19, %s5157_s29 }
 0xaa7   :  { %v543_v21 = vpop.permute.xlu1 %542 }
 0xb0f   :  { %v548_v23 = vpop.permute.xlu1 %547 }
 0xb10   :  { %v550_v25 = vmul.f32 %v548_v23, %v543_v21 }
 0xb12   :  { %v558_v20 = vadd.f32 %v557_v24, %v550_v25 }
 0xb14   :  { %v559_v26 = vpack.c.bf16 %v558_v20, %v558_v20 }
 0xb16   :  { %4376 = vmatmul.mubr.msk.bf16.vlgmr.msra.gmra.mrb[4].mxu1 %vm175_vm2, %v559_v26 }
 0xb17   :  { %4388 = vmatpush3.bf16.msra.mxu1 %v5311_v3  ;;  %4391 = vmatprep.mubr.msk.bf16.mxu1 %vm5154_vm0, %v5153_v1 }
 0xb18   :  { %4389 = vmatprep.subr.bf16.mxu1 %v5153_v1 }
 0xb1b   :  { %4390 = vmatpush3.bf16.msra.mxu1 %v5319_v4 }
 0xb1c   :  { %4403 = vmatprep.subr.bf16.mxu1 %v5153_v1 }
 0xbe9   :  { %v597_v27 = vpop.f32.mrb[4].mxu1 }
 0xbea   :  { %v598_v29 = vadd.f32 %v5352_v14, %v597_v27  ;;  %v4377_v30 = vpop.f32.mrb[5].mxu1 }
 0xbeb   :  { %v600_v31 = vpop.f32.mrb[6].mxu1 }
 0xbec   :  { %611 = vrot.lane.b32.xlu0 %v598_v29, %s5156_s4  ;;  %v4378_v32 = vpop.f32.mrb[7].mxu1  ;;  %v603_v34 = vadd.f32 %v598_v29, %v5347_v12 }
 0xbee   :  { %v3864_v35 = vmul.f32 -1.442695, %v603_v34 }
 0xbf0   :  { %644 = vperm.xlu0 %4962, %v641_v33   ;;  %5101 = vpow2.f32 %v3864_v35 }
 0xbfa   :  { %v5102_v36 = vpop.eup %5101 }
 0xbfb   :  { %v607_v37 = vadd.f32 1.0, %v5102_v36 }
 0xbfd   :  { %5103 = vrcp.f32 %v607_v37 }
 0xc07   :  { %v5104_v38 = vpop.eup %5103 }
 0xc08   :  { %v621_v48 = vsub.f32 1.0, %v5104_v38 }
 0xc5e   :  { %v612_v39 = vpop.permute.xlu0 %611 }
 0xc5f   :  { %v614_v40 = vmul.f32 %v5104_v38, %v612_v39 }
 0xc61   :  { %616 = vrot.lane.b32.xlu1 %v614_v40, %s5156_s4 }
 0xc65   :  { %637 = vperm.xlu1 %4961, %v3865_v28  }
 0xc69   :  { %628 = vrot.lane.b32.xlu1 %v558_v20, %s5158_s5 }
 0xc6f   :  { %v645_v44 = vpop.permute.xlu0 %644 }
 0xc70   :  { %v647_v45 = vmul.f32 %v645_v44, %v558_v20  ;;  %v3871_v44 = vld [vmem:[%s6319_s6 + $0xc] sm:$0x3] }
 0xcd3   :  { %v617_v41 = vpop.permute.xlu1 %616 }
 0xcd4   :  { %v619_v42 = vadd.f32 %v617_v41, %v5347_v12 }
 0xcd6   :  { %5105 = vtanh.f32 %v619_v42 }
 0xce0   :  { %v5106_v43 = vpop.eup %5105 }
 0xce1   :  { %623 = vrot.lane.b32.xlu0 %v5106_v43, %s5157_s29 }
 0xce4   :  { %v638_v46 = vpop.permute.xlu1 %637 }
 0xce5   :  { %649 = vrot.lane.b32.xlu0 %v647_v45, %s5158_s5 }
 0xce8   :  { %v629_v47 = vpop.permute.xlu1 %628 }
 0xce9   :  { %v631_v50 = vmul.f32 %v5104_v38, %v629_v47 }
 0xd53   :  { %v624_v49 = vpop.permute.xlu0 %623 }
 0xd54   :  { %v626_v51 = vmul.f32 %v624_v49, %v621_v48 }
 0xd56   :  { %v632_v52 = vadd.f32 %v631_v50, %v626_v51 }
 0xd57   :  { %v650_v54 = vpop.permute.xlu0 %649 }
 0xd58   :  { %v640_v53 = vmul.f32 %v638_v46, %v632_v52  ;;  %v846_v46 = vsub.f32 1.0, %v3871_v44 }
 0xd5a   :  { %v652_v55 = vadd.f32 %v650_v54, %v640_v53 }
 0xd5c   :  { %v653_v56 = vpack.c.bf16 %v652_v55, %v652_v55  ;;  %v727_v18 = vrot.slane %v652_v55, 6 }
 0xd5e   :  { %655 = vrot.lane.b32.xlu1 %v653_v56, %s5157_s29 }
 0xdd0   :  { %v656_v57 = vpop.permute.xlu1 %655 }
 0xdd1   :  { %4384 = vmatmul.mubr.msk.bf16.vlgmr.msra.gmra.mrb[16].mxu0 %vm175_vm2, %v656_v57 }
 0xdd2   :  { %4396 = vmatpush3.bf16.msra.mxu0 %v5311_v3  ;;  %4399 = vmatprep.mubr.msk.bf16.mxu0 %vm5154_vm0, %v5153_v1 }
 0xdd3   :  { %4397 = vmatprep.subr.bf16.mxu0 %v5153_v1 }
 0xdd6   :  { %4398 = vmatpush3.bf16.msra.mxu0 %v5319_v4 }
 0xdd7   :  { %4411 = vmatprep.subr.bf16.mxu0 %v5153_v1 }
 0xea4   :  { %v694_v58 = vpop.f32.mrb[16].mxu0 }
 0xea5   :  { %v695_v59 = vadd.f32 %v5352_v14, %v694_v58  ;;  %v4385_v60 = vpop.f32.mrb[17].mxu0 }
 0xea6   :  { %v697_v61 = vpop.f32.mrb[18].mxu0 }
 0xea7   :  { %v701_v63 = vrot.slane %v695_v59, 6  ;;  %v4386_v3 = vpop.f32.mrb[19].mxu0 }
 0xea9   :  { %710 = vrot.lane.b32.xlu0 %v701_v63, %s5156_s4  ;;  %v703_v4 = vadd.f32 %v701_v63, %v5347_v12 }
 0xeab   :  { %v3867_v2 = vmul.f32 -1.442695, %v703_v4 }
 0xead   :  { %747 = vperm.xlu0 %4962, %v744_v0   ;;  %5107 = vpow2.f32 %v3867_v2 }
 0xeb1   :  { %735 = vperm.xlu0 %4962, %v3868_v62  }
 0xeb7   :  { %v5108_v6 = vpop.eup %5107 }
 0xeb8   :  { %v707_v7 = vadd.f32 1.0, %v5108_v6 }
 0xeba   :  { %5109 = vrcp.f32 %v707_v7 }
 0xec4   :  { %v5110_v8 = vpop.eup %5109 }
 0xec5   :  { %v720_v19 = vsub.f32 1.0, %v5110_v8  ;;  %v729_v22 = vmul.f32 %v5110_v8, %v727_v18 }
 0xf1b   :  { %v711_v9 = vpop.permute.xlu0 %710 }
 0xf1c   :  { %v713_v10 = vmul.f32 %v5110_v8, %v711_v9 }
 0xf1e   :  { %715 = vrot.lane.b32.xlu1 %v713_v10, %s5156_s4 }
 0xf2c   :  { %v748_v11 = vpop.permute.xlu0 %747 }
 0xf2d   :  { %v750_v13 = vmul.f32 %v748_v11, %v652_v55 }
 0xf2f   :  { %752 = vrot.lane.b32.xlu0 %v750_v13, %s5157_s29 }
 0xf30   :  { %v736_v20 = vpop.permute.xlu0 %735 }
 0xf90   :  { %v716_v15 = vpop.permute.xlu1 %715 }
 0xf91   :  { %v718_v16 = vadd.f32 %v716_v15, %v5347_v12 }
 0xf93   :  { %5111 = vtanh.f32 %v718_v16 }
 0xf9d   :  { %v5112_v17 = vpop.eup %5111 }
 0xf9e   :  { %722 = vrot.lane.b32.xlu1 %v5112_v17, %s5157_s29 }
 0xfa1   :  { %v753_v28 = vpop.permute.xlu0 %752 }
0x1010   :  { %v723_v21 = vpop.permute.xlu1 %722 }
0x1011   :  { %v725_v23 = vmul.f32 %v723_v21, %v720_v19  ;;  %v1019_v19 = vld [vmem:[%s6322_s1] sm:$0xff] }
0x1012   :  { %v1021_v21 = vld [vmem:[%s6323_s7] sm:$0xff] }
0x1013   :  { %v730_v24 = vadd.f32 %v729_v22, %v725_v23 }
0x1015   :  { %v739_v25 = vrot.slane %v730_v24, 2 }
0x1017   :  { %740 = vrot.lane.b32.xlu1 %v739_v25, %s5157_s29  ;;  %v4977_v25 = vld [vmem:[%s6324_s28] sm:$0xff]  }
0x1089   :  { %v741_v26 = vpop.permute.xlu1 %740 }
0x108a   :  { %v743_v27 = vmul.f32 %v741_v26, %v736_v20  ;;  %v4978_v20 = vld [vmem:[%s6324_s28 + $0x8] sm:$0xff]  }
0x108c   :  { %v755_v29 = vadd.f32 %v753_v28, %v743_v27  ;;  %v4979_v28 = vld [vmem:[%s6286_s14] sm:$0xff]  }
0x108e   :  { %v756_v30 = vpack.c.bf16 %v755_v29, %v755_v29  ;;  %v827_v45 = vrot.slane %v755_v29, 4 }
0x1090   :  { %4392 = vmatmul.mubr.msk.bf16.vlgmr.msra.gmra.mrb[8].mxu1 %vm175_vm2, %v756_v30 }
0x1091   :  { %4407 = vmatprep.mubr.msk.bf16.mxu1 %vm5154_vm0, %v5153_v1  ;;  %4404 = vmatpush3.bf16.msra.mxu1 %v4977_v25 }
0x1092   :  { %4405 = vmatprep.subr.bf16.mxu1 %v5153_v1 }
0x1095   :  { %4406 = vmatpush3.bf16.msra.mxu1 %v4978_v20 }
0x1096   :  { %4419 = vmatprep.subr.bf16.mxu1 %v5153_v1 }
0x1163   :  { %v794_v31 = vpop.f32.mrb[8].mxu1 }
0x1164   :  { %v795_v32 = vadd.f32 %v5352_v14, %v794_v31  ;;  %v4393_v33 = vpop.f32.mrb[9].mxu1 }
0x1165   :  { %v797_v34 = vpop.f32.mrb[10].mxu1  ;;  %v1020_v33 = vld [vmem:[%s6322_s1 + $0x8] sm:$0xff] }
0x1166   :  { %v801_v35 = vrot.slane %v795_v32, 4  ;;  %v4394_v36 = vpop.f32.mrb[11].mxu1  ;;  %v4981_v34 = vld [vmem:[%s6286_s14 + $0x8] sm:$0xff]  }
0x1168   :  { %810 = vrot.lane.b32.xlu1 %v801_v35, %s5156_s4  ;;  %v803_v37 = vadd.f32 %v801_v35, %v5347_v12  ;;  %v1022_v35 = vld [vmem:[%s6323_s7 + $0x8] sm:$0xff]  ;;  %s5162_s7 = smov [#allocation2]  }
0x116a   :  { %v3870_v38 = vmul.f32 -1.442695, %v803_v37 }
0x116c   :  { %5113 = vpow2.f32 %v3870_v38 }
0x1176   :  { %v5114_v39 = vpop.eup %5113 }
0x1177   :  { %v807_v40 = vadd.f32 1.0, %v5114_v39 }
0x1179   :  { %5115 = vrcp.f32 %v807_v40 }
0x1183   :  { %v5116_v41 = vpop.eup %5115 }
0x1184   :  { %v820_v51 = vsub.f32 1.0, %v5116_v41 }
0x11da   :  { %v811_v42 = vpop.permute.xlu1 %810 }
0x11db   :  { %v813_v43 = vmul.f32 %v5116_v41, %v811_v42  ;;  %v1054_v42 = vlaneseq }
0x11dd   :  { %815 = vrot.lane.b32.xlu0 %v813_v43, %s5156_s4  ;;  %v4980_v43 = vld [vmem:[%s6286_s14 + $0x10] sm:$0xff]  }
0x11e1   :  { %828 = vrot.lane.b32.xlu0 %v827_v45, %s5158_s5  ;;  %v1043_v45 = vld [vmem:[%s6325_s0] sm:$0xff] }
0x11e5   :  { %849 = vperm.xlu0 %4962, %v846_v46   ;;  %v1044_v46 = vld [vmem:[%s6325_s0 + $0x8] sm:$0xff]  ;;  %s5159_s0 = smov 112  }
0x124f   :  { %v816_v47 = vpop.permute.xlu0 %815 }
0x1250   :  { %v818_v48 = vadd.f32 %v816_v47, %v5347_v12  ;;  %v5526_v47 = vshrl.u32 %v1054_v42, 7  ;;  %v4990_v42 = vld [vmem:[%s6288_s16 + $0x28] sm:$0xff]  }
0x1252   :  { %5117 = vtanh.f32 %v818_v48  ;;  %v4982_v48 = vld [vmem:[%s6286_s14 + $0x18] sm:$0xff]   ;;  %vm1056_vm3 = vcmp.lt.s32.totalorder %v5526_v47, 1  ;;  %vm1190_vm4 = vcmp.lt.s32.totalorder %v5526_v47, 7 }
0x1253   :  { %v829_v50 = vpop.permute.xlu0 %828 }
0x1254   :  { %v831_v53 = vmul.f32 %v5116_v41, %v829_v50  ;;  %v1053_v50 = vrot.slane %v1044_v46, 7 }
0x125c   :  { %v5118_v49 = vpop.eup %5117 }
0x125d   :  { %822 = vrot.lane.b32.xlu1 %v5118_v49, %s5157_s29  ;;  %v1052_v49 = vrot.slane %v1043_v45, 7 }
0x1261   :  { %837 = vperm.xlu1 %4961, %v3871_v44  }
0x1264   :  { %v850_v58 = vpop.permute.xlu0 %849 }
0x1265   :  { %v852_v60 = vmul.f32 %v850_v58, %v755_v29  ;;  %v1188_v58 = vrot.slane %v1043_v45, 1 }
0x12cf   :  { %v823_v52 = vpop.permute.xlu1 %822 }
0x12d0   :  { %v825_v54 = vmul.f32 %v823_v52, %v820_v51  ;;  %v1046_v51 = vpack.c.bf16 %v1044_v46, %v1043_v45  ;;  %v1058_v52 = vsel %vm1056_vm3, %v1053_v50, %v1052_v49 }
0x12d2   :  { %v832_v55 = vadd.f32 %v831_v53, %v825_v54  ;;  %v1057_v54 = vsel %vm1056_vm3, %v1052_v49, %v1053_v50 }
0x12d4   :  { %v841_v56 = vrot.slane %v832_v55, 4 }
0x12d6   :  { %842 = vrot.lane.b32.xlu1 %v841_v56, %s5157_s29 }
0x12e0   :  { %v838_v57 = vpop.permute.xlu1 %837 }
0x1348   :  { %v843_v59 = vpop.permute.xlu1 %842 }
0x1349   :  { %v845_v61 = vmul.f32 %v843_v59, %v838_v57  ;;  %v1189_v59 = vrot.slane %v1044_v46, 1 }
0x134b   :  { %v5468_v62 = vadd.f32 %v852_v60, %v845_v61  ;;  %v4983_v60 = vld [vmem:[%s6286_s14 + $0x20] sm:$0xff]  }
0x134d   :  { %v854_v63 = vpack.c.bf16 %v5468_v62, %v5468_v62  ;;  %v925_v17 = vrot.slane %v5468_v62, 2 }
0x134f   :  { %4400 = vmatmul.mubr.msk.bf16.vlgmr.msra.gmra.mrb[20].mxu0 %vm175_vm2, %v854_v63 }
0x1350   :  { %4415 = vmatprep.mubr.msk.bf16.mxu0 %vm5154_vm0, %v5153_v1  ;;  %4412 = vmatpush3.bf16.msra.mxu0 %v4979_v28 }
0x1351   :  { %4413 = vmatprep.subr.bf16.mxu0 %v5153_v1 }
0x1354   :  { %4414 = vmatpush3.bf16.msra.mxu0 %v4981_v34 }
0x1355   :  { %4427 = vmatprep.subr.bf16.mxu0 %v5153_v1 }
0x1422   :  { %v892_v3 = vpop.f32.mrb[20].mxu0 }
0x1423   :  { %v893_v0 = vadd.f32 %v5352_v14, %v892_v3  ;;  %v4401_v4 = vpop.f32.mrb[21].mxu0  ;;  %v3874_v14 = vld [vmem:[%s6319_s6 + $0xe] sm:$0x3]  ;;  %v1191_v3 = vsel %vm1190_vm4, %v1188_v58, %v1189_v59 }
0x1424   :  { %v895_v2 = vpop.f32.mrb[22].mxu0  ;;  %v944_v18 = vsub.f32 1.0, %v3874_v14  ;;  %v4984_v4 = vld [vmem:[%s6286_s14 + $0x28] sm:$0xff]  }
0x1425   :  { %v899_v6 = vrot.slane %v893_v0, 2  ;;  %v4402_v7 = vpop.f32.mrb[23].mxu0 }
0x1427   :  { %908 = vrot.lane.b32.xlu0 %v899_v6, %s5156_s4  ;;  %v901_v8 = vadd.f32 %v899_v6, %v5347_v12 }
0x1429   :  { %v3873_v9 = vmul.f32 -1.442695, %v901_v8  ;;  %v5571_v8 = vld [vmem:[%s6283_s11] sm:$0xff] }
0x142b   :  { %5119 = vpow2.f32 %v3873_v9  ;;  %v3875_v9 = vld [vmem:[%s6326_s8] ss:$0 sm:$0xff] }
0x1435   :  { %v5120_v10 = vpop.eup %5119 }
0x1436   :  { %v905_v11 = vadd.f32 1.0, %v5120_v10 }
0x1438   :  { %5121 = vrcp.f32 %v905_v11 }
0x1442   :  { %v5122_v13 = vpop.eup %5121 }
0x1499   :  { %v909_v15 = vpop.permute.xlu0 %908 }
0x149a   :  { %v911_v16 = vmul.f32 %v5122_v13, %v909_v15 }
0x149c   :  { %913 = vrot.lane.b32.xlu1 %v911_v16, %s5156_s4 }
0x14a0   :  { %926 = vrot.lane.b32.xlu1 %v925_v17, %s5158_s5  ;;  %v5581_v17 = vld [vmem:[%s6283_s11 + $0x8] sm:$0xff] }
0x14a4   :  { %947 = vperm.xlu1 %4961, %v944_v18  }
0x14a8   :  { %1061 = vperm.xlu1 %4961, %v1019_v19  }
0x14ac   :  { %1195 = vperm.xlu1 %4961, %v1021_v21  }
0x150e   :  { %v914_v22 = vpop.permute.xlu1 %913 }
0x150f   :  { %v916_v23 = vadd.f32 %v914_v22, %v5347_v12  ;;  %v918_v12 = vsub.f32 1.0, %v5122_v13 }
0x1511   :  { %5123 = vtanh.f32 %v916_v23 }
0x1512   :  { %v927_v26 = vpop.permute.xlu1 %926 }
0x1513   :  { %v929_v29 = vmul.f32 %v5122_v13, %v927_v26 }
0x151b   :  { %v5124_v24 = vpop.eup %5123 }
0x151c   :  { %920 = vrot.lane.b32.xlu0 %v5124_v24, %s5157_s29 }
0x1520   :  { %935 = vperm.xlu0 %4962, %v3874_v14  }
0x1523   :  { %v948_v37 = vpop.permute.xlu1 %947 }
0x1524   :  { %v950_v39 = vmul.f32 %v948_v37, %v5468_v62  ;;  %v1192_v62 = vsel %vm1190_vm4, %v1189_v59, %v1188_v58  ;;  %v4985_v37 = vld [vmem:[%s6288_s16] sm:$0xff]  }
0x1527   :  { %v5537_v53 = vpop.permute.xlu1 %1061 }
0x1528   :  { %v1069_v56 = vmul.f32 %v5537_v53, %v1058_v52  ;;  %v4993_v52 = vld [vmem:[%s6290_s18 + $0x40] sm:$0xff]  }
0x152b   :  { %v5557_v0 = vpop.permute.xlu1 %1195 }
0x152c   :  { %v1203_v6 = vmul.f32 %v5557_v0, %v1191_v3  ;;  %v5007_v3 = vld [vmem:[%s6290_s18 + $0x78] sm:$0xff]  }
0x158e   :  { %v921_v27 = vpop.permute.xlu0 %920 }
0x158f   :  { %v923_v30 = vmul.f32 %v921_v27, %v918_v12 }
0x1591   :  { %v930_v31 = vadd.f32 %v929_v29, %v923_v30  ;;  %v1025_v30 = vld [vmem:[%s6284_s12] sm:$0xff] }
0x1593   :  { %v939_v32 = vrot.slane %v930_v31, 6  ;;  %v1026_v31 = vld [vmem:[%s6284_s12 + $0x8] sm:$0xff] }
0x1595   :  { %940 = vrot.lane.b32.xlu0 %v939_v32, %s5157_s29 }
0x1599   :  { %1066 = vperm.xlu0 %4962, %v1020_v33   ;;  %v5596_v33 = vpack.c.bf16 %v1026_v31, %v1025_v30 }
0x159d   :  { %1200 = vperm.xlu0 %4962, %v1022_v35  }
0x159f   :  { %v936_v36 = vpop.permute.xlu0 %935 }
0x1607   :  { %v941_v38 = vpop.permute.xlu0 %940 }
0x1608   :  { %v943_v40 = vmul.f32 %v941_v38, %v936_v36  ;;  %v4986_v38 = vld [vmem:[%s6288_s16 + $0x8] sm:$0xff]  }
0x160a   :  { %v951_v41 = vadd.f32 %v950_v39, %v943_v40  ;;  %v4987_v39 = vld [vmem:[%s6288_s16 + $0x10] sm:$0xff]   ;;  %v4988_v40 = vld [vmem:[%s6288_s16 + $0x18] sm:$0xff]  }
0x160c   :  { %v952_v44 = vpack.c.bf16 %v951_v41, %v951_v41  ;;  %v4989_v41 = vld [vmem:[%s6288_s16 + $0x20] sm:$0xff]  }
0x160e   :  { %4408 = vmatmul.mubr.msk.bf16.vlgmr.msra.gmra.mrb[12].mxu1 %vm175_vm2, %v952_v44  ;;  %v4991_v44 = vld [vmem:[%s6288_s16 + $0x30] sm:$0xff]  }
0x160f   :  { %4420 = vmatpush3.bf16.msra.mxu1 %v4980_v43  ;;  %4423 = vmatprep.mubr.msk.bf16.mxu1 %vm5154_vm0, %v5153_v1  ;;  %v3896_v43 = vld [vmem:[%s6287_s15] ss:$0 sm:$0xff] }
0x1610   :  { %4421 = vmatprep.subr.bf16.mxu1 %v5153_v1 }
0x1613   :  { %4422 = vmatpush3.bf16.msra.mxu1 %v4982_v48  ;;  %v4992_v48 = vld [vmem:[%s6288_s16 + $0x38] sm:$0xff]  }
0x1616   :  { %4424 = vmatmul.mubr.msk.bf16.vlgmr.msra.gmra.mrb[16].mxu1 %vm175_vm2, %v1046_v51 }
0x1617   :  { %4437 = vmatprep.mubr.msk.f32.mxu1 %vm1280_vm5, %v5571_v8 }
0x1618   :  { %v5542_v55 = vpop.permute.xlu0 %1066 }
0x1619   :  { %v1070_v57 = vmul.f32 %v5542_v55, %v1057_v54  ;;  %v4995_v54 = vld [vmem:[%s6290_s18 + $0x48] sm:$0xff]  }
0x161b   :  { %v1071_v61 = vpack.c.bf16 %v1070_v57, %v1069_v56  ;;  %v4997_v56 = vld [vmem:[%s6290_s18 + $0x50] sm:$0xff]   ;;  %v4999_v57 = vld [vmem:[%s6290_s18 + $0x58] sm:$0xff]  }
0x161c   :  { %v5552_v63 = vpop.permute.xlu0 %1200 }
0x161d   :  { %4416 = vmatmul.mubr.msk.bf16.vlgmr.msra.gmra.mrb[24].mxu0 %vm175_vm2, %v1071_v61  ;;  %v1204_v2 = vmul.f32 %v5552_v63, %v1192_v62  ;;  %v5003_v61 = vld [vmem:[%s6290_s18 + $0x68] sm:$0xff]   ;;  %v5005_v62 = vld [vmem:[%s6290_s18 + $0x70] sm:$0xff]  }
0x161e   :  { %4428 = vmatpush3.bf16.msra.mxu0 %v4983_v60  ;;  %4431 = vmatprep.mubr.msk.bf16.mxu0 %vm5154_vm0, %v5153_v1  ;;  %v5001_v60 = vld [vmem:[%s6290_s18 + $0x60] sm:$0xff]  }
0x161f   :  { %4429 = vmatprep.subr.bf16.mxu0 %v5153_v1  ;;  %v1205_v7 = vpack.c.bf16 %v1204_v2, %v1203_v6  ;;  %v4994_v2 = vld [vmem:[%s6290_s18] sm:$0xff]  }
0x1622   :  { %4430 = vmatpush3.bf16.msra.mxu0 %v4984_v4 }
0x1623   :  { %4828 = vmatprep.subr.bf16.mxu0 %v5596_v33 }
0x1625   :  { %4432 = vmatmul.mubr.msk.bf16.vlgmr.msra.gmra.mrb[28].mxu0 %vm175_vm2, %v1205_v7  ;;  %v4996_v7 = vld [vmem:[%s6290_s18 + $0x8] sm:$0xff]  }
0x1626   :  { %4830 = vmatpush3.bf16.msra.mxu0 %v5596_v33 }
0x1627   :  { %4832 = vmatprep.subr.bf16.mxu0 %v5596_v33 }
0x16e1   :  { %v1013_v10 = vpop.f32.mrb[12].mxu1 }
0x16e2   :  { %v1014_v11 = vadd.f32 %v3875_v9, %v1013_v10  ;;  %v4409_v13 = vpop.f32.mrb[13].mxu1  ;;  %v4998_v9 = vld [vmem:[%s6290_s18 + $0x10] sm:$0xff]   ;;  %v5000_v10 = vld [vmem:[%s6290_s18 + $0x18] sm:$0xff]  }
0x16e3   :  { %v1016_v15 = vpop.f32.mrb[14].mxu1  ;;  %v5004_v13 = vld [vmem:[%s6290_s18 + $0x28] sm:$0xff]  }
0x16e4   :  { %1448 = vrot.lane.b32.xlu1 %v1014_v11, %s5159_s0  ;;  %v4410_v16 = vpop.f32.mrb[15].mxu1  ;;  %v1279_v14 = vadd.f32 1.0, %v1014_v11  ;;  %v5006_v15 = vld [vmem:[%s6290_s18 + $0x30] sm:$0xff]  }
0x16e5   :  { %v5008_v16 = vld [vmem:[%s6290_s18 + $0x38] sm:$0xff]  }
0x16e6   :  { %2391 = vrot.lane.b32.xlu0 %v1279_v14, %s5157_s29  ;;  %4435 = vmatprep.subr.msk.mxu1 %vm1287_vm6, %v1279_v14 }
0x16e7   :  { %4436 = vmatpush3.msk.msra.mxu1 %vm1287_vm6, %v1279_v14  ;;  %v3907_v14 = vld [vmem:[%s6289_s17] ss:$0 sm:$0xff] }
0x16e8   :  { %2551 = vrot.lane.b32.xlu1 %v1014_v11, %s5160_s2  ;;  %4438 = vmatmul.mubr.msk.f32.vlgmr.msra.gmra.mrb[20].mxu1 %vm1280_vm5, %v5581_v17  ;;  %v5002_v11 = vld [vmem:[%s6290_s18 + $0x20] sm:$0xff]  }
0x16e9   :  { %v1181_v18 = vpop.f32.mrb[16].mxu1  ;;  %4449 = vmatprep.mubr.msk.f32.mxu1 %vm1280_vm5, %v5571_v8 }
0x16ea   :  { %v4425_v19 = vpop.f32.mrb[17].mxu1 }
0x16eb   :  { %v1184_v21 = vpop.f32.mrb[18].mxu1 }
0x16ec   :  { %v4426_v22 = vpop.f32.mrb[19].mxu1 }
0x16f0   :  { %v1125_v23 = vpop.f32.mrb[24].mxu0 }
0x16f1   :  { %v1182_v24 = vadd.f32 %v1181_v18, %v1125_v23  ;;  %v4417_v25 = vpop.f32.mrb[25].mxu0 }
0x16f2   :  { %v1128_v20 = vpop.f32.mrb[26].mxu0 }
0x16f3   :  { %v1185_v26 = vadd.f32 %v1184_v21, %v1128_v20  ;;  %v4418_v12 = vpop.f32.mrb[27].mxu0 }
0x16f8   :  { %v1260_v27 = vpop.f32.mrb[28].mxu0 }
0x16f9   :  { %v1267_v28 = vadd.f32 %v1260_v27, %v1182_v24  ;;  %v4433_v29 = vpop.f32.mrb[29].mxu0 }
0x16fa   :  { %v1263_v32 = vpop.f32.mrb[30].mxu0 }
0x16fb   :  { %v1268_v34 = vadd.f32 %v1263_v32, %v1185_v26  ;;  %v4434_v35 = vpop.f32.mrb[31].mxu0  ;;  %v5640_v46 = vadd.f32 %v3896_v43, %v1267_v28 }
0x16fd   :  { %v5637_v45 = vadd.f32 %v3896_v43, %v1268_v34  ;;  %v1277_v50 = vmax.f32 %v5640_v46, 0.0  ;;  %v5011_v43 = vld [vmem:[%s6290_s18 + $0x90] sm:$0xff]   ;;  %v5031_v46 = vld [vmem:[%s6290_s18 + $0x118] sm:$0xff]  }
0x16ff   :  { %v1278_v49 = vmax.f32 %v5637_v45, 0.0  ;;  %v5029_v45 = vld [vmem:[%s6290_s18 + $0x110] sm:$0xff]  }
0x1701   :  { %v1608_v51 = vpack.c.bf16 %v1278_v49, %v1277_v50 }
0x1756   :  { %v1449_v36 = vpop.permute.xlu1 %1448 }
0x1757   :  { %4447 = vmatprep.subr.msk.mxu1 %vm1287_vm6, %v1449_v36 }
0x1758   :  { %4448 = vmatpush3.msk.msra.mxu1 %vm1287_vm6, %v1449_v36 }
0x1759   :  { %4450 = vmatmul.mubr.msk.f32.vlgmr.msra.gmra.mrb[22].mxu1 %vm1280_vm5, %v5581_v17  ;;  %4459 = vmatprep.subr.bf16.mxu1 %v5153_v1 }
0x175a   :  { %4460 = vmatpush3.bf16.msra.mxu1 %v4985_v37  ;;  %4475 = vmatprep.mubr.msk.bf16.mxu1 %vm5154_vm0, %v5153_v1 }
0x175b   :  { %4461 = vmatprep.subr.bf16.mxu1 %v5153_v1 }
0x175e   :  { %4462 = vmatpush3.bf16.msra.mxu1 %v4986_v38 }
0x175f   :  { %4463 = vmatprep.subr.bf16.mxu1 %v5153_v1 }
0x1762   :  { %4464 = vmatpush3.bf16.msra.mxu1 %v4987_v39  ;;  %v5009_v39 = vld [vmem:[%s6290_s18 + $0x80] sm:$0xff]  }
0x1763   :  { %4465 = vmatprep.subr.bf16.mxu1 %v5153_v1 }
0x1766   :  { %4466 = vmatpush3.bf16.msra.mxu1 %v4988_v40 }
0x1767   :  { %4467 = vmatprep.subr.bf16.mxu1 %v5153_v1 }
0x176a   :  { %4468 = vmatpush3.bf16.msra.mxu1 %v4989_v41 }
0x176b   :  { %4469 = vmatprep.subr.bf16.mxu1 %v5153_v1 }
0x176e   :  { %4470 = vmatpush3.bf16.msra.mxu1 %v4990_v42  ;;  %v5010_v42 = vld [vmem:[%s6290_s18 + $0x88] sm:$0xff]  }
0x176f   :  { %4471 = vmatprep.subr.bf16.mxu1 %v5153_v1 }
0x1772   :  { %4472 = vmatpush3.bf16.msra.mxu1 %v4991_v44  ;;  %v5012_v44 = vld [vmem:[%s6290_s18 + $0x98] sm:$0xff]  }
0x1773   :  { %4473 = vmatprep.subr.bf16.mxu1 %v5153_v1 }
0x1776   :  { %4474 = vmatpush3.bf16.msra.mxu1 %v4992_v48  ;;  %v5013_v48 = vld [vmem:[%s6290_s18 + $0xa0] sm:$0xff]  }
0x1777   :  { %4499 = vmatprep.subr.bf16.mxu1 %v5153_v1 }
0x1779   :  { %4476 = vmatmul.mubr.bf16.vlgmr.msra.gmra.mrb[24].mxu1 %v1608_v51  ;;  %v5014_v51 = vld [vmem:[%s6290_s18 + $0xa8] sm:$0xff]  }
0x177a   :  { %4515 = vmatprep.mubr.msk.bf16.mxu1 %vm5154_vm0, %v5153_v1  ;;  %4500 = vmatpush3.bf16.msra.mxu1 %v4993_v52  ;;  %v5015_v52 = vld [vmem:[%s6290_s18 + $0xb0] sm:$0xff]  }
0x177b   :  { %4501 = vmatprep.subr.bf16.mxu1 %v5153_v1 }
0x177e   :  { %4502 = vmatpush3.bf16.msra.mxu1 %v4995_v54  ;;  %v5016_v54 = vld [vmem:[%s6290_s18 + $0xb8] sm:$0xff]  }
0x177f   :  { %4503 = vmatprep.subr.bf16.mxu1 %v5153_v1 }
0x1782   :  { %4504 = vmatpush3.bf16.msra.mxu1 %v4997_v56 }
0x1783   :  { %4505 = vmatprep.subr.bf16.mxu1 %v5153_v1 }
0x1786   :  { %4506 = vmatpush3.bf16.msra.mxu1 %v4999_v57 }
0x1787   :  { %4507 = vmatprep.subr.bf16.mxu1 %v5153_v1 }
0x178a   :  { %4508 = vmatpush3.bf16.msra.mxu1 %v5001_v60  ;;  %v1029_v60 = vld [vmem:[%s6285_s13 + $0x10] sm:$0xff] }
0x178b   :  { %4509 = vmatprep.subr.bf16.mxu1 %v5153_v1 }
0x178e   :  { %4510 = vmatpush3.bf16.msra.mxu1 %v5003_v61  ;;  %v5161_v61 = vmov 0.0|0.0  }
0x178f   :  { %4511 = vmatprep.subr.bf16.mxu1 %v5153_v1 }
0x1792   :  { %4512 = vmatpush3.bf16.msra.mxu1 %v5005_v62 }
0x1793   :  { %4513 = vmatprep.subr.bf16.mxu1 %v5153_v1 }
0x1796   :  { %4514 = vmatpush3.bf16.msra.mxu1 %v5007_v3  ;;  %v1030_v3 = vld [vmem:[%s6285_s13 + $0x18] sm:$0xff] }
0x1797   :  { %4835 = vmatprep.subr.bf16.mxu1 %v5161_v61 }
0x17bb   :  { %v4439_v58 = vpop.f32.mrb[20].mxu1 }
0x17bc   :  { %v1357_v59 = vpop.f32.mrb[21].mxu1 }
0x17bd   :  { %4444 = vmatprep.mubr.msk.f32.mxu0 %vm107_vm1, %v1357_v59  ;;  %v1028_v59 = vld [vmem:[%s6285_s13 + $0x8] sm:$0xff] }
0x17be   :  { %4445 = vmatmul.mubr.msk.f32.vlgmr.msra.gmra.mrb[32].mxu0 %vm107_vm1, %v4439_v58  ;;  %v1027_v58 = vld [vmem:[%s6285_s13] sm:$0xff] }
0x17bf   :  { %4834 = vmatpush3.bf16.msra.mxu0 %v5596_v33  ;;  %v5792_v62 = vpack.c.bf16 %v1028_v59, %v1027_v58 }
0x17c0   :  { %4479 = vmatprep.subr.bf16.mxu0 %v5153_v1 }
0x182c   :  { %v4451_v4 = vpop.f32.mrb[22].mxu1 }
0x182d   :  { %v1518_v6 = vpop.f32.mrb[23].mxu1 }
0x182e   :  { %4456 = vmatprep.mubr.msk.f32.mxu0 %vm107_vm1, %v1518_v6  ;;  %v1032_v6 = vld [vmem:[%s6285_s13 + $0x28] sm:$0xff] }
0x182f   :  { %4457 = vmatmul.mubr.msk.f32.vlgmr.msra.gmra.mrb[34].mxu0 %vm107_vm1, %v4451_v4  ;;  %v5800_v4 = vpack.c.bf16 %v1030_v3, %v1029_v60 }
0x1830   :  { %4480 = vmatpush3.bf16.msra.mxu0 %v4994_v2  ;;  %4495 = vmatprep.mubr.msk.bf16.mxu0 %vm5154_vm0, %v5153_v1  ;;  %v1031_v2 = vld [vmem:[%s6285_s13 + $0x20] sm:$0xff] }
0x1831   :  { %4481 = vmatprep.subr.bf16.mxu0 %v5153_v1 }
0x1834   :  { %4482 = vmatpush3.bf16.msra.mxu0 %v4996_v7  ;;  %v5812_v7 = vpack.c.bf16 %v1032_v6, %v1031_v2 }
0x1835   :  { %4483 = vmatprep.subr.bf16.mxu0 %v5153_v1 }
0x1838   :  { %4484 = vmatpush3.bf16.msra.mxu0 %v4998_v9  ;;  %v1033_v9 = vld [vmem:[%s6285_s13 + $0x30] sm:$0xff] }
0x1839   :  { %4485 = vmatprep.subr.bf16.mxu0 %v5153_v1 }
0x183c   :  { %4486 = vmatpush3.bf16.msra.mxu0 %v5000_v10  ;;  %v1034_v10 = vld [vmem:[%s6285_s13 + $0x38] sm:$0xff] }
0x183d   :  { %4487 = vmatprep.subr.bf16.mxu0 %v5153_v1 }
0x1840   :  { %4488 = vmatpush3.bf16.msra.mxu0 %v5002_v11  ;;  %v5826_v11 = vpack.c.bf16 %v1034_v10, %v1033_v9 }
0x1841   :  { %4489 = vmatprep.subr.bf16.mxu0 %v5153_v1 }
0x1844   :  { %4490 = vmatpush3.bf16.msra.mxu0 %v5004_v13  ;;  %v1035_v13 = vld [vmem:[%s6285_s13 + $0x40] sm:$0xff] }
0x1845   :  { %4491 = vmatprep.subr.bf16.mxu0 %v5153_v1 }
0x1848   :  { %4492 = vmatpush3.bf16.msra.mxu0 %v5006_v15  ;;  %v1036_v15 = vld [vmem:[%s6285_s13 + $0x48] sm:$0xff] }
0x1849   :  { %4493 = vmatprep.subr.bf16.mxu0 %v5153_v1 }
0x184c   :  { %v1712_v18 = vpop.f32.mrb[24].mxu1  ;;  %4494 = vmatpush3.bf16.msra.mxu0 %v5008_v16  ;;  %v5838_v16 = vpack.c.bf16 %v1036_v15, %v1035_v13 }
0x184d   :  { %v1713_v19 = vadd.f32 %v3907_v14, %v1712_v18  ;;  %v4477_v21 = vpop.f32.mrb[25].mxu1  ;;  %4519 = vmatprep.subr.bf16.mxu0 %v5153_v1  ;;  %v1038_v18 = vld [vmem:[%s6285_s13 + $0x58] sm:$0xff] }
0x184e   :  { %v1715_v22 = vpop.f32.mrb[26].mxu1  ;;  %v1039_v21 = vld [vmem:[%s6285_s13 + $0x60] sm:$0xff] }
0x184f   :  { %v1719_v23 = vmax.f32 %v1713_v19, 0.0  ;;  %v1716_v24 = vadd.f32 %v3907_v14, %v1715_v22  ;;  %v4478_v25 = vpop.f32.mrb[27].mxu1  ;;  %v1037_v14 = vld [vmem:[%s6285_s13 + $0x50] sm:$0xff]  ;;  %v1040_v22 = vld [vmem:[%s6285_s13 + $0x68] sm:$0xff] }
0x1850   :  { %v5850_v19 = vpack.c.bf16 %v1038_v18, %v1037_v14  ;;  %v1042_v25 = vld [vmem:[%s6285_s13 + $0x78] sm:$0xff] }
0x1851   :  { %v1720_v20 = vmax.f32 %v1716_v24, 0.0  ;;  %v1740_v26 = vrot.slane %v1719_v23, 7  ;;  %v1941_v12 = vrot.slane %v1719_v23, 1  ;;  %v1041_v24 = vld [vmem:[%s6285_s13 + $0x70] sm:$0xff] }
0x1853   :  { %v1722_v27 = vpack.c.bf16 %v1720_v20, %v1719_v23  ;;  %v1741_v28 = vrot.slane %v1720_v20, 7  ;;  %v1942_v29 = vrot.slane %v1720_v20, 1  ;;  %v5862_v23 = vpack.c.bf16 %v1040_v22, %v1039_v21 }
0x1854   :  { %v5873_v20 = vpack.c.bf16 %v1042_v25, %v1041_v24  ;;  %v2392_v24 = vpop.permute.xlu0 %2391 }
0x1855   :  { %v1742_v30 = vsel %vm1056_vm3, %v1740_v26, %v1741_v28  ;;  %v1743_v31 = vsel %vm1056_vm3, %v1741_v28, %v1740_v26  ;;  %v1943_v32 = vsel %vm1190_vm4, %v1941_v12, %v1942_v29  ;;  %v1944_v34 = vsel %vm1190_vm4, %v1942_v29, %v1941_v12  ;;  %4516 = vmatmul.mubr.bf16.vlgmr.msra.gmra.mrb[28].mxu1 %v1722_v27 }
0x1856   :  { %v1744_v35 = vmul.f32 %v1743_v31, %v5537_v53  ;;  %v1745_v36 = vmul.f32 %v1742_v30, %v5542_v55  ;;  %v1945_v37 = vmul.f32 %v1943_v32, %v5557_v0  ;;  %v1946_v38 = vmul.f32 %v1944_v34, %v5552_v63  ;;  %4571 = vmatprep.mubr.msk.f32.mxu1 %vm5154_vm0, %v5153_v1 }
0x1857   :  { %4837 = vmatpush3.bf16.msra.mxu1 %v5792_v62 }
0x1858   :  { %v1746_v40 = vpack.c.bf16 %v1745_v36, %v1744_v35  ;;  %v1947_v41 = vpack.c.bf16 %v1946_v38, %v1945_v37  ;;  %4838 = vmatprep.subr.bf16.mxu1 %v5161_v61  ;;  %v3972_v38 = vld [vmem:[%s6291_s19] ss:$0 sm:$0xff] }
0x185a   :  { %4496 = vmatmul.mubr.bf16.vlgmr.msra.gmra.mrb[36].mxu0 %v1746_v40 }
0x185b   :  { %4520 = vmatpush3.bf16.msra.mxu0 %v5009_v39  ;;  %4535 = vmatprep.mubr.msk.bf16.mxu0 %vm5154_vm0, %v5153_v1 }
0x185c   :  { %4521 = vmatprep.subr.bf16.mxu0 %v5153_v1  ;;  %4840 = vmatpush3.bf16.msra.mxu1 %v5800_v4 }
0x185d   :  { %4841 = vmatprep.subr.bf16.mxu1 %v5161_v61 }
0x185f   :  { %4522 = vmatpush3.bf16.msra.mxu0 %v5010_v42 }
0x1860   :  { %4523 = vmatprep.subr.bf16.mxu0 %v5153_v1  ;;  %4843 = vmatpush3.bf16.msra.mxu1 %v5812_v7 }
0x1861   :  { %4844 = vmatprep.subr.bf16.mxu1 %v5161_v61 }
0x1863   :  { %4524 = vmatpush3.bf16.msra.mxu0 %v5011_v43 }
0x1864   :  { %4525 = vmatprep.subr.bf16.mxu0 %v5153_v1  ;;  %4846 = vmatpush3.bf16.msra.mxu1 %v5826_v11 }
0x1865   :  { %4847 = vmatprep.subr.bf16.mxu1 %v5161_v61 }
0x1867   :  { %4526 = vmatpush3.bf16.msra.mxu0 %v5012_v44 }
0x1868   :  { %4527 = vmatprep.subr.bf16.mxu0 %v5153_v1  ;;  %4849 = vmatpush3.bf16.msra.mxu1 %v5838_v16 }
0x1869   :  { %4850 = vmatprep.subr.bf16.mxu1 %v5161_v61 }
0x186b   :  { %4528 = vmatpush3.bf16.msra.mxu0 %v5013_v48 }
0x186c   :  { %4529 = vmatprep.subr.bf16.mxu0 %v5153_v1  ;;  %4852 = vmatpush3.bf16.msra.mxu1 %v5850_v19 }
0x186d   :  { %4853 = vmatprep.subr.bf16.mxu1 %v5161_v61 }
0x186f   :  { %4530 = vmatpush3.bf16.msra.mxu0 %v5014_v51 }
0x1870   :  { %4531 = vmatprep.subr.bf16.mxu0 %v5153_v1  ;;  %4855 = vmatpush3.bf16.msra.mxu1 %v5862_v23 }
0x1871   :  { %4856 = vmatprep.subr.bf16.mxu1 %v5161_v61 }
0x1873   :  { %4532 = vmatpush3.bf16.msra.mxu0 %v5015_v52 }
0x1874   :  { %4533 = vmatprep.subr.bf16.mxu0 %v5153_v1  ;;  %4858 = vmatpush3.bf16.msra.mxu1 %v5873_v20 }
0x1875   :  { %4883 = vmatprep.subr.bf16.mxu1 %v5161_v61 }
0x1877   :  { %4534 = vmatpush3.bf16.msra.mxu0 %v5016_v54 }
0x1878   :  { %4859 = vmatprep.subr.bf16.mxu0 %v5161_v61 }
0x187a   :  { %4536 = vmatmul.mubr.bf16.vlgmr.msra.gmra.mrb[40].mxu0 %v1947_v41 }
0x187b   :  { %4606 = vmatprep.mubr.msk.f32.mxu0 %vm5154_vm0, %v5153_v1  ;;  %4861 = vmatpush3.bf16.msra.mxu0 %v5792_v62 }
0x187c   :  { %4862 = vmatprep.subr.bf16.mxu0 %v5161_v61 }
0x187f   :  { %4864 = vmatpush3.bf16.msra.mxu0 %v5800_v4 }
0x1880   :  { %4865 = vmatprep.subr.bf16.mxu0 %v5161_v61 }
0x1883   :  { %4867 = vmatpush3.bf16.msra.mxu0 %v5812_v7 }
0x1884   :  { %4868 = vmatprep.subr.bf16.mxu0 %v5161_v61 }
0x1887   :  { %4870 = vmatpush3.bf16.msra.mxu0 %v5826_v11 }
0x1888   :  { %4871 = vmatprep.subr.bf16.mxu0 %v5161_v61 }
0x188b   :  { %4873 = vmatpush3.bf16.msra.mxu0 %v5838_v16 }
0x188c   :  { %4874 = vmatprep.subr.bf16.mxu0 %v5161_v61 }
0x188f   :  { %4876 = vmatpush3.bf16.msra.mxu0 %v5850_v19 }
0x1890   :  { %4877 = vmatprep.subr.bf16.mxu0 %v5161_v61 }
0x1891   :  { %v5778_v56 = vpop.f32.mrb[32].mxu0 }
0x1892   :  { %v5780_v57 = vpop.f32.mrb[33].mxu0 }
0x1893   :  { %4879 = vmatpush3.bf16.msra.mxu0 %v5862_v23 }
0x1894   :  { %4880 = vmatprep.subr.bf16.mxu0 %v5161_v61 }
0x1897   :  { %4882 = vmatpush3.bf16.msra.mxu0 %v5873_v20 }
0x1898   :  { %4886 = vmatprep.subr.bf16.mxu0 %v5161_v61 }
0x1902   :  { %v5880_v26 = vpop.f32.mrb[34].mxu0 }
0x1903   :  { %v5882_v12 = vpop.f32.mrb[35].mxu0 }
0x1928   :  { %v1934_v27 = vpop.f32.mrb[28].mxu1 }
0x1929   :  { %v4517_v28 = vpop.f32.mrb[29].mxu1 }
0x192a   :  { %v1937_v29 = vpop.f32.mrb[30].mxu1 }
0x192b   :  { %v4518_v30 = vpop.f32.mrb[31].mxu1 }
0x192d   :  { %v1845_v31 = vpop.f32.mrb[36].mxu0 }
0x192e   :  { %v1935_v32 = vadd.f32 %v1934_v27, %v1845_v31  ;;  %v4497_v34 = vpop.f32.mrb[37].mxu0 }
0x192f   :  { %v1848_v35 = vpop.f32.mrb[38].mxu0  ;;  %v2552_v34 = vpop.permute.xlu1 %2551 }
0x1930   :  { %v1938_v36 = vadd.f32 %v1937_v29, %v1848_v35  ;;  %v4498_v37 = vpop.f32.mrb[39].mxu0 }
0x194d   :  { %v2047_v39 = vpop.f32.mrb[40].mxu0 }
0x194e   :  { %v2054_v40 = vadd.f32 %v2047_v39, %v1935_v32  ;;  %v4537_v41 = vpop.f32.mrb[41].mxu0  ;;  %v5018_v39 = vld [vmem:[%s6288_s16 + $0x48] sm:$0xff]  }
0x194f   :  { %v2050_v42 = vpop.f32.mrb[42].mxu0  ;;  %v5021_v41 = vld [vmem:[%s6288_s16 + $0x60] sm:$0xff]  }
0x1950   :  { %v5887_v43 = vadd.f32 %v3972_v38, %v2054_v40  ;;  %v2055_v44 = vadd.f32 %v2050_v42, %v1938_v36  ;;  %v4538_v48 = vpop.f32.mrb[43].mxu0  ;;  %v5020_v40 = vld [vmem:[%s6288_s16 + $0x58] sm:$0xff]   ;;  %v5022_v42 = vld [vmem:[%s6288_s16 + $0x68] sm:$0xff]  }
0x1951   :  { %v5024_v48 = vld [vmem:[%s6288_s16 + $0x78] sm:$0xff]  }
0x1952   :  { %v5889_v51 = vadd.f32 %v3972_v38, %v2055_v44  ;;  %v2069_v52 = vmul.f32 %v5887_v43, %v5887_v43  ;;  %v5023_v44 = vld [vmem:[%s6288_s16 + $0x70] sm:$0xff]  }
0x1954   :  { %v2062_v54 = vadd.f32 %v5889_v51, %v5887_v43  ;;  %v2070_v58 = vmul.f32 %v5889_v51, %v5889_v51 }
0x1956   :  { %v2063_v59 = vrot.slane %v2062_v54, 4  ;;  %v2071_v60 = vadd.f32 %v2070_v58, %v2069_v52 }
0x1958   :  { %v2064_v3 = vadd.f32 %v2063_v59, %v2062_v54  ;;  %v2072_v2 = vrot.slane %v2071_v60, 4 }
0x195a   :  { %v2065_v6 = vrot.slane %v2064_v3, 2  ;;  %v2073_v9 = vadd.f32 %v2072_v2, %v2071_v60 }
0x195c   :  { %v2066_v10 = vadd.f32 %v2065_v6, %v2064_v3  ;;  %v2074_v13 = vrot.slane %v2073_v9, 2  ;;  %v5026_v3 = vld [vmem:[%s6290_s18 + $0xc0] sm:$0xff]   ;;  %v5965_v6 = vsub.s32 0, %v5526_v47 }
0x195e   :  { %v2067_v15 = vrot.slane %v2066_v10, 1  ;;  %v2075_v14 = vadd.f32 %v2074_v13, %v2073_v9  ;;  %v5028_v9 = vld [vmem:[%s6290_s18 + $0xc8] sm:$0xff]   ;;  %v5030_v13 = vld [vmem:[%s6290_s18 + $0xd0] sm:$0xff]  }
0x1960   :  { %v2068_v18 = vadd.f32 %v2067_v15, %v2066_v10  ;;  %v2076_v21 = vrot.slane %v2075_v14, 1 }
0x1962   :  { %4572 = vmatmul.mubr.f32.vlgmr.msra.gmra.mrb[32].mxu1 %v2068_v18  ;;  %v2077_v22 = vadd.f32 %v2076_v21, %v2075_v14 }
0x1963   :  { %4885 = vmatpush3.bf16.msra.mxu1 %v5596_v33  ;;  %4613 = vmatprep.mubr.msk.f32.mxu1 %vm5154_vm0, %v5153_v1 }
0x1964   :  { %4623 = vmatprep.subr.msk.mxu1 %vm1287_vm6, %v2392_v24  ;;  %4607 = vmatmul.mubr.f32.vlgmr.msra.gmra.mrb[44].mxu0 %v2077_v22 }
0x1965   :  { %4888 = vmatpush3.bf16.msra.mxu0 %v5596_v33  ;;  %4620 = vmatprep.mubr.msk.f32.mxu0 %vm5154_vm0, %v5153_v1 }
0x1966   :  { %4890 = vmatprep.subr.bf16.mxu0 %v5596_v33 }
0x1a35   :  { %v2144_v25 = vpop.f32.mrb[32].mxu1 }
0x1a36   :  { %v2148_v27 = vmul.f32 0.0078125, %v2144_v25  ;;  %v4573_v28 = vpop.f32.mrb[33].mxu1 }
0x1a37   :  { %v2215_v29 = vpop.f32.mrb[44].mxu0 }
0x1a38   :  { %v2220_v30 = vmul.f32 %v2148_v27, %v2148_v27  ;;  %v2219_v31 = vmul.f32 0.0078125, %v2215_v29  ;;  %v4608_v32 = vpop.f32.mrb[45].mxu0  ;;  %4614 = vmatmul.mubr.msk.f32.vlgmr.msra.gmra.mrb[34].mxu1 %vm107_vm1, %v2148_v27 }
0x1a39   :  { %4624 = vmatpush3.msk.msra.mxu1 %vm1287_vm6, %v2392_v24  ;;  %4625 = vmatprep.mubr.msk.f32.mxu1 %vm1280_vm5, %v5571_v8  ;;  %v5032_v24 = vld [vmem:[%s6290_s18 + $0xd8] sm:$0xff]  }
0x1a3a   :  { %v2221_v35 = vsub.f32 %v2219_v31, %v2220_v30  ;;  %4635 = vmatprep.subr.msk.mxu1 %vm1287_vm6, %v2552_v34 }
0x1a3c   :  { %v2222_v36 = vmax.f32 %v2221_v35, 0.0  ;;  %4626 = vmatmul.mubr.msk.f32.vlgmr.msra.gmra.mrb[36].mxu1 %vm1280_vm5, %v5581_v17  ;;  %v5036_v35 = vld [vmem:[%s6290_s18 + $0xe8] sm:$0xff]  }
0x1a3d   :  { %4636 = vmatpush3.msk.msra.mxu1 %vm1287_vm6, %v2552_v34  ;;  %4637 = vmatprep.mubr.msk.f32.mxu1 %vm1280_vm5, %v5571_v8  ;;  %v5017_v8 = vld [vmem:[%s6288_s16 + $0x40] sm:$0xff]  }
0x1a3e   :  { %v2223_v37 = vadd.f32 1e-05, %v2222_v36  ;;  %4647 = vmatprep.subr.bf16.mxu1 %v5153_v1  ;;  %v5025_v34 = vld [vmem:[%s6290_s18 + $0x100] sm:$0xff]   ;;  %v5037_v36 = vld [vmem:[%s6290_s18 + $0x130] sm:$0xff]  }
0x1a40   :  { %5125 = vrsqrt.f32 %v2223_v37  ;;  %4638 = vmatmul.mubr.msk.f32.vlgmr.msra.gmra.mrb[38].mxu1 %vm1280_vm5, %v5581_v17  ;;  %v5019_v17 = vld [vmem:[%s6288_s16 + $0x50] sm:$0xff]  }
0x1a41   :  { %4663 = vmatprep.mubr.msk.bf16.mxu1 %vm5154_vm0, %v5153_v1  ;;  %4648 = vmatpush3.bf16.msra.mxu1 %v5017_v8  ;;  %v5038_v37 = vld [vmem:[%s6290_s18 + $0xf0] sm:$0xff]   ;;  %v5040_v8 = vld [vmem:[%s6290_s18 + $0xf8] sm:$0xff]  }
0x1a42   :  { %4649 = vmatprep.subr.bf16.mxu1 %v5153_v1 }
0x1a45   :  { %4650 = vmatpush3.bf16.msra.mxu1 %v5018_v39 }
0x1a46   :  { %4651 = vmatprep.subr.bf16.mxu1 %v5153_v1 }
0x1a49   :  { %4652 = vmatpush3.bf16.msra.mxu1 %v5019_v17 }
0x1a4a   :  { %v5126_v38 = vpop.eup %5125  ;;  %4653 = vmatprep.subr.bf16.mxu1 %v5153_v1 }
0x1a4b   :  { %4621 = vmatmul.mubr.msk.f32.vlgmr.msra.gmra.mrb[46].mxu0 %vm107_vm1, %v5126_v38  ;;  %v5039_v38 = vld [vmem:[%s6290_s18 + $0x138] sm:$0xff]  }
0x1a4c   :  { %4892 = vmatpush3.bf16.msra.mxu0 %v5596_v33 }
0x1a4d   :  { %4894 = vmatprep.subr.bf16.mxu0 %v5596_v33  ;;  %4654 = vmatpush3.bf16.msra.mxu1 %v5020_v40 }
0x1a4e   :  { %4655 = vmatprep.subr.bf16.mxu1 %v5153_v1 }
0x1a51   :  { %4656 = vmatpush3.bf16.msra.mxu1 %v5021_v41 }
0x1a52   :  { %4657 = vmatprep.subr.bf16.mxu1 %v5153_v1 }
0x1a55   :  { %4658 = vmatpush3.bf16.msra.mxu1 %v5022_v42  ;;  %v4001_v42 = vld [vmem:[%s6289_s17 + $0x1] ss:$0 sm:$0xff] }
0x1a56   :  { %4659 = vmatprep.subr.bf16.mxu1 %v5153_v1 }
0x1a59   :  { %4660 = vmatpush3.bf16.msra.mxu1 %v5023_v44 }
0x1a5a   :  { %4661 = vmatprep.subr.bf16.mxu1 %v5153_v1 }
0x1a5d   :  { %4662 = vmatpush3.bf16.msra.mxu1 %v5024_v48 }
0x1a5e   :  { %4687 = vmatprep.subr.bf16.mxu1 %v5153_v1 }
0x1b0b   :  { %v2294_v52 = vpop.f32.mrb[34].mxu1 }
0x1b0c   :  { %v4615_v54 = vpop.f32.mrb[35].mxu1  ;;  %v2374_v10 = vrot.slane %v2294_v52, %v5965_v6 }
0x1b0e   :  { %v2375_v14 = vsub.f32 %v5887_v43, %v2374_v10  ;;  %v2376_v18 = vsub.f32 %v5889_v51, %v2374_v10  ;;  %v5034_v43 = vld [vmem:[%s6290_s18 + $0xe0] sm:$0xff]  }
0x1b0f   :  { %v4627_v58 = vpop.f32.mrb[36].mxu1 }
0x1b10   :  { %v2461_v59 = vpop.f32.mrb[37].mxu1 }
0x1b11   :  { %4632 = vmatprep.mubr.msk.f32.mxu0 %vm107_vm1, %v2461_v59 }
0x1b12   :  { %4633 = vmatmul.mubr.msk.f32.vlgmr.msra.gmra.mrb[48].mxu0 %vm107_vm1, %v4627_v58 }
0x1b13   :  { %v4639_v60 = vpop.f32.mrb[38].mxu1  ;;  %4896 = vmatpush3.bf16.msra.mxu0 %v5596_v33 }
0x1b14   :  { %v2621_v2 = vpop.f32.mrb[39].mxu1  ;;  %4667 = vmatprep.subr.bf16.mxu0 %v5153_v1 }
0x1b15   :  { %4644 = vmatprep.mubr.msk.f32.mxu0 %vm107_vm1, %v2621_v2 }
0x1b16   :  { %4645 = vmatmul.mubr.msk.f32.vlgmr.msra.gmra.mrb[50].mxu0 %vm107_vm1, %v4639_v60 }
0x1b17   :  { %4668 = vmatpush3.bf16.msra.mxu0 %v5026_v3  ;;  %4683 = vmatprep.mubr.msk.bf16.mxu0 %vm5154_vm0, %v5153_v1 }
0x1b18   :  { %4669 = vmatprep.subr.bf16.mxu0 %v5153_v1 }
0x1b1b   :  { %4670 = vmatpush3.bf16.msra.mxu0 %v5028_v9 }
0x1b1c   :  { %4671 = vmatprep.subr.bf16.mxu0 %v5153_v1 }
0x1b1e   :  { %v2367_v15 = vpop.f32.mrb[46].mxu0 }
0x1b1f   :  { %v2380_v21 = vrot.slane %v2367_v15, %v5965_v6  ;;  %v4622_v22 = vpop.f32.mrb[47].mxu0  ;;  %4672 = vmatpush3.bf16.msra.mxu0 %v5030_v13 }
0x1b20   :  { %4673 = vmatprep.subr.bf16.mxu0 %v5153_v1 }
0x1b21   :  { %v2381_v25 = vmul.f32 %v2380_v21, %v2375_v14  ;;  %v2382_v27 = vmul.f32 %v2380_v21, %v2376_v18 }
0x1b23   :  { %v2383_v28 = vmul.f32 %v2381_v25, %v5780_v57  ;;  %v2384_v29 = vmul.f32 %v5778_v56, %v2382_v27  ;;  %4674 = vmatpush3.bf16.msra.mxu0 %v5032_v24 }
0x1b24   :  { %4675 = vmatprep.subr.bf16.mxu0 %v5153_v1 }
0x1b25   :  { %v2385_v51 = vadd.f32 %v2383_v28, %v5882_v12  ;;  %v2386_v30 = vadd.f32 %v5880_v26, %v2384_v29  ;;  %v5027_v12 = vld [vmem:[%s6290_s18 + $0x108] sm:$0xff]   ;;  %v5041_v29 = vld [vmem:[%s6290_s18 + $0x140] sm:$0xff]  }
0x1b27   :  { %v2387_v31 = vmax.f32 %v2385_v51, 0.0  ;;  %v2388_v32 = vmax.f32 %v2386_v30, 0.0  ;;  %4676 = vmatpush3.bf16.msra.mxu0 %v5034_v43  ;;  %v5046_v30 = vld [vmem:[%s6290_s18 + $0x168] sm:$0xff]  }
0x1b28   :  { %4677 = vmatprep.subr.bf16.mxu0 %v5153_v1 }
0x1b29   :  { %v5996_v57 = vadd.f32 %v2387_v31, %v1277_v50  ;;  %v6000_v56 = vadd.f32 %v2388_v32, %v1278_v49  ;;  %v5033_v49 = vld [vmem:[%s6290_s18 + $0x120] sm:$0xff]   ;;  %v5035_v50 = vld [vmem:[%s6290_s18 + $0x128] sm:$0xff]   ;;  %v5047_v31 = vld [vmem:[%s6290_s18 + $0x170] sm:$0xff]  }
0x1b2a   :  { %v5048_v32 = vld [vmem:[%s6290_s18 + $0x178] sm:$0xff]  }
0x1b2b   :  { %v2711_v26 = vpack.c.bf16 %v6000_v56, %v5996_v57  ;;  %4678 = vmatpush3.bf16.msra.mxu0 %v5036_v35 }
0x1b2c   :  { %4679 = vmatprep.subr.bf16.mxu0 %v5153_v1 }
0x1b2d   :  { %4664 = vmatmul.mubr.bf16.vlgmr.msra.gmra.mrb[40].mxu1 %v2711_v26 }
0x1b2e   :  { %4688 = vmatpush3.bf16.msra.mxu1 %v5025_v34  ;;  %4703 = vmatprep.mubr.msk.bf16.mxu1 %vm5154_vm0, %v5153_v1 }
0x1b2f   :  { %4689 = vmatprep.subr.bf16.mxu1 %v5153_v1  ;;  %4680 = vmatpush3.bf16.msra.mxu0 %v5038_v37 }
0x1b30   :  { %4681 = vmatprep.subr.bf16.mxu0 %v5153_v1 }
0x1b32   :  { %4690 = vmatpush3.bf16.msra.mxu1 %v5027_v12 }
0x1b33   :  { %4691 = vmatprep.subr.bf16.mxu1 %v5153_v1  ;;  %4682 = vmatpush3.bf16.msra.mxu0 %v5040_v8 }
0x1b34   :  { %4707 = vmatprep.subr.bf16.mxu0 %v5153_v1 }
0x1b36   :  { %4692 = vmatpush3.bf16.msra.mxu1 %v5029_v45 }
0x1b37   :  { %4693 = vmatprep.subr.bf16.mxu1 %v5153_v1 }
0x1b3a   :  { %4694 = vmatpush3.bf16.msra.mxu1 %v5031_v46 }
0x1b3b   :  { %4695 = vmatprep.subr.bf16.mxu1 %v5153_v1 }
0x1b3e   :  { %4696 = vmatpush3.bf16.msra.mxu1 %v5033_v49 }
0x1b3f   :  { %4697 = vmatprep.subr.bf16.mxu1 %v5153_v1 }
0x1b42   :  { %4698 = vmatpush3.bf16.msra.mxu1 %v5035_v50 }
0x1b43   :  { %4699 = vmatprep.subr.bf16.mxu1 %v5153_v1 }
0x1b46   :  { %4700 = vmatpush3.bf16.msra.mxu1 %v5037_v36 }
0x1b47   :  { %4701 = vmatprep.subr.bf16.mxu1 %v5153_v1 }
0x1b4a   :  { %4702 = vmatpush3.bf16.msra.mxu1 %v5039_v38 }
0x1b4b   :  { %4897 = vmatprep.subr.bf16.mxu1 %v5161_v61 }
0x1be5   :  { %v6050_v39 = vpop.f32.mrb[48].mxu0 }
0x1be6   :  { %v6052_v17 = vpop.f32.mrb[49].mxu0 }
0x1be9   :  { %v6054_v40 = vpop.f32.mrb[50].mxu0 }
0x1bea   :  { %v6056_v41 = vpop.f32.mrb[51].mxu0 }
0x1c00   :  { %v2816_v44 = vpop.f32.mrb[40].mxu1 }
0x1c01   :  { %v2817_v48 = vadd.f32 %v4001_v42, %v2816_v44  ;;  %v4665_v52 = vpop.f32.mrb[41].mxu1 }
0x1c02   :  { %v2819_v54 = vpop.f32.mrb[42].mxu1 }
0x1c03   :  { %v2823_v58 = vmax.f32 %v2817_v48, 0.0  ;;  %v2820_v59 = vadd.f32 %v4001_v42, %v2819_v54  ;;  %v4666_v60 = vpop.f32.mrb[43].mxu1 }
0x1c05   :  { %v2824_v3 = vmax.f32 %v2820_v59, 0.0  ;;  %v2844_v2 = vrot.slane %v2823_v58, 7  ;;  %v3046_v9 = vrot.slane %v2823_v58, 1 }
0x1c07   :  { %v2826_v10 = vpack.c.bf16 %v2824_v3, %v2823_v58  ;;  %v2845_v13 = vrot.slane %v2824_v3, 7  ;;  %v3047_v15 = vrot.slane %v2824_v3, 1 }
0x1c09   :  { %v2846_v14 = vsel %vm1056_vm3, %v2844_v2, %v2845_v13  ;;  %v2847_v18 = vsel %vm1056_vm3, %v2845_v13, %v2844_v2  ;;  %v3048_v21 = vsel %vm1190_vm4, %v3046_v9, %v3047_v15  ;;  %v3049_v22 = vsel %vm1190_vm4, %v3047_v15, %v3046_v9  ;;  %4704 = vmatmul.mubr.bf16.vlgmr.msra.gmra.mrb[44].mxu1 %v2826_v10 }
0x1c0a   :  { %v2848_v24 = vmul.f32 %v2847_v18, %v5537_v53  ;;  %v2849_v25 = vmul.f32 %v2846_v14, %v5542_v55  ;;  %v3050_v27 = vmul.f32 %v3048_v21, %v5557_v0  ;;  %v3051_v28 = vmul.f32 %v3049_v22, %v5552_v63  ;;  %4899 = vmatpush3.bf16.msra.mxu1 %v5792_v62  ;;  %v5042_v53 = vld [vmem:[%s6290_s18 + $0x148] sm:$0xff]   ;;  %v5043_v55 = vld [vmem:[%s6290_s18 + $0x150] sm:$0xff]   ;;  %v5044_v63 = vld [vmem:[%s6290_s18 + $0x158] sm:$0xff]  }
0x1c0b   :  { %4900 = vmatprep.subr.bf16.mxu1 %v5161_v61  ;;  %4759 = vmatprep.mubr.msk.f32.mxu1 %vm5154_vm0, %v5153_v1  ;;  %v5045_v0 = vld [vmem:[%s6290_s18 + $0x160] sm:$0xff]  }
0x1c0c   :  { %v2850_v43 = vpack.c.bf16 %v2849_v25, %v2848_v24  ;;  %v3052_v51 = vpack.c.bf16 %v3051_v28, %v3050_v27 }
0x1c0e   :  { %4684 = vmatmul.mubr.bf16.vlgmr.msra.gmra.mrb[52].mxu0 %v2850_v43  ;;  %4902 = vmatpush3.bf16.msra.mxu1 %v5800_v4 }
0x1c0f   :  { %4708 = vmatpush3.bf16.msra.mxu0 %v5041_v29  ;;  %4723 = vmatprep.mubr.msk.bf16.mxu0 %vm5154_vm0, %v5153_v1 }
0x1c10   :  { %4709 = vmatprep.subr.bf16.mxu0 %v5153_v1  ;;  %4903 = vmatprep.subr.bf16.mxu1 %v5161_v61 }
0x1c12   :  { %4905 = vmatpush3.bf16.msra.mxu1 %v5812_v7 }
0x1c13   :  { %4710 = vmatpush3.bf16.msra.mxu0 %v5042_v53  ;;  %4906 = vmatprep.subr.bf16.mxu1 %v5161_v61  ;;  %v5049_v53 = vld [vmem:[%s6292_s20] ss:$8 sps:$4 sm:$0xff]  }
0x1c14   :  { %4711 = vmatprep.subr.bf16.mxu0 %v5153_v1 }
0x1c16   :  { %4908 = vmatpush3.bf16.msra.mxu1 %v5826_v11 }
0x1c17   :  { %4712 = vmatpush3.bf16.msra.mxu0 %v5043_v55  ;;  %4909 = vmatprep.subr.bf16.mxu1 %v5161_v61  ;;  %v5054_v55 = vld [vmem:[%s6292_s20 + $0x14] ss:$8 sps:$4 sm:$0xff]  }
0x1c18   :  { %4713 = vmatprep.subr.bf16.mxu0 %v5153_v1 }
0x1c1a   :  { %4911 = vmatpush3.bf16.msra.mxu1 %v5838_v16 }
0x1c1b   :  { %4714 = vmatpush3.bf16.msra.mxu0 %v5044_v63  ;;  %4912 = vmatprep.subr.bf16.mxu1 %v5161_v61  ;;  %v5057_v63 = vld [vmem:[%s6292_s20 + $0x24] ss:$8 sps:$4 sm:$0xff]  }
0x1c1c   :  { %4715 = vmatprep.subr.bf16.mxu0 %v5153_v1 }
0x1c1e   :  { %4914 = vmatpush3.bf16.msra.mxu1 %v5850_v19 }
0x1c1f   :  { %4716 = vmatpush3.bf16.msra.mxu0 %v5045_v0  ;;  %4915 = vmatprep.subr.bf16.mxu1 %v5161_v61  ;;  %v5055_v0 = vld [vmem:[%s6292_s20 + $0x20] ss:$8 sps:$4 sm:$0xff]  }
0x1c20   :  { %4717 = vmatprep.subr.bf16.mxu0 %v5153_v1 }
0x1c22   :  { %4917 = vmatpush3.bf16.msra.mxu1 %v5862_v23 }
0x1c23   :  { %4718 = vmatpush3.bf16.msra.mxu0 %v5046_v30  ;;  %4918 = vmatprep.subr.bf16.mxu1 %v5161_v61  ;;  %v5060_v30 = vld [vmem:[%s6292_s20 + $0x34] ss:$8 sps:$4 sm:$0xff]  }
0x1c24   :  { %4719 = vmatprep.subr.bf16.mxu0 %v5153_v1 }
0x1c26   :  { %4920 = vmatpush3.bf16.msra.mxu1 %v5873_v20 }
0x1c27   :  { %4720 = vmatpush3.bf16.msra.mxu0 %v5047_v31  ;;  %4945 = vmatprep.subr.bf16.mxu1 %v5161_v61  ;;  %v5058_v31 = vld [vmem:[%s6292_s20 + $0x30] ss:$8 sps:$4 sm:$0xff]  }
0x1c28   :  { %4721 = vmatprep.subr.bf16.mxu0 %v5153_v1 }
0x1c2b   :  { %4722 = vmatpush3.bf16.msra.mxu0 %v5048_v32  ;;  %v5063_v32 = vld [vmem:[%s6292_s20 + $0x44] ss:$8 sps:$4 sm:$0xff]  }
0x1c2c   :  { %4921 = vmatprep.subr.bf16.mxu0 %v5161_v61 }
0x1c2e   :  { %4724 = vmatmul.mubr.bf16.vlgmr.msra.gmra.mrb[56].mxu0 %v3052_v51  ;;  %v5051_v51 = vld [vmem:[%s6292_s20 + $0x4] ss:$8 sps:$4 sm:$0xff]  }
0x1c2f   :  { %4923 = vmatpush3.bf16.msra.mxu0 %v5792_v62  ;;  %4794 = vmatprep.mubr.msk.f32.mxu0 %vm5154_vm0, %v5153_v1 }
0x1c30   :  { %4924 = vmatprep.subr.bf16.mxu0 %v5161_v61 }
0x1c33   :  { %4926 = vmatpush3.bf16.msra.mxu0 %v5800_v4 }
0x1c34   :  { %4927 = vmatprep.subr.bf16.mxu0 %v5161_v61 }
0x1c37   :  { %4929 = vmatpush3.bf16.msra.mxu0 %v5812_v7 }
0x1c38   :  { %4930 = vmatprep.subr.bf16.mxu0 %v5161_v61 }
0x1c3b   :  { %4932 = vmatpush3.bf16.msra.mxu0 %v5826_v11 }
0x1c3c   :  { %4933 = vmatprep.subr.bf16.mxu0 %v5161_v61 }
0x1c3f   :  { %4935 = vmatpush3.bf16.msra.mxu0 %v5838_v16 }
0x1c40   :  { %4936 = vmatprep.subr.bf16.mxu0 %v5161_v61 }
0x1c43   :  { %4938 = vmatpush3.bf16.msra.mxu0 %v5850_v19 }
0x1c44   :  { %4939 = vmatprep.subr.bf16.mxu0 %v5161_v61 }
0x1c47   :  { %4941 = vmatpush3.bf16.msra.mxu0 %v5862_v23  ;;  %v4082_v23 = vld [vmem:[%s6291_s19 + $0x1] ss:$0 sm:$0xff] }
0x1c48   :  { %4942 = vmatprep.subr.bf16.mxu0 %v5161_v61 }
0x1c4b   :  { %4944 = vmatpush3.bf16.msra.mxu0 %v5873_v20 }
0x1c4c   :  { %4948 = vmatprep.subr.bf16.mxu0 %v5161_v61 }
0x1cdc   :  { %v3039_v62 = vpop.f32.mrb[44].mxu1 }
0x1cdd   :  { %v4705_v4 = vpop.f32.mrb[45].mxu1 }
0x1cde   :  { %v3042_v7 = vpop.f32.mrb[46].mxu1  ;;  %v5066_v4 = vld [vmem:[%s6292_s20 + $0x54] ss:$8 sps:$4 sm:$0xff]  }
0x1cdf   :  { %v4706_v11 = vpop.f32.mrb[47].mxu1 }
0x1ce0   :  { %v5069_v11 = vld [vmem:[%s6292_s20 + $0x64] ss:$8 sps:$4 sm:$0xff]  }
0x1ce1   :  { %v2950_v34 = vpop.f32.mrb[52].mxu0 }
0x1ce2   :  { %v3040_v16 = vadd.f32 %v3039_v62, %v2950_v34  ;;  %v4685_v26 = vpop.f32.mrb[53].mxu0  ;;  %v5061_v62 = vld [vmem:[%s6292_s20 + $0x40] ss:$8 sps:$4 sm:$0xff]  }
0x1ce3   :  { %v2953_v12 = vpop.f32.mrb[54].mxu0  ;;  %v5067_v34 = vld [vmem:[%s6292_s20 + $0x60] ss:$8 sps:$4 sm:$0xff]   ;;  %v5070_v26 = vld [vmem:[%s6292_s20 + $0x70] ss:$8 sps:$4 sm:$0xff]  }
0x1ce4   :  { %v3043_v45 = vadd.f32 %v3042_v7, %v2953_v12  ;;  %v4686_v19 = vpop.f32.mrb[55].mxu0  ;;  %v5064_v7 = vld [vmem:[%s6292_s20 + $0x50] ss:$8 sps:$4 sm:$0xff]  }
0x1d01   :  { %v3152_v46 = vpop.f32.mrb[56].mxu0 }
0x1d02   :  { %v3159_v49 = vadd.f32 %v3152_v46, %v3040_v16  ;;  %v4725_v50 = vpop.f32.mrb[57].mxu0  ;;  %v5072_v16 = vld [vmem:[%s6292_s20 + $0x74] ss:$8 sps:$4 sm:$0xff]  }
0x1d03   :  { %v3155_v20 = vpop.f32.mrb[58].mxu0 }
0x1d04   :  { %v6146_v35 = vadd.f32 %v4082_v23, %v3159_v49  ;;  %v3160_v61 = vadd.f32 %v3155_v20, %v3043_v45  ;;  %v4726_v36 = vpop.f32.mrb[59].mxu0 }
0x1d06   :  { %v6148_v37 = vadd.f32 %v4082_v23, %v3160_v61  ;;  %v3174_v38 = vmul.f32 %v6146_v35, %v6146_v35 }
0x1d08   :  { %v3167_v8 = vadd.f32 %v6148_v37, %v6146_v35  ;;  %v3175_v42 = vmul.f32 %v6148_v37, %v6148_v37 }
0x1d0a   :  { %v3168_v44 = vrot.slane %v3167_v8, 4  ;;  %v3176_v48 = vadd.f32 %v3175_v42, %v3174_v38 }
0x1d0c   :  { %v3169_v52 = vadd.f32 %v3168_v44, %v3167_v8  ;;  %v3177_v54 = vrot.slane %v3176_v48, 4 }
0x1d0e   :  { %v3170_v58 = vrot.slane %v3169_v52, 2  ;;  %v3178_v59 = vadd.f32 %v3177_v54, %v3176_v48 }
0x1d10   :  { %v3171_v60 = vadd.f32 %v3170_v58, %v3169_v52  ;;  %v3179_v3 = vrot.slane %v3178_v59, 2  ;;  %v3513_v58 = vld [vmem:[%s6293_s21] sm:$0x3] }
0x1d12   :  { %v3172_v2 = vrot.slane %v3171_v60, 1  ;;  %v3180_v9 = vadd.f32 %v3179_v3, %v3178_v59 }
0x1d14   :  { %v3173_v10 = vadd.f32 %v3172_v2, %v3171_v60  ;;  %v3181_v13 = vrot.slane %v3180_v9, 1 }
0x1d16   :  { %4760 = vmatmul.mubr.f32.vlgmr.msra.gmra.mrb[48].mxu1 %v3173_v10  ;;  %v3182_v15 = vadd.f32 %v3181_v13, %v3180_v9 }
0x1d17   :  { %4947 = vmatpush3.bf16.msra.mxu1 %v5596_v33  ;;  %4801 = vmatprep.mubr.msk.f32.mxu1 %vm5154_vm0, %v5153_v1 }
0x1d18   :  { %4795 = vmatmul.mubr.f32.vlgmr.msra.gmra.mrb[60].mxu0 %v3182_v15  ;;  %3605 = vmatprep.subr.bf16.mxu1 %v5051_v51 }
0x1d19   :  { %4950 = vmatpush3.bf16.msra.mxu0 %v5596_v33  ;;  %4808 = vmatprep.mubr.msk.f32.mxu0 %vm5154_vm0, %v5153_v1 }
0x1d1a   :  { %4811 = vmatprep.subr.bf16.mxu0 %v5153_v1 }
0x1de9   :  { %v3249_v14 = vpop.f32.mrb[48].mxu1 }
0x1dea   :  { %v3253_v18 = vmul.f32 0.0078125, %v3249_v14  ;;  %v4761_v21 = vpop.f32.mrb[49].mxu1 }
0x1deb   :  { %v3320_v22 = vpop.f32.mrb[60].mxu0 }
0x1dec   :  { %v3325_v24 = vmul.f32 %v3253_v18, %v3253_v18  ;;  %v3324_v25 = vmul.f32 0.0078125, %v3320_v22  ;;  %v4796_v27 = vpop.f32.mrb[61].mxu0  ;;  %4802 = vmatmul.mubr.msk.f32.vlgmr.msra.gmra.mrb[50].mxu1 %vm107_vm1, %v3253_v18 }
0x1ded   :  { %3637 = vmatprep.mubr.bf16.mxu1 %v5155_v5  ;;  %3606 = vmatpush1.bf16.msra.mxu1 %v5049_v53  ;;  %v5052_v5 = vld [vmem:[%s6292_s20 + $0x10] ss:$8 sps:$4 sm:$0xff]  }
0x1dee   :  { %v3326_v28 = vsub.f32 %v3324_v25, %v3325_v24  ;;  %3607 = vmatprep.subr.bf16.mxu1 %v5054_v55 }
0x1df0   :  { %v3327_v29 = vmax.f32 %v3326_v28, 0.0 }
0x1df1   :  { %3608 = vmatpush1.bf16.msra.mxu1 %v5052_v5 }
0x1df2   :  { %v3328_v43 = vadd.f32 1e-05, %v3327_v29  ;;  %3609 = vmatprep.subr.bf16.mxu1 %v5057_v63  ;;  %v5073_v29 = vld [vmem:[%s6294_s22] sm:$0xff]  }
0x1df4   :  { %5127 = vrsqrt.f32 %v3328_v43  ;;  %v5074_v43 = vld [vmem:[%s6294_s22 + $0x8] sm:$0xff]  }
0x1df5   :  { %3610 = vmatpush1.bf16.msra.mxu1 %v5055_v0 }
0x1df6   :  { %3611 = vmatprep.subr.bf16.mxu1 %v5060_v30 }
0x1df9   :  { %3612 = vmatpush1.bf16.msra.mxu1 %v5058_v31 }
0x1dfa   :  { %3613 = vmatprep.subr.bf16.mxu1 %v5063_v32 }
0x1dfd   :  { %3614 = vmatpush1.bf16.msra.mxu1 %v5061_v62 }
0x1dfe   :  { %v5128_v33 = vpop.eup %5127  ;;  %3615 = vmatprep.subr.bf16.mxu1 %v5066_v4 }
0x1dff   :  { %4809 = vmatmul.mubr.msk.f32.vlgmr.msra.gmra.mrb[62].mxu0 %vm107_vm1, %v5128_v33 }
0x1e00   :  { %4815 = vmatprep.mubr.msk.bf16.mxu0 %vm5154_vm0, %v5153_v1  ;;  %4812 = vmatpush3.bf16.msra.mxu0 %v5073_v29 }
0x1e01   :  { %3616 = vmatpush1.bf16.msra.mxu1 %v5064_v7  ;;  %4813 = vmatprep.subr.bf16.mxu0 %v5153_v1 }
0x1e02   :  { %3617 = vmatprep.subr.bf16.mxu1 %v5069_v11 }
0x1e04   :  { %4814 = vmatpush3.bf16.msra.mxu0 %v5074_v43 }
0x1e05   :  { %3618 = vmatpush1.bf16.msra.mxu1 %v5067_v34  ;;  %4819 = vmatprep.subr.bf16.mxu0 %v5153_v1 }
0x1e06   :  { %3619 = vmatprep.subr.bf16.mxu1 %v5072_v16 }
0x1e09   :  { %3620 = vmatpush1.bf16.msra.mxu1 %v5070_v26 }
0x1ebf   :  { %v3399_v12 = vpop.f32.mrb[50].mxu1 }
0x1ec0   :  { %v4803_v45 = vpop.f32.mrb[51].mxu1  ;;  %v3479_v19 = vrot.slane %v3399_v12, %v5965_v6 }
0x1ec2   :  { %v3480_v46 = vsub.f32 %v6146_v35, %v3479_v19  ;;  %v3481_v49 = vsub.f32 %v6148_v37, %v3479_v19 }
0x1ed2   :  { %v3472_v23 = vpop.f32.mrb[62].mxu0 }
0x1ed3   :  { %v3485_v50 = vrot.slane %v3472_v23, %v5965_v6  ;;  %v4810_v20 = vpop.f32.mrb[63].mxu0 }
0x1ed5   :  { %v3486_v61 = vmul.f32 %v3485_v50, %v3480_v46  ;;  %v3487_v36 = vmul.f32 %v3485_v50, %v3481_v49 }
0x1ed7   :  { %v3488_v38 = vmul.f32 %v3486_v61, %v6052_v17  ;;  %v3489_v8 = vmul.f32 %v6050_v39, %v3487_v36  ;;  %v3521_v17 = vsub.s32 1, %v5526_v47  ;;  %v3518_v39 = vrot.slane %v3513_v58, %v5965_v6  ;;  %v5075_v61 = vld [vmem:[%s6296_s24] sm:$0xff]   ;;  %v5076_v36 = vld [vmem:[%s6296_s24 + $0x8] sm:$0xff]   ;;  %s3838_s24 = sshll.u32 %s5162_s7, 4  ;;  %s3839_s24 = int_to_ptr.vmem [resolvable:$true] %s3838_s24 }
0x1ed8   :  { %p5134_p1 = scmp.lt.s32.totalorder %s3839_s24, %s3839_s24 }
0x1ed9   :  { %v3490_v42 = vadd.f32 %v3488_v38, %v6056_v41  ;;  %v3491_v44 = vadd.f32 %v6054_v40, %v3489_v8  ;;  %v3522_v59 = vrot.slane %v3513_v58, %v3521_v17  ;;  %v4101_v38 = vld [vmem:[%s6295_s23] ss:$0 sm:$0xff]  ;;  %s5129_s23 = scalar_lea.vmem %s3839_s24, 32 }
0x1eda   :  { %p5130_p0 = scmp.ne.s32.totalorder %s3839_s24, %s5129_s23  ;;  %p5135_p2 = scmp.lt.s32.totalorder %s5129_s23, %s5129_s23 }
0x1edb   :  { %v3492_v48 = vmax.f32 %v3490_v42, 0.0  ;;  %v3493_v52 = vmax.f32 %v3491_v44, 0.0 }
0x1edc   :  { %p5136_p3 = por %p5135_p2, %p5134_p1 }
0x1edd   :  { %v3494_v54 = vadd.f32 %v3492_v48, %v5996_v57  ;;  %v3495_v35 = vadd.f32 %v3493_v52, %v6000_v56 }
0x1ede   :  { %p5137_p4 = pnand %p5136_p3, %p5130_p0 }
0x1edf   :  { %v3496_v37 = vpack.c.bf16 %v3495_v35, %v3494_v54 }
0x1ee1   :  { %3638 = vmatmul.mubr.bf16.vlgmr.msra.gmra.mrb[52].mxu1 %v3496_v37 }
0x1fb4   :  { %v3639_v41 = vpop.f32.mrb[52].mxu1 }
0x1fb5   :  { %v3640_v60 = vadd.f32 %v3639_v41, %v3518_v39  ;;  %v3641_v40 = vpop.f32.mrb[53].mxu1 }
0x1fb6   :  { %v3642_v3 = vadd.f32 %v3641_v40, %v3522_v59  ;;  %v3643_v2 = vpop.f32.mrb[54].mxu1 }
0x1fb7   :  { %v3648_v9 = vmax.f32 %v3640_v60, 0.0  ;;  %v3644_v57 = vadd.f32 %v3643_v2, %v3518_v39  ;;  %v3645_v10 = vpop.f32.mrb[55].mxu1 }
0x1fb8   :  { %v3649_v56 = vmax.f32 %v3642_v3, 0.0  ;;  %v3646_v13 = vadd.f32 %v3645_v10, %v3522_v59 }
0x1fb9   :  { %v3650_v15 = vmax.f32 %v3644_v57, 0.0 }
0x1fba   :  { %v3652_v14 = vmax.f32 %v3648_v9, %v3649_v56  ;;  %v3651_v18 = vmax.f32 %v3646_v13, 0.0 }
0x1fbc   :  { %v3653_v21 = vmax.f32 %v3650_v15, %v3651_v18 }
0x1fbe   :  { %v4963_v22 = vpack.i.bf16 %v3653_v21, %v3652_v14 }
0x1fc0   :  { %4964 = vrot.lane.b32.xlu0 %v4963_v22, %s5156_s4 }
0x2032   :  { %v4965_v47 = vpop.permute.xlu0 %4964 }
0x2033   :  { %v4967_v6 = vunpack.i.h.bf16 %v4965_v47  ;;  %v4966_v24 = vunpack.i.l.bf16 %v4965_v47 }
0x2035   :  { %v3663_v25 = vmax.f32 %v3653_v21, %v4967_v6  ;;  %v3662_v27 = vmax.f32 %v3652_v14, %v4966_v24 }
0x2037   :  { %v4968_v28 = vpack.i.bf16 %v3663_v25, %v3662_v27 }
0x2039   :  { %4969 = vrot.lane.b32.xlu1 %v4968_v28, %s5157_s29 }
0x20ab   :  { %v4970_v33 = vpop.permute.xlu1 %4969 }
0x20ac   :  { %v4972_v51 = vunpack.i.h.bf16 %v4970_v33  ;;  %v4971_v53 = vunpack.i.l.bf16 %v4970_v33 }
0x20ae   :  { %v3673_v5 = vmax.f32 %v3663_v25, %v4972_v51  ;;  %v3672_v55 = vmax.f32 %v3662_v27, %v4971_v53 }
0x20b0   :  { %v3681_v63 = vsel %vm175_vm2, %v3673_v5, -inf  ;;  %v3674_v0 = vsel %vm175_vm2, %v3672_v55, -inf }
0x20b1   :  { %v3682_v30 = vrot.slane %v3681_v63, 4  ;;  %v3675_v31 = vrot.slane %v3674_v0, 4 }
0x20b3   :  { %v3683_v32 = vmax.f32 %v3681_v63, %v3682_v30  ;;  %v3676_v62 = vmax.f32 %v3674_v0, %v3675_v31 }
0x20b5   :  { %v3684_v4 = vrot.slane %v3683_v32, 2  ;;  %v3677_v7 = vrot.slane %v3676_v62, 2 }
0x20b7   :  { %v3685_v11 = vmax.f32 %v3683_v32, %v3684_v4  ;;  %v3678_v34 = vmax.f32 %v3676_v62, %v3677_v7 }
0x20b9   :  { %v3686_v16 = vrot.slane %v3685_v11, 1  ;;  %v3679_v26 = vrot.slane %v3678_v34, 1 }
0x20bb   :  { %v3687_v12 = vmax.f32 %v3685_v11, %v3686_v16  ;;  %v3680_v45 = vmax.f32 %v3678_v34, %v3679_v26 }
0x20bd   :  { %v3689_v19 = vpack.c.bf16 %v3687_v12, %v3687_v12  ;;  %v3688_v23 = vpack.c.bf16 %v3680_v45, %v3680_v45 }
0x20bf   :  { %v3704_v46 = vunpack.c.l.b16 %v3689_v19  ;;  %v3703_v49 = vunpack.c.l.b16 %v3688_v23 }
0x20c1   :  { %v3706_v50 = vsel %vm3705_vm7, %v3704_v46, %v3703_v49 }
0x20c2   :  { %v3707_v20 = vpack.c.b16 %v3706_v50, %v3706_v50 }
0x20c4   :  { %4816 = vmatmul.mubr.msk.bf16.vlgmr.msra.gmra.mrb[64].mxu0 %vm175_vm2, %v3707_v20 }
0x20c5   :  { %4823 = vmatprep.mubr.msk.bf16.mxu0 %vm5154_vm0, %v5153_v1  ;;  %4820 = vmatpush3.bf16.msra.mxu0 %v5075_v61 }
0x20c6   :  { %4821 = vmatprep.subr.bf16.mxu0 %v5153_v1  ;;  %v4105_v1 = vld [vmem:[%s6297_s25] ss:$0 sm:$0xff] }
0x20c9   :  { %4822 = vmatpush3.bf16.msra.mxu0 %v5076_v36 }
0x2197   :  { %v3757_v8 = vpop.f32.mrb[64].mxu0 }
0x2198   :  { %v3758_v42 = vadd.f32 %v4101_v38, %v3757_v8  ;;  %v4817_v44 = vpop.f32.mrb[65].mxu0 }
0x2199   :  { %v3760_v48 = vpop.f32.mrb[66].mxu0 }
0x219a   :  { %v3763_v52 = vmax.f32 %v3758_v42, 0.0  ;;  %v4818_v54 = vpop.f32.mrb[67].mxu0 }
0x219c   :  { %v3764_v35 = vpack.c.bf16 %v3763_v52, %v3763_v52 }
0x219e   :  { %4824 = vmatmul.mubr.msk.bf16.vlgmr.msra.gmra.mrb[68].mxu0 %vm175_vm2, %v3764_v35 }
0x2271   :  { %v3825_v37 = vpop.f32.mrb[68].mxu0 }
0x2272   :  { %v3826_v58 = vadd.f32 %v4105_v1, %v3825_v37  ;;  %v4825_v17 = vpop.f32.mrb[69].mxu0 }
0x2273   :  { %v3828_v39 = vpop.f32.mrb[70].mxu0 }
0x2274   :  { %3831 = vst [vmem:[#allocation2] sm:$0x3] %v3826_v58  ;;  %v4826_v59 = vpop.f32.mrb[71].mxu0 }
0x2275   :  { %5140 = shalt.err (!%p5137_p4)
}
0x2276   :  { %s5141_s25 = scalar_lea.hbm %s6298_s26, 32 }
0x2277   :  { %p5142_p5 = scmp.ne.s32.totalorder %s6298_s26, %s5141_s25  ;;  %p5145_p6 = scmp.lt.u32.totalorder %s5141_s25, %s6298_s26 }
0x2279   :  { %p5147_p7 = pnand %p5145_p6, %p5142_p5 }
0x227b   :  { %5150 = shalt.err (!%p5147_p7)
}
0x227c   :  { %3841 = dma.vmem_to_hbm [thread:$0]  %s3839_s24, 32, %s6298_s26, [#allocation3]  }
0x227d   :  { %5151 = dma.done.wait [#allocation3], 32  }
0x227e   :  { %5152 = vsyncadd [#allocation3], 4294967264 }
0x227f   :  { %3845 = vsyncpa [#allocation3], 1 }

</bundles_post_ra>
